<compile_context>
chip_gen: v7x
topology: tpu7x:2x2x1
jax: 0.10.0
libtpu: 0.0.40
codegen_flags: <defaults>
</compile_context>

<pallas_src>
import functools

import jax
import jax.numpy as jnp
import numpy as np
from jax.experimental import pallas as pl
from jax.experimental.pallas import tpu as pltpu


# ----------------------------------------------------------------------------
# One-time probe of pltpu.roll's shift convention (and availability).
# Returns +1 if pltpu.roll(x, s) == jnp.roll(x, s), -1 if reversed, 0 if the
# rotate fails to lower (then the kernel falls back to slice+concat shifts).
# ----------------------------------------------------------------------------
@functools.lru_cache(maxsize=None)
def _pltpu_roll_sign():
    def probe(x_ref, o_ref):
        o_ref[...] = pltpu.roll(x_ref[...], 1, axis=1)

    try:
        x = jnp.arange(8 * 128, dtype=jnp.float32).reshape(8, 128)
        y = pl.pallas_call(
            probe, out_shape=jax.ShapeDtypeStruct((8, 128), jnp.float32))(x)
        if bool(jnp.array_equal(y, jnp.roll(x, 1, axis=1))):
            return 1
        if bool(jnp.array_equal(y, jnp.roll(x, -1, axis=1))):
            return -1
        return 0
    except Exception:
        return 0


def _derive_vmem_limit(per_step_bytes):
    try:
        cap = int(pltpu.get_tpu_info().vmem_capacity_bytes)
    except Exception:
        cap = 64 * 1024 * 1024        # conservative: v7x per-core VMEM
    want = max(32 * 1024 * 1024, 2 * int(per_step_bytes))
    return int(min(want, (cap * 9) // 10))


# ----------------------------------------------------------------------------
# In-kernel helpers.
# ----------------------------------------------------------------------------
def _shift_lanes(h, jnp_shift, roll_sign, keep_mask):
    """jnp.roll(h, jnp_shift, axis=1) with zero fill (not wrap) at the edge."""
    C, L = h.shape
    if roll_sign == 0:                      # fallback: slice + concat
        z = jnp.zeros((C, 1), h.dtype)
        if jnp_shift == 1:                  # y[l] = h[l-1]
            return jnp.concatenate([z, h[:, :L - 1]], axis=1)
        return jnp.concatenate([h[:, 1:], z], axis=1)
    y = pltpu.roll(h, (jnp_shift * roll_sign) % L, axis=1)   # XLU rotate
    return jnp.where(keep_mask, y, jnp.zeros((), h.dtype))


def _gn_silu_conv3(x, A, gamma, beta, w, bias, not_first, not_last,
                   roll_sign, stacked, cdt, eps):
    """GroupNorm -> SiLU -> Conv1d(k=3, pad=1) on one (C, L) tile.

    A is the (C, C) group-averaging matrix (1/(group_size*L) on same-group
    entries). w is either (C, 3C) tap-major (stacked path) or (3, C, C)
    (accumulated path), already in the matmul compute dtype.
    """
    # Fused one-pass GroupNorm statistics: one (C,C)@(C,2) MXU matmul (f32).
    sums = jnp.concatenate([jnp.sum(x, axis=1, keepdims=True),
                            jnp.sum(x * x, axis=1, keepdims=True)], axis=1)
    stats = jnp.dot(A, sums, preferred_element_type=jnp.float32)        # (C,2)
    mean = stats[:, 0:1]
    var = stats[:, 1:2] - mean * mean
    xn = (x - mean) * jax.lax.rsqrt(var + eps) * gamma + beta
    h = xn * jax.nn.sigmoid(xn)                                         # SiLU

    hb = h.astype(cdt)
    h_m1 = _shift_lanes(hb, 1, roll_sign, not_first)                    # h[l-1]
    h_p1 = _shift_lanes(hb, -1, roll_sign, not_last)                    # h[l+1]

    if stacked:
        hstack = jnp.concatenate([h_m1, hb, h_p1], axis=0)              # (3C,L)
        out = jnp.dot(w, hstack, preferred_element_type=jnp.float32)
    else:
        out = jnp.dot(w[0], h_m1, preferred_element_type=jnp.float32)
        out = out + jnp.dot(w[1], hb, preferred_element_type=jnp.float32)
        out = out + jnp.dot(w[2], h_p1, preferred_element_type=jnp.float32)
    return out + bias


def _fused_block_kernel(*refs, num_layers, n_q, stack_ds, stack_conv,
                        roll_sign, eps):
    xs_ref, a_ref, dw_ref, db_ref = refs[:4]
    layer_refs = refs[4:4 + 8 * num_layers]
    o_ref = refs[4 + 8 * num_layers]

    l_out = o_ref.shape[-1]
    cdt = xs_ref.dtype
    A = a_ref[...]                                   # (C, C) f32

    # --- Downsample1d: strided conv as matmul(s) over space-to-depth taps ---
    xs = xs_ref[0]                                   # (C_in*factor, n_blk)
    if stack_ds:
        cols = jnp.concatenate([xs[:, q:q + l_out] for q in range(n_q)], axis=0)
        x = jnp.dot(dw_ref[...], cols, preferred_element_type=jnp.float32)
    else:
        dw = dw_ref[...]                             # (n_q, C, C_in*factor)
        x = jnp.dot(dw[0], xs[:, :l_out], preferred_element_type=jnp.float32)
        for q in range(1, n_q):
            x = x + jnp.dot(dw[q], xs[:, q:q + l_out],
                            preferred_element_type=jnp.float32)
    x = x + db_ref[...]                              # (C, l_out), f32

    # Edge masks for the k=3 taps (hoisted out of the layer loop).
    lane = jax.lax.broadcasted_iota(jnp.int32, (1, l_out), 1)
    not_first = lane > 0
    not_last = lane < l_out - 1

    # --- ResnetBlock1d x num_layers, everything stays in VMEM/vregs ---------
    for i in range(num_layers):
        g1, be1, w1, cb1, g2, be2, w2, cb2 = layer_refs[8 * i:8 * (i + 1)]
        h = _gn_silu_conv3(x, A, g1[...], be1[...], w1[...], cb1[...],
                           not_first, not_last, roll_sign, stack_conv, cdt, eps)
        h = _gn_silu_conv3(h, A, g2[...], be2[...], w2[...], cb2[...],
                           not_first, not_last, roll_sign, stack_conv, cdt, eps)
        x = x + h                                    # identity skip

    o_ref[0] = x.astype(o_ref.dtype)


# ----------------------------------------------------------------------------
# Wrapper: space-to-depth relayout + weight flattening in XLA, one pallas_call.
# ----------------------------------------------------------------------------
def downsample_block1d(x, params, *, factor, num_groups, kernel_multiplier=2,
                       eps=1e-5, compute_dtype=jnp.bfloat16,
                       stack_threshold=256):
    assert kernel_multiplier % 2 == 0
    B, c_in, L = x.shape
    f = factor
    down_w = params["down_w"]                        # (C, c_in, K)
    down_b = params["down_b"]                        # (C,)
    C, _, K = down_w.shape
    assert K == f * kernel_multiplier + 1
    assert C % num_groups == 0
    num_layers = len(params["blocks"])

    pad_l = f * (kernel_multiplier // 2)
    l_out = (L - 1) // f + 1                         # conv output length
    n_q = -(-K // f)                                 # taps per phase (= km + 1)
    n_blk = l_out + n_q - 1
    L_blk = n_blk * f
    right = L_blk - pad_l - L
    assert right >= 0

    # Space-to-depth: (B, c_in, L_blk) -> (B, c_in*f, n_blk); same byte count
    # as the raw (padded) input, so no K*C_in im2col blowup in HBM.
    x_pad = jnp.pad(x, ((0, 0), (0, 0), (pad_l, right)))
    xs = (x_pad.reshape(B, c_in, n_blk, f)
               .transpose(0, 1, 3, 2)
               .reshape(B, c_in * f, n_blk)
               .astype(compute_dtype))

    # Downsample weight regrouped per phase: W[q, o, c*f + r] = w[o, c, q*f+r].
    dw_pad = jnp.pad(down_w.astype(jnp.float32),
                     ((0, 0), (0, 0), (0, n_q * f - K)))
    dw_qcr = (dw_pad.reshape(C, c_in, n_q, f)
                    .transpose(2, 0, 1, 3)
                    .reshape(n_q, C, c_in * f))
    stack_ds = (n_q * c_in * f) <= stack_threshold
    if stack_ds:
        dw_arg = jnp.transpose(dw_qcr, (1, 0, 2)).reshape(C, n_q * c_in * f)
    else:
        dw_arg = dw_qcr
    dw_arg = dw_arg.astype(compute_dtype)
    db_arg = down_b.reshape(C, 1).astype(jnp.float32)

    # Group-averaging matrix shared by every GroupNorm (C channels, l_out len).
    gs = C // num_groups
    gid = np.arange(C) // gs
    A = jnp.asarray((gid[:, None] == gid[None, :]).astype(np.float32)
                    / float(gs * l_out))

    # Per-layer parameters (weights pre-cast; layout chosen per conv path).
    stack_conv = (3 * C) <= stack_threshold
    layer_args = []
    for p in params["blocks"]:
        for (g, be, w, b) in ((p["gn1_g"], p["gn1_b"], p["w1"], p["b1"]),
                              (p["gn2_g"], p["gn2_b"], p["w2"], p["b2"])):
            if stack_conv:
                w_arg = jnp.transpose(w, (0, 2, 1)).reshape(C, 3 * C)
            else:
                w_arg = jnp.transpose(w, (2, 0, 1))          # (3, C, C)
            layer_args += [g.reshape(C, 1).astype(jnp.float32),
                           be.reshape(C, 1).astype(jnp.float32),
                           w_arg.astype(compute_dtype),
                           b.reshape(C, 1).astype(jnp.float32)]

    # VMEM budget derived from the actual tile sizes (not hard-coded).
    isz_c = jnp.dtype(compute_dtype).itemsize
    xs_block = c_in * f * n_blk * isz_c
    out_block = C * l_out * jnp.dtype(x.dtype).itemsize
    const_bytes = (A.size * 4 + dw_arg.size * isz_c + db_arg.size * 4
                   + sum(int(a.size) * a.dtype.itemsize for a in layer_args))
    temp_bytes = 8 * C * l_out * 4 + n_q * c_in * f * l_out * isz_c
    vmem_limit = _derive_vmem_limit(2 * xs_block + 2 * out_block
                                    + const_bytes + temp_bytes)

    roll_sign = _pltpu_roll_sign()
    kernel = functools.partial(
        _fused_block_kernel, num_layers=num_layers, n_q=n_q,
        stack_ds=stack_ds, stack_conv=stack_conv, roll_sign=roll_sign, eps=eps)

    def build(use_buffered):
        kw = dict(pipeline_mode=pl.Buffered(1)) if use_buffered else {}

        def cspec(arr):
            return pl.BlockSpec(arr.shape,
                                lambda b, nd=arr.ndim: (0,) * nd, **kw)

        in_specs = ([pl.BlockSpec((1, c_in * f, n_blk), lambda b: (b, 0, 0)),
                     cspec(A), cspec(dw_arg), cspec(db_arg)]
                    + [cspec(a) for a in layer_args])
        return pl.pallas_call(
            kernel,
            out_shape=jax.ShapeDtypeStruct((B, C, l_out), x.dtype),
            grid=(B,),
            in_specs=in_specs,
            out_specs=pl.BlockSpec((1, C, l_out), lambda b: (b, 0, 0)),
            compiler_params=pltpu.CompilerParams(
                dimension_semantics=("parallel",),
                vmem_limit_bytes=vmem_limit))

    args = (xs, A, dw_arg, db_arg, *layer_args)
    try:
        return build(True)(*args)
    except Exception:
        # TODO(synk): drop this fallback once pl.Buffered(1) on constant blocks
        # is confirmed on the deployed Pallas/Mosaic version.
        return build(False)(*args)


# ----------------------------------------------------------------------------
# Pure-JAX reference (correctness check only, f32 everywhere).
# ----------------------------------------------------------------------------
def _conv1d_ref(x, w, b, stride, padding):
    out = jax.lax.conv_general_dilated(
        x, w, window_strides=(stride,), padding=[(padding, padding)],
        dimension_numbers=("NCH", "OIH", "NCH"))
    return out + b[None, :, None]


def _group_norm_ref(x, g, b, num_groups, eps=1e-5):
    B, C, L = x.shape
    xg = x.reshape(B, num_groups, -1)
    mean = xg.mean(-1, keepdims=True)
    var = ((xg - mean) ** 2).mean(-1, keepdims=True)
    xn = ((xg - mean) * jax.lax.rsqrt(var + eps)).reshape(B, C, L)
    return xn * g[None, :, None] + b[None, :, None]


def _ref_forward(x, params, *, factor, num_groups, kernel_multiplier=2):
    silu = lambda v: v * jax.nn.sigmoid(v)
    pad = factor * (kernel_multiplier // 2)
    x = _conv1d_ref(x, params["down_w"], params["down_b"], stride=factor,
                    padding=pad)
    for p in params["blocks"]:
        h = _conv1d_ref(silu(_group_norm_ref(x, p["gn1_g"], p["gn1_b"],
                                             num_groups)),
                        p["w1"], p["b1"], stride=1, padding=1)
        h = _conv1d_ref(silu(_group_norm_ref(h, p["gn2_g"], p["gn2_b"],
                                             num_groups)),
                        p["w2"], p["b2"], stride=1, padding=1)
        x = h + x
    return x


# ----------------------------------------------------------------------------
# Deterministic synthetic parameters (PyTorch-style uniform conv init).
# ----------------------------------------------------------------------------
def _init_params(key, in_channels, out_channels, factor, num_layers,
                 kernel_multiplier=2):
    keys = iter(jax.random.split(key, 1 + 4 * num_layers))

    def conv_init(k, c_out, c_in, ksize):
        bound = 1.0 / np.sqrt(c_in * ksize)
        kw, kb = jax.random.split(k)
        w = jax.random.uniform(kw, (c_out, c_in, ksize), jnp.float32,
                               -bound, bound)
        b = jax.random.uniform(kb, (c_out,), jnp.float32, -bound, bound)
        return w, b

    K = factor * kernel_multiplier + 1
    down_w, down_b = conv_init(next(keys), out_channels, in_channels, K)

    blocks = []
    C = out_channels
    for _ in range(num_layers):
        w1, b1 = conv_init(next(keys), C, C, 3)
        w2, b2 = conv_init(next(keys), C, C, 3)
        kg1, kg2 = jax.random.split(next(keys))
        kh1, kh2 = jax.random.split(next(keys))
        blocks.append(dict(
            gn1_g=jax.random.uniform(kg1, (C,), jnp.float32, 0.6, 1.4),
            gn1_b=jax.random.uniform(kg2, (C,), jnp.float32, -0.3, 0.3),
            w1=w1, b1=b1,
            gn2_g=jax.random.uniform(kh1, (C,), jnp.float32, 0.6, 1.4),
            gn2_b=jax.random.uniform(kh2, (C,), jnp.float32, -0.3, 0.3),
            w2=w2, b2=b2))
    return dict(down_w=down_w, down_b=down_b, blocks=blocks)


if __name__ == "__main__":
    # (config, compute_dtype, atol, rtol). The f32 run checks exact kernel
    # logic tightly; the bf16 runs exercise the MXU fast path (looser tolerance
    # because bf16 operand rounding accumulates across 5 convs + 4 GroupNorms).
    runs = [
        # stacked matmul paths (small C), 2 resnet layers
        (dict(B=2, c_in=8, c_out=16, factor=2, groups=4, layers=2, L=256),
         jnp.float32, 2e-3, 2e-3),
        (dict(B=2, c_in=8, c_out=16, factor=2, groups=4, layers=2, L=256),
         jnp.bfloat16, 8e-2, 5e-2),
        # accumulated-dot paths (3*C > 256), 1 resnet layer
        (dict(B=2, c_in=48, c_out=96, factor=2, groups=4, layers=1, L=256),
         jnp.bfloat16, 8e-2, 5e-2),
    ]

    key = jax.random.PRNGKey(0)
    for cfg, cdt, atol, rtol in runs:
        key, kx, kp = jax.random.split(key, 3)
        x = jax.random.normal(kx, (cfg["B"], cfg["c_in"], cfg["L"]),
                              jnp.float32)
        params = _init_params(kp, cfg["c_in"], cfg["c_out"], cfg["factor"],
                              cfg["layers"])

        out = downsample_block1d(x, params, factor=cfg["factor"],
                                 num_groups=cfg["groups"], compute_dtype=cdt)
        out = jax.block_until_ready(out)

        ref = _ref_forward(x, params, factor=cfg["factor"],
                           num_groups=cfg["groups"])
        np.testing.assert_allclose(np.asarray(out), np.asarray(ref),
                                   atol=atol, rtol=rtol)
        assert out.shape == (cfg["B"], cfg["c_out"],
                             cfg["L"] // cfg["factor"])

    print("KERNEL_OK")
</pallas_src>

<mosaic_0001>
module attributes {stable_mosaic.version = 11 : i64} {
  func.func @probe(%arg0: memref<8x128xf32, #tpu.memory_space<vmem>>, %arg1: memref<8x128xf32, #tpu.memory_space<vmem>>) attributes {dimension_semantics = [], scalar_prefetch = 0 : i64, scratch_operands = 0 : i64, tpu.core_type = #tpu.core_type<tc>} {
    %c0 = arith.constant 0 : index
    %c0_0 = arith.constant 0 : index
    %0 = vector.load %arg0[%c0, %c0_0] : memref<8x128xf32, #tpu.memory_space<vmem>>, vector<8x128xf32>
    %c1_i32 = arith.constant 1 : i32
    %1 = tpu.dynamic_rotate %0 by %c1_i32 dim 1 : vector<8x128xf32>, i32 -> vector<8x128xf32>
    %c0_1 = arith.constant 0 : index
    %c0_2 = arith.constant 0 : index
    %2 = vector.load %arg1[%c0_1, %c0_2] : memref<8x128xf32, #tpu.memory_space<vmem>>, vector<8x128xf32>
    tpu.vector_store %arg1[%c0_1, %c0_2], %1 {strides = array<i32>} : memref<8x128xf32, #tpu.memory_space<vmem>>, vector<8x128xf32>,
    return
  }
}

module attributes {stable_mosaic.version = 11 : i64} {
  func.func @_fused_block_kernel(%arg0: i32, %arg1: memref<1x16x130xf32, #tpu.memory_space<vmem>>, %arg2: memref<16x16xf32, #tpu.memory_space<vmem>>, %arg3: memref<16x48xf32, #tpu.memory_space<vmem>>, %arg4: memref<16x1xf32, #tpu.memory_space<vmem>>, %arg5: memref<16x1xf32, #tpu.memory_space<vmem>>, %arg6: memref<16x1xf32, #tpu.memory_space<vmem>>, %arg7: memref<16x48xf32, #tpu.memory_space<vmem>>, %arg8: memref<16x1xf32, #tpu.memory_space<vmem>>, %arg9: memref<16x1xf32, #tpu.memory_space<vmem>>, %arg10: memref<16x1xf32, #tpu.memory_space<vmem>>, %arg11: memref<16x48xf32, #tpu.memory_space<vmem>>, %arg12: memref<16x1xf32, #tpu.memory_space<vmem>>, %arg13: memref<16x1xf32, #tpu.memory_space<vmem>>, %arg14: memref<16x1xf32, #tpu.memory_space<vmem>>, %arg15: memref<16x48xf32, #tpu.memory_space<vmem>>, %arg16: memref<16x1xf32, #tpu.memory_space<vmem>>, %arg17: memref<16x1xf32, #tpu.memory_space<vmem>>, %arg18: memref<16x1xf32, #tpu.memory_space<vmem>>, %arg19: memref<16x48xf32, #tpu.memory_space<vmem>>, %arg20: memref<16x1xf32, #tpu.memory_space<vmem>>, %arg21: memref<1x16x128xf32, #tpu.memory_space<vmem>>) attributes {dimension_semantics = [#tpu.dimension_semantics<parallel>], iteration_bounds = array<i64: 2>, scalar_prefetch = 0 : i64, scratch_operands = 0 : i64, tpu.core_type = #tpu.core_type<tc>, window_params = [{transform_indices = @transform_0, window_bounds = array<i64: 1, 16, 130>}, {pipeline_mode = #tpu.pipeline_mode<synchronous>, transform_indices = @transform_1, window_bounds = array<i64: 16, 16>}, {pipeline_mode = #tpu.pipeline_mode<synchronous>, transform_indices = @transform_2, window_bounds = array<i64: 16, 48>}, {pipeline_mode = #tpu.pipeline_mode<synchronous>, transform_indices = @transform_3, window_bounds = array<i64: 16, 1>}, {pipeline_mode = #tpu.pipeline_mode<synchronous>, transform_indices = @transform_4, window_bounds = array<i64: 16, 1>}, {pipeline_mode = #tpu.pipeline_mode<synchronous>, transform_indices = @transform_5, window_bounds = array<i64: 16, 1>}, {pipeline_mode = #tpu.pipeline_mode<synchronous>, transform_indices = @transform_6, window_bounds = array<i64: 16, 48>}, {pipeline_mode = #tpu.pipeline_mode<synchronous>, transform_indices = @transform_7, window_bounds = array<i64: 16, 1>}, {pipeline_mode = #tpu.pipeline_mode<synchronous>, transform_indices = @transform_8, window_bounds = array<i64: 16, 1>}, {pipeline_mode = #tpu.pipeline_mode<synchronous>, transform_indices = @transform_9, window_bounds = array<i64: 16, 1>}, {pipeline_mode = #tpu.pipeline_mode<synchronous>, transform_indices = @transform_10, window_bounds = array<i64: 16, 48>}, {pipeline_mode = #tpu.pipeline_mode<synchronous>, transform_indices = @transform_11, window_bounds = array<i64: 16, 1>}, {pipeline_mode = #tpu.pipeline_mode<synchronous>, transform_indices = @transform_12, window_bounds = array<i64: 16, 1>}, {pipeline_mode = #tpu.pipeline_mode<synchronous>, transform_indices = @transform_13, window_bounds = array<i64: 16, 1>}, {pipeline_mode = #tpu.pipeline_mode<synchronous>, transform_indices = @transform_14, window_bounds = array<i64: 16, 48>}, {pipeline_mode = #tpu.pipeline_mode<synchronous>, transform_indices = @transform_15, window_bounds = array<i64: 16, 1>}, {pipeline_mode = #tpu.pipeline_mode<synchronous>, transform_indices = @transform_16, window_bounds = array<i64: 16, 1>}, {pipeline_mode = #tpu.pipeline_mode<synchronous>, transform_indices = @transform_17, window_bounds = array<i64: 16, 1>}, {pipeline_mode = #tpu.pipeline_mode<synchronous>, transform_indices = @transform_18, window_bounds = array<i64: 16, 48>}, {pipeline_mode = #tpu.pipeline_mode<synchronous>, transform_indices = @transform_19, window_bounds = array<i64: 16, 1>}, {transform_indices = @transform_20, window_bounds = array<i64: 1, 16, 128>}]} {
    %c0 = arith.constant 0 : index
    %c0_0 = arith.constant 0 : index
    %0 = vector.load %arg2[%c0, %c0_0] : memref<16x16xf32, #tpu.memory_space<vmem>>, vector<16x16xf32>
    %c0_1 = arith.constant 0 : index
    %c0_2 = arith.constant 0 : index
    %c0_3 = arith.constant 0 : index
    %1 = vector.load %arg1[%c0_1, %c0_2, %c0_3] : memref<1x16x130xf32, #tpu.memory_space<vmem>>, vector<1x16x130xf32>
    %2 = vector.shape_cast %1 : vector<1x16x130xf32> to vector<16x130xf32>
    %3 = vector.extract_strided_slice %2 {offsets = [0, 0], sizes = [16, 128], strides = [1, 1]} : vector<16x130xf32> to vector<16x128xf32>
    %4 = vector.extract_strided_slice %2 {offsets = [0, 1], sizes = [16, 128], strides = [1, 1]} : vector<16x130xf32> to vector<16x128xf32>
    %5 = vector.extract_strided_slice %2 {offsets = [0, 2], sizes = [16, 128], strides = [1, 1]} : vector<16x130xf32> to vector<16x128xf32>
    %6 = tpu.concatenate %3, %4, %5 in 0 : vector<16x128xf32>, vector<16x128xf32>, vector<16x128xf32> -> vector<48x128xf32>
    %c0_4 = arith.constant 0 : index
    %c0_5 = arith.constant 0 : index
    %7 = vector.load %arg3[%c0_4, %c0_5] : memref<16x48xf32, #tpu.memory_space<vmem>>, vector<16x48xf32>
    %cst = arith.constant dense<0.000000e+00> : vector<16x128xf32>
    %8 = tpu.matmul %7, %6, %cst {dimension_numbers = #tpu.dot_dimension_numbers<[1], [0], [0], [1], [0, 0, 1, 1], [], []>} : vector<16x48xf32>, vector<48x128xf32>, vector<16x128xf32> -> vector<16x128xf32>
    %c0_6 = arith.constant 0 : index
    %c0_7 = arith.constant 0 : index
    %9 = vector.load %arg4[%c0_6, %c0_7] : memref<16x1xf32, #tpu.memory_space<vmem>>, vector<16x1xf32>
    %10 = vector.broadcast %9 : vector<16x1xf32> to vector<16x128xf32>
    %11 = arith.addf %8, %10 : vector<16x128xf32>
    %c0_8 = arith.constant 0 : index
    %c0_9 = arith.constant 0 : index
    %12 = vector.load %arg5[%c0_8, %c0_9] : memref<16x1xf32, #tpu.memory_space<vmem>>, vector<16x1xf32>
    %c0_10 = arith.constant 0 : index
    %c0_11 = arith.constant 0 : index
    %13 = vector.load %arg6[%c0_10, %c0_11] : memref<16x1xf32, #tpu.memory_space<vmem>>, vector<16x1xf32>
    %c0_12 = arith.constant 0 : index
    %c0_13 = arith.constant 0 : index
    %14 = vector.load %arg7[%c0_12, %c0_13] : memref<16x48xf32, #tpu.memory_space<vmem>>, vector<16x48xf32>
    %c0_14 = arith.constant 0 : index
    %c0_15 = arith.constant 0 : index
    %15 = vector.load %arg8[%c0_14, %c0_15] : memref<16x1xf32, #tpu.memory_space<vmem>>, vector<16x1xf32>
    %cst_16 = arith.constant dense<0.000000e+00> : vector<16xf32>
    %16 = vector.multi_reduction <add>, %11, %cst_16 [1] : vector<16x128xf32> to vector<16xf32>
    %17 = vector.shape_cast %16 : vector<16xf32> to vector<16x1xf32>
    %18 = arith.mulf %11, %11 : vector<16x128xf32>
    %cst_17 = arith.constant dense<0.000000e+00> : vector<16xf32>
    %19 = vector.multi_reduction <add>, %18, %cst_17 [1] : vector<16x128xf32> to vector<16xf32>
    %20 = vector.shape_cast %19 : vector<16xf32> to vector<16x1xf32>
    %21 = tpu.concatenate %17, %20 in 1 : vector<16x1xf32>, vector<16x1xf32> -> vector<16x2xf32>
    %cst_18 = arith.constant dense<0.000000e+00> : vector<16x2xf32>
    %22 = tpu.matmul %0, %21, %cst_18 {dimension_numbers = #tpu.dot_dimension_numbers<[1], [0], [0], [1], [0, 0, 1, 1], [], []>} : vector<16x16xf32>, vector<16x2xf32>, vector<16x2xf32> -> vector<16x2xf32>
    %23 = vector.extract_strided_slice %22 {offsets = [0, 0], sizes = [16, 1], strides = [1, 1]} : vector<16x2xf32> to vector<16x1xf32>
    %24 = vector.extract_strided_slice %22 {offsets = [0, 1], sizes = [16, 1], strides = [1, 1]} : vector<16x2xf32> to vector<16x1xf32>
    %25 = arith.mulf %23, %23 : vector<16x1xf32>
    %26 = arith.subf %24, %25 : vector<16x1xf32>
    %27 = vector.broadcast %23 : vector<16x1xf32> to vector<16x128xf32>
    %28 = arith.subf %11, %27 : vector<16x128xf32>
    %cst_19 = arith.constant 9.99999974E-6 : f32
    %29 = vector.broadcast %cst_19 : f32 to vector<16x1xf32>
    %30 = arith.addf %26, %29 : vector<16x1xf32>
    %31 = math.rsqrt %30 : vector<16x1xf32>
    %32 = vector.broadcast %31 : vector<16x1xf32> to vector<16x128xf32>
    %33 = arith.mulf %28, %32 : vector<16x128xf32>
    %34 = vector.broadcast %12 : vector<16x1xf32> to vector<16x128xf32>
    %35 = arith.mulf %33, %34 : vector<16x128xf32>
    %36 = vector.broadcast %13 : vector<16x1xf32> to vector<16x128xf32>
    %37 = arith.addf %35, %36 : vector<16x128xf32>
    %38 = arith.negf %37 : vector<16x128xf32>
    %39 = math.exp %38 : vector<16x128xf32>
    %cst_20 = arith.constant 1.000000e+00 : f32
    %40 = vector.broadcast %cst_20 : f32 to vector<16x128xf32>
    %41 = arith.addf %40, %39 : vector<16x128xf32>
    %42 = arith.divf %40, %41 : vector<16x128xf32>
    %43 = arith.mulf %37, %42 : vector<16x128xf32>
    %cst_21 = arith.constant 0.000000e+00 : f32
    %44 = vector.broadcast %cst_21 : f32 to vector<16x1xf32>
    %45 = vector.extract_strided_slice %43 {offsets = [0, 0], sizes = [16, 127], strides = [1, 1]} : vector<16x128xf32> to vector<16x127xf32>
    %46 = tpu.concatenate %44, %45 in 1 : vector<16x1xf32>, vector<16x127xf32> -> vector<16x128xf32>
    %cst_22 = arith.constant 0.000000e+00 : f32
    %47 = vector.broadcast %cst_22 : f32 to vector<16x1xf32>
    %48 = vector.extract_strided_slice %43 {offsets = [0, 1], sizes = [16, 127], strides = [1, 1]} : vector<16x128xf32> to vector<16x127xf32>
    %49 = tpu.concatenate %48, %47 in 1 : vector<16x127xf32>, vector<16x1xf32> -> vector<16x128xf32>
    %50 = tpu.concatenate %46, %43, %49 in 0 : vector<16x128xf32>, vector<16x128xf32>, vector<16x128xf32> -> vector<48x128xf32>
    %cst_23 = arith.constant dense<0.000000e+00> : vector<16x128xf32>
    %51 = tpu.matmul %14, %50, %cst_23 {dimension_numbers = #tpu.dot_dimension_numbers<[1], [0], [0], [1], [0, 0, 1, 1], [], []>} : vector<16x48xf32>, vector<48x128xf32>, vector<16x128xf32> -> vector<16x128xf32>
    %52 = vector.broadcast %15 : vector<16x1xf32> to vector<16x128xf32>
    %53 = arith.addf %51, %52 : vector<16x128xf32>
    %c0_24 = arith.constant 0 : index
    %c0_25 = arith.constant 0 : index
    %54 = vector.load %arg9[%c0_24, %c0_25] : memref<16x1xf32, #tpu.memory_space<vmem>>, vector<16x1xf32>
    %c0_26 = arith.constant 0 : index
    %c0_27 = arith.constant 0 : index
    %55 = vector.load %arg10[%c0_26, %c0_27] : memref<16x1xf32, #tpu.memory_space<vmem>>, vector<16x1xf32>
    %c0_28 = arith.constant 0 : index
    %c0_29 = arith.constant 0 : index
    %56 = vector.load %arg11[%c0_28, %c0_29] : memref<16x48xf32, #tpu.memory_space<vmem>>, vector<16x48xf32>
    %c0_30 = arith.constant 0 : index
    %c0_31 = arith.constant 0 : index
    %57 = vector.load %arg12[%c0_30, %c0_31] : memref<16x1xf32, #tpu.memory_space<vmem>>, vector<16x1xf32>
    %cst_32 = arith.constant dense<0.000000e+00> : vector<16xf32>
    %58 = vector.multi_reduction <add>, %53, %cst_32 [1] : vector<16x128xf32> to vector<16xf32>
    %59 = vector.shape_cast %58 : vector<16xf32> to vector<16x1xf32>
    %60 = arith.mulf %53, %53 : vector<16x128xf32>
    %cst_33 = arith.constant dense<0.000000e+00> : vector<16xf32>
    %61 = vector.multi_reduction <add>, %60, %cst_33 [1] : vector<16x128xf32> to vector<16xf32>
    %62 = vector.shape_cast %61 : vector<16xf32> to vector<16x1xf32>
    %63 = tpu.concatenate %59, %62 in 1 : vector<16x1xf32>, vector<16x1xf32> -> vector<16x2xf32>
    %cst_34 = arith.constant dense<0.000000e+00> : vector<16x2xf32>
    %64 = tpu.matmul %0, %63, %cst_34 {dimension_numbers = #tpu.dot_dimension_numbers<[1], [0], [0], [1], [0, 0, 1, 1], [], []>} : vector<16x16xf32>, vector<16x2xf32>, vector<16x2xf32> -> vector<16x2xf32>
    %65 = vector.extract_strided_slice %64 {offsets = [0, 0], sizes = [16, 1], strides = [1, 1]} : vector<16x2xf32> to vector<16x1xf32>
    %66 = vector.extract_strided_slice %64 {offsets = [0, 1], sizes = [16, 1], strides = [1, 1]} : vector<16x2xf32> to vector<16x1xf32>
    %67 = arith.mulf %65, %65 : vector<16x1xf32>
    %68 = arith.subf %66, %67 : vector<16x1xf32>
    %69 = vector.broadcast %65 : vector<16x1xf32> to vector<16x128xf32>
    %70 = arith.subf %53, %69 : vector<16x128xf32>
    %cst_35 = arith.constant 9.99999974E-6 : f32
    %71 = vector.broadcast %cst_35 : f32 to vector<16x1xf32>
    %72 = arith.addf %68, %71 : vector<16x1xf32>
    %73 = math.rsqrt %72 : vector<16x1xf32>
    %74 = vector.broadcast %73 : vector<16x1xf32> to vector<16x128xf32>
    %75 = arith.mulf %70, %74 : vector<16x128xf32>
    %76 = vector.broadcast %54 : vector<16x1xf32> to vector<16x128xf32>
    %77 = arith.mulf %75, %76 : vector<16x128xf32>
    %78 = vector.broadcast %55 : vector<16x1xf32> to vector<16x128xf32>
    %79 = arith.addf %77, %78 : vector<16x128xf32>
    %80 = arith.negf %79 : vector<16x128xf32>
    %81 = math.exp %80 : vector<16x128xf32>
    %cst_36 = arith.constant 1.000000e+00 : f32
    %82 = vector.broadcast %cst_36 : f32 to vector<16x128xf32>
    %83 = arith.addf %82, %81 : vector<16x128xf32>
    %84 = arith.divf %82, %83 : vector<16x128xf32>
    %85 = arith.mulf %79, %84 : vector<16x128xf32>
    %cst_37 = arith.constant 0.000000e+00 : f32
    %86 = vector.broadcast %cst_37 : f32 to vector<16x1xf32>
    %87 = vector.extract_strided_slice %85 {offsets = [0, 0], sizes = [16, 127], strides = [1, 1]} : vector<16x128xf32> to vector<16x127xf32>
    %88 = tpu.concatenate %86, %87 in 1 : vector<16x1xf32>, vector<16x127xf32> -> vector<16x128xf32>
    %cst_38 = arith.constant 0.000000e+00 : f32
    %89 = vector.broadcast %cst_38 : f32 to vector<16x1xf32>
    %90 = vector.extract_strided_slice %85 {offsets = [0, 1], sizes = [16, 127], strides = [1, 1]} : vector<16x128xf32> to vector<16x127xf32>
    %91 = tpu.concatenate %90, %89 in 1 : vector<16x127xf32>, vector<16x1xf32> -> vector<16x128xf32>
    %92 = tpu.concatenate %88, %85, %91 in 0 : vector<16x128xf32>, vector<16x128xf32>, vector<16x128xf32> -> vector<48x128xf32>
    %cst_39 = arith.constant dense<0.000000e+00> : vector<16x128xf32>
    %93 = tpu.matmul %56, %92, %cst_39 {dimension_numbers = #tpu.dot_dimension_numbers<[1], [0], [0], [1], [0, 0, 1, 1], [], []>} : vector<16x48xf32>, vector<48x128xf32>, vector<16x128xf32> -> vector<16x128xf32>
    %94 = vector.broadcast %57 : vector<16x1xf32> to vector<16x128xf32>
    %95 = arith.addf %93, %94 : vector<16x128xf32>
    %96 = arith.addf %11, %95 : vector<16x128xf32>
    %c0_40 = arith.constant 0 : index
    %c0_41 = arith.constant 0 : index
    %97 = vector.load %arg13[%c0_40, %c0_41] : memref<16x1xf32, #tpu.memory_space<vmem>>, vector<16x1xf32>
    %c0_42 = arith.constant 0 : index
    %c0_43 = arith.constant 0 : index
    %98 = vector.load %arg14[%c0_42, %c0_43] : memref<16x1xf32, #tpu.memory_space<vmem>>, vector<16x1xf32>
    %c0_44 = arith.constant 0 : index
    %c0_45 = arith.constant 0 : index
    %99 = vector.load %arg15[%c0_44, %c0_45] : memref<16x48xf32, #tpu.memory_space<vmem>>, vector<16x48xf32>
    %c0_46 = arith.constant 0 : index
    %c0_47 = arith.constant 0 : index
    %100 = vector.load %arg16[%c0_46, %c0_47] : memref<16x1xf32, #tpu.memory_space<vmem>>, vector<16x1xf32>
    %cst_48 = arith.constant dense<0.000000e+00> : vector<16xf32>
    %101 = vector.multi_reduction <add>, %96, %cst_48 [1] : vector<16x128xf32> to vector<16xf32>
    %102 = vector.shape_cast %101 : vector<16xf32> to vector<16x1xf32>
    %103 = arith.mulf %96, %96 : vector<16x128xf32>
    %cst_49 = arith.constant dense<0.000000e+00> : vector<16xf32>
    %104 = vector.multi_reduction <add>, %103, %cst_49 [1] : vector<16x128xf32> to vector<16xf32>
    %105 = vector.shape_cast %104 : vector<16xf32> to vector<16x1xf32>
    %106 = tpu.concatenate %102, %105 in 1 : vector<16x1xf32>, vector<16x1xf32> -> vector<16x2xf32>
    %cst_50 = arith.constant dense<0.000000e+00> : vector<16x2xf32>
    %107 = tpu.matmul %0, %106, %cst_50 {dimension_numbers = #tpu.dot_dimension_numbers<[1], [0], [0], [1], [0, 0, 1, 1], [], []>} : vector<16x16xf32>, vector<16x2xf32>, vector<16x2xf32> -> vector<16x2xf32>
    %108 = vector.extract_strided_slice %107 {offsets = [0, 0], sizes = [16, 1], strides = [1, 1]} : vector<16x2xf32> to vector<16x1xf32>
    %109 = vector.extract_strided_slice %107 {offsets = [0, 1], sizes = [16, 1], strides = [1, 1]} : vector<16x2xf32> to vector<16x1xf32>
    %110 = arith.mulf %108, %108 : vector<16x1xf32>
    %111 = arith.subf %109, %110 : vector<16x1xf32>
    %112 = vector.broadcast %108 : vector<16x1xf32> to vector<16x128xf32>
    %113 = arith.subf %96, %112 : vector<16x128xf32>
    %cst_51 = arith.constant 9.99999974E-6 : f32
    %114 = vector.broadcast %cst_51 : f32 to vector<16x1xf32>
    %115 = arith.addf %111, %114 : vector<16x1xf32>
    %116 = math.rsqrt %115 : vector<16x1xf32>
    %117 = vector.broadcast %116 : vector<16x1xf32> to vector<16x128xf32>
    %118 = arith.mulf %113, %117 : vector<16x128xf32>
    %119 = vector.broadcast %97 : vector<16x1xf32> to vector<16x128xf32>
    %120 = arith.mulf %118, %119 : vector<16x128xf32>
    %121 = vector.broadcast %98 : vector<16x1xf32> to vector<16x128xf32>
    %122 = arith.addf %120, %121 : vector<16x128xf32>
    %123 = arith.negf %122 : vector<16x128xf32>
    %124 = math.exp %123 : vector<16x128xf32>
    %cst_52 = arith.constant 1.000000e+00 : f32
    %125 = vector.broadcast %cst_52 : f32 to vector<16x128xf32>
    %126 = arith.addf %125, %124 : vector<16x128xf32>
    %127 = arith.divf %125, %126 : vector<16x128xf32>
    %128 = arith.mulf %122, %127 : vector<16x128xf32>
    %cst_53 = arith.constant 0.000000e+00 : f32
    %129 = vector.broadcast %cst_53 : f32 to vector<16x1xf32>
    %130 = vector.extract_strided_slice %128 {offsets = [0, 0], sizes = [16, 127], strides = [1, 1]} : vector<16x128xf32> to vector<16x127xf32>
    %131 = tpu.concatenate %129, %130 in 1 : vector<16x1xf32>, vector<16x127xf32> -> vector<16x128xf32>
    %cst_54 = arith.constant 0.000000e+00 : f32
    %132 = vector.broadcast %cst_54 : f32 to vector<16x1xf32>
    %133 = vector.extract_strided_slice %128 {offsets = [0, 1], sizes = [16, 127], strides = [1, 1]} : vector<16x128xf32> to vector<16x127xf32>
    %134 = tpu.concatenate %133, %132 in 1 : vector<16x127xf32>, vector<16x1xf32> -> vector<16x128xf32>
    %135 = tpu.concatenate %131, %128, %134 in 0 : vector<16x128xf32>, vector<16x128xf32>, vector<16x128xf32> -> vector<48x128xf32>
    %cst_55 = arith.constant dense<0.000000e+00> : vector<16x128xf32>
    %136 = tpu.matmul %99, %135, %cst_55 {dimension_numbers = #tpu.dot_dimension_numbers<[1], [0], [0], [1], [0, 0, 1, 1], [], []>} : vector<16x48xf32>, vector<48x128xf32>, vector<16x128xf32> -> vector<16x128xf32>
    %137 = vector.broadcast %100 : vector<16x1xf32> to vector<16x128xf32>
    %138 = arith.addf %136, %137 : vector<16x128xf32>
    %c0_56 = arith.constant 0 : index
    %c0_57 = arith.constant 0 : index
    %139 = vector.load %arg17[%c0_56, %c0_57] : memref<16x1xf32, #tpu.memory_space<vmem>>, vector<16x1xf32>
    %c0_58 = arith.constant 0 : index
    %c0_59 = arith.constant 0 : index
    %140 = vector.load %arg18[%c0_58, %c0_59] : memref<16x1xf32, #tpu.memory_space<vmem>>, vector<16x1xf32>
    %c0_60 = arith.constant 0 : index
    %c0_61 = arith.constant 0 : index
    %141 = vector.load %arg19[%c0_60, %c0_61] : memref<16x48xf32, #tpu.memory_space<vmem>>, vector<16x48xf32>
    %c0_62 = arith.constant 0 : index
    %c0_63 = arith.constant 0 : index
    %142 = vector.load %arg20[%c0_62, %c0_63] : memref<16x1xf32, #tpu.memory_space<vmem>>, vector<16x1xf32>
    %cst_64 = arith.constant dense<0.000000e+00> : vector<16xf32>
    %143 = vector.multi_reduction <add>, %138, %cst_64 [1] : vector<16x128xf32> to vector<16xf32>
    %144 = vector.shape_cast %143 : vector<16xf32> to vector<16x1xf32>
    %145 = arith.mulf %138, %138 : vector<16x128xf32>
    %cst_65 = arith.constant dense<0.000000e+00> : vector<16xf32>
    %146 = vector.multi_reduction <add>, %145, %cst_65 [1] : vector<16x128xf32> to vector<16xf32>
    %147 = vector.shape_cast %146 : vector<16xf32> to vector<16x1xf32>
    %148 = tpu.concatenate %144, %147 in 1 : vector<16x1xf32>, vector<16x1xf32> -> vector<16x2xf32>
    %cst_66 = arith.constant dense<0.000000e+00> : vector<16x2xf32>
    %149 = tpu.matmul %0, %148, %cst_66 {dimension_numbers = #tpu.dot_dimension_numbers<[1], [0], [0], [1], [0, 0, 1, 1], [], []>} : vector<16x16xf32>, vector<16x2xf32>, vector<16x2xf32> -> vector<16x2xf32>
    %150 = vector.extract_strided_slice %149 {offsets = [0, 0], sizes = [16, 1], strides = [1, 1]} : vector<16x2xf32> to vector<16x1xf32>
    %151 = vector.extract_strided_slice %149 {offsets = [0, 1], sizes = [16, 1], strides = [1, 1]} : vector<16x2xf32> to vector<16x1xf32>
    %152 = arith.mulf %150, %150 : vector<16x1xf32>
    %153 = arith.subf %151, %152 : vector<16x1xf32>
    %154 = vector.broadcast %150 : vector<16x1xf32> to vector<16x128xf32>
    %155 = arith.subf %138, %154 : vector<16x128xf32>
    %cst_67 = arith.constant 9.99999974E-6 : f32
    %156 = vector.broadcast %cst_67 : f32 to vector<16x1xf32>
    %157 = arith.addf %153, %156 : vector<16x1xf32>
    %158 = math.rsqrt %157 : vector<16x1xf32>
    %159 = vector.broadcast %158 : vector<16x1xf32> to vector<16x128xf32>
    %160 = arith.mulf %155, %159 : vector<16x128xf32>
    %161 = vector.broadcast %139 : vector<16x1xf32> to vector<16x128xf32>
    %162 = arith.mulf %160, %161 : vector<16x128xf32>
    %163 = vector.broadcast %140 : vector<16x1xf32> to vector<16x128xf32>
    %164 = arith.addf %162, %163 : vector<16x128xf32>
    %165 = arith.negf %164 : vector<16x128xf32>
    %166 = math.exp %165 : vector<16x128xf32>
    %cst_68 = arith.constant 1.000000e+00 : f32
    %167 = vector.broadcast %cst_68 : f32 to vector<16x128xf32>
    %168 = arith.addf %167, %166 : vector<16x128xf32>
    %169 = arith.divf %167, %168 : vector<16x128xf32>
    %170 = arith.mulf %164, %169 : vector<16x128xf32>
    %cst_69 = arith.constant 0.000000e+00 : f32
    %171 = vector.broadcast %cst_69 : f32 to vector<16x1xf32>
    %172 = vector.extract_strided_slice %170 {offsets = [0, 0], sizes = [16, 127], strides = [1, 1]} : vector<16x128xf32> to vector<16x127xf32>
    %173 = tpu.concatenate %171, %172 in 1 : vector<16x1xf32>, vector<16x127xf32> -> vector<16x128xf32>
    %cst_70 = arith.constant 0.000000e+00 : f32
    %174 = vector.broadcast %cst_70 : f32 to vector<16x1xf32>
    %175 = vector.extract_strided_slice %170 {offsets = [0, 1], sizes = [16, 127], strides = [1, 1]} : vector<16x128xf32> to vector<16x127xf32>
    %176 = tpu.concatenate %175, %174 in 1 : vector<16x127xf32>, vector<16x1xf32> -> vector<16x128xf32>
    %177 = tpu.concatenate %173, %170, %176 in 0 : vector<16x128xf32>, vector<16x128xf32>, vector<16x128xf32> -> vector<48x128xf32>
    %cst_71 = arith.constant dense<0.000000e+00> : vector<16x128xf32>
    %178 = tpu.matmul %141, %177, %cst_71 {dimension_numbers = #tpu.dot_dimension_numbers<[1], [0], [0], [1], [0, 0, 1, 1], [], []>} : vector<16x48xf32>, vector<48x128xf32>, vector<16x128xf32> -> vector<16x128xf32>
    %179 = vector.broadcast %142 : vector<16x1xf32> to vector<16x128xf32>
    %180 = arith.addf %178, %179 : vector<16x128xf32>
    %181 = arith.addf %96, %180 : vector<16x128xf32>
    %c0_72 = arith.constant 0 : index
    %c0_73 = arith.constant 0 : index
    %c0_74 = arith.constant 0 : index
    %182 = vector.load %arg21[%c0_72, %c0_73, %c0_74] : memref<1x16x128xf32, #tpu.memory_space<vmem>>, vector<1x16x128xf32>
    %183 = vector.shape_cast %182 : vector<1x16x128xf32> to vector<16x128xf32>
    %184 = vector.shape_cast %181 : vector<16x128xf32> to vector<1x16x128xf32>
    tpu.vector_store %arg21[%c0_72, %c0_73, %c0_74], %184 {strides = array<i32>} : memref<1x16x128xf32, #tpu.memory_space<vmem>>, vector<1x16x128xf32>,
    return
  }
  func.func @transform_0(%arg0: i32) -> (i32, i32, i32) {
    %c0_i32 = arith.constant 0 : i32
    %c0_i32_0 = arith.constant 0 : i32
    %c0_i32_1 = arith.constant 0 : i32
    return %arg0, %c0_i32, %c0_i32_0 : i32, i32, i32
  }
  func.func @transform_1(%arg0: i32) -> (i32, i32) {
    %c0_i32 = arith.constant 0 : i32
    %c0_i32_0 = arith.constant 0 : i32
    %c0_i32_1 = arith.constant 0 : i32
    return %c0_i32, %c0_i32_0 : i32, i32
  }
  func.func @transform_2(%arg0: i32) -> (i32, i32) {
    %c0_i32 = arith.constant 0 : i32
    %c0_i32_0 = arith.constant 0 : i32
    %c0_i32_1 = arith.constant 0 : i32
    return %c0_i32, %c0_i32_0 : i32, i32
  }
  func.func @transform_3(%arg0: i32) -> (i32, i32) {
    %c0_i32 = arith.constant 0 : i32
    %c0_i32_0 = arith.constant 0 : i32
    %c0_i32_1 = arith.constant 0 : i32
    return %c0_i32, %c0_i32_0 : i32, i32
  }
  func.func @transform_4(%arg0: i32) -> (i32, i32) {
    %c0_i32 = arith.constant 0 : i32
    %c0_i32_0 = arith.constant 0 : i32
    %c0_i32_1 = arith.constant 0 : i32
    return %c0_i32, %c0_i32_0 : i32, i32
  }
  func.func @transform_5(%arg0: i32) -> (i32, i32) {
    %c0_i32 = arith.constant 0 : i32
    %c0_i32_0 = arith.constant 0 : i32
    %c0_i32_1 = arith.constant 0 : i32
    return %c0_i32, %c0_i32_0 : i32, i32
  }
  func.func @transform_6(%arg0: i32) -> (i32, i32) {
    %c0_i32 = arith.constant 0 : i32
    %c0_i32_0 = arith.constant 0 : i32
    %c0_i32_1 = arith.constant 0 : i32
    return %c0_i32, %c0_i32_0 : i32, i32
  }
  func.func @transform_7(%arg0: i32) -> (i32, i32) {
    %c0_i32 = arith.constant 0 : i32
    %c0_i32_0 = arith.constant 0 : i32
    %c0_i32_1 = arith.constant 0 : i32
    return %c0_i32, %c0_i32_0 : i32, i32
  }
  func.func @transform_8(%arg0: i32) -> (i32, i32) {
    %c0_i32 = arith.constant 0 : i32
    %c0_i32_0 = arith.constant 0 : i32
    %c0_i32_1 = arith.constant 0 : i32
    return %c0_i32, %c0_i32_0 : i32, i32
  }
  func.func @transform_9(%arg0: i32) -> (i32, i32) {
    %c0_i32 = arith.constant 0 : i32
    %c0_i32_0 = arith.constant 0 : i32
    %c0_i32_1 = arith.constant 0 : i32
    return %c0_i32, %c0_i32_0 : i32, i32
  }
  func.func @transform_10(%arg0: i32) -> (i32, i32) {
    %c0_i32 = arith.constant 0 : i32
    %c0_i32_0 = arith.constant 0 : i32
    %c0_i32_1 = arith.constant 0 : i32
    return %c0_i32, %c0_i32_0 : i32, i32
  }
  func.func @transform_11(%arg0: i32) -> (i32, i32) {
    %c0_i32 = arith.constant 0 : i32
    %c0_i32_0 = arith.constant 0 : i32
    %c0_i32_1 = arith.constant 0 : i32
    return %c0_i32, %c0_i32_0 : i32, i32
  }
  func.func @transform_12(%arg0: i32) -> (i32, i32) {
    %c0_i32 = arith.constant 0 : i32
    %c0_i32_0 = arith.constant 0 : i32
    %c0_i32_1 = arith.constant 0 : i32
    return %c0_i32, %c0_i32_0 : i32, i32
  }
  func.func @transform_13(%arg0: i32) -> (i32, i32) {
    %c0_i32 = arith.constant 0 : i32
    %c0_i32_0 = arith.constant 0 : i32
    %c0_i32_1 = arith.constant 0 : i32
    return %c0_i32, %c0_i32_0 : i32, i32
  }
  func.func @transform_14(%arg0: i32) -> (i32, i32) {
    %c0_i32 = arith.constant 0 : i32
    %c0_i32_0 = arith.constant 0 : i32
    %c0_i32_1 = arith.constant 0 : i32
    return %c0_i32, %c0_i32_0 : i32, i32
  }
  func.func @transform_15(%arg0: i32) -> (i32, i32) {
    %c0_i32 = arith.constant 0 : i32
    %c0_i32_0 = arith.constant 0 : i32
    %c0_i32_1 = arith.constant 0 : i32
    return %c0_i32, %c0_i32_0 : i32, i32
  }
  func.func @transform_16(%arg0: i32) -> (i32, i32) {
    %c0_i32 = arith.constant 0 : i32
    %c0_i32_0 = arith.constant 0 : i32
    %c0_i32_1 = arith.constant 0 : i32
    return %c0_i32, %c0_i32_0 : i32, i32
  }
  func.func @transform_17(%arg0: i32) -> (i32, i32) {
    %c0_i32 = arith.constant 0 : i32
    %c0_i32_0 = arith.constant 0 : i32
    %c0_i32_1 = arith.constant 0 : i32
    return %c0_i32, %c0_i32_0 : i32, i32
  }
  func.func @transform_18(%arg0: i32) -> (i32, i32) {
    %c0_i32 = arith.constant 0 : i32
    %c0_i32_0 = arith.constant 0 : i32
    %c0_i32_1 = arith.constant 0 : i32
    return %c0_i32, %c0_i32_0 : i32, i32
  }
  func.func @transform_19(%arg0: i32) -> (i32, i32) {
    %c0_i32 = arith.constant 0 : i32
    %c0_i32_0 = arith.constant 0 : i32
    %c0_i32_1 = arith.constant 0 : i32
    return %c0_i32, %c0_i32_0 : i32, i32
  }
  func.func @transform_20(%arg0: i32) -> (i32, i32, i32) {
    %c0_i32 = arith.constant 0 : i32
    %c0_i32_0 = arith.constant 0 : i32
    %c0_i32_1 = arith.constant 0 : i32
    return %arg0, %c0_i32, %c0_i32_0 : i32, i32, i32
  }
}

module attributes {stable_mosaic.version = 11 : i64} {
  func.func @_fused_block_kernel(%arg0: i32, %arg1: memref<1x16x130xf32, #tpu.memory_space<vmem>>, %arg2: memref<16x16xf32, #tpu.memory_space<vmem>>, %arg3: memref<16x48xf32, #tpu.memory_space<vmem>>, %arg4: memref<16x1xf32, #tpu.memory_space<vmem>>, %arg5: memref<16x1xf32, #tpu.memory_space<vmem>>, %arg6: memref<16x1xf32, #tpu.memory_space<vmem>>, %arg7: memref<16x48xf32, #tpu.memory_space<vmem>>, %arg8: memref<16x1xf32, #tpu.memory_space<vmem>>, %arg9: memref<16x1xf32, #tpu.memory_space<vmem>>, %arg10: memref<16x1xf32, #tpu.memory_space<vmem>>, %arg11: memref<16x48xf32, #tpu.memory_space<vmem>>, %arg12: memref<16x1xf32, #tpu.memory_space<vmem>>, %arg13: memref<16x1xf32, #tpu.memory_space<vmem>>, %arg14: memref<16x1xf32, #tpu.memory_space<vmem>>, %arg15: memref<16x48xf32, #tpu.memory_space<vmem>>, %arg16: memref<16x1xf32, #tpu.memory_space<vmem>>, %arg17: memref<16x1xf32, #tpu.memory_space<vmem>>, %arg18: memref<16x1xf32, #tpu.memory_space<vmem>>, %arg19: memref<16x48xf32, #tpu.memory_space<vmem>>, %arg20: memref<16x1xf32, #tpu.memory_space<vmem>>, %arg21: memref<1x16x128xf32, #tpu.memory_space<vmem>>) attributes {dimension_semantics = [#tpu.dimension_semantics<parallel>], iteration_bounds = array<i64: 2>, scalar_prefetch = 0 : i64, scratch_operands = 0 : i64, tpu.core_type = #tpu.core_type<tc>, window_params = [{transform_indices = @transform_0, window_bounds = array<i64: 1, 16, 130>}, {pipeline_mode = #tpu.pipeline_mode<synchronous>, transform_indices = @transform_1, window_bounds = array<i64: 16, 16>}, {pipeline_mode = #tpu.pipeline_mode<synchronous>, transform_indices = @transform_2, window_bounds = array<i64: 16, 48>}, {pipeline_mode = #tpu.pipeline_mode<synchronous>, transform_indices = @transform_3, window_bounds = array<i64: 16, 1>}, {pipeline_mode = #tpu.pipeline_mode<synchronous>, transform_indices = @transform_4, window_bounds = array<i64: 16, 1>}, {pipeline_mode = #tpu.pipeline_mode<synchronous>, transform_indices = @transform_5, window_bounds = array<i64: 16, 1>}, {pipeline_mode = #tpu.pipeline_mode<synchronous>, transform_indices = @transform_6, window_bounds = array<i64: 16, 48>}, {pipeline_mode = #tpu.pipeline_mode<synchronous>, transform_indices = @transform_7, window_bounds = array<i64: 16, 1>}, {pipeline_mode = #tpu.pipeline_mode<synchronous>, transform_indices = @transform_8, window_bounds = array<i64: 16, 1>}, {pipeline_mode = #tpu.pipeline_mode<synchronous>, transform_indices = @transform_9, window_bounds = array<i64: 16, 1>}, {pipeline_mode = #tpu.pipeline_mode<synchronous>, transform_indices = @transform_10, window_bounds = array<i64: 16, 48>}, {pipeline_mode = #tpu.pipeline_mode<synchronous>, transform_indices = @transform_11, window_bounds = array<i64: 16, 1>}, {pipeline_mode = #tpu.pipeline_mode<synchronous>, transform_indices = @transform_12, window_bounds = array<i64: 16, 1>}, {pipeline_mode = #tpu.pipeline_mode<synchronous>, transform_indices = @transform_13, window_bounds = array<i64: 16, 1>}, {pipeline_mode = #tpu.pipeline_mode<synchronous>, transform_indices = @transform_14, window_bounds = array<i64: 16, 48>}, {pipeline_mode = #tpu.pipeline_mode<synchronous>, transform_indices = @transform_15, window_bounds = array<i64: 16, 1>}, {pipeline_mode = #tpu.pipeline_mode<synchronous>, transform_indices = @transform_16, window_bounds = array<i64: 16, 1>}, {pipeline_mode = #tpu.pipeline_mode<synchronous>, transform_indices = @transform_17, window_bounds = array<i64: 16, 1>}, {pipeline_mode = #tpu.pipeline_mode<synchronous>, transform_indices = @transform_18, window_bounds = array<i64: 16, 48>}, {pipeline_mode = #tpu.pipeline_mode<synchronous>, transform_indices = @transform_19, window_bounds = array<i64: 16, 1>}, {transform_indices = @transform_20, window_bounds = array<i64: 1, 16, 128>}]} {
    %c0 = arith.constant 0 : index
    %c0_0 = arith.constant 0 : index
    %0 = vector.load %arg2[%c0, %c0_0] : memref<16x16xf32, #tpu.memory_space<vmem>>, vector<16x16xf32>
    %c0_1 = arith.constant 0 : index
    %c0_2 = arith.constant 0 : index
    %c0_3 = arith.constant 0 : index
    %1 = vector.load %arg1[%c0_1, %c0_2, %c0_3] : memref<1x16x130xf32, #tpu.memory_space<vmem>>, vector<1x16x130xf32>
    %2 = vector.shape_cast %1 : vector<1x16x130xf32> to vector<16x130xf32>
    %3 = vector.extract_strided_slice %2 {offsets = [0, 0], sizes = [16, 128], strides = [1, 1]} : vector<16x130xf32> to vector<16x128xf32>
    %4 = vector.extract_strided_slice %2 {offsets = [0, 1], sizes = [16, 128], strides = [1, 1]} : vector<16x130xf32> to vector<16x128xf32>
    %5 = vector.extract_strided_slice %2 {offsets = [0, 2], sizes = [16, 128], strides = [1, 1]} : vector<16x130xf32> to vector<16x128xf32>
    %6 = tpu.concatenate %3, %4, %5 in 0 : vector<16x128xf32>, vector<16x128xf32>, vector<16x128xf32> -> vector<48x128xf32>
    %c0_4 = arith.constant 0 : index
    %c0_5 = arith.constant 0 : index
    %7 = vector.load %arg3[%c0_4, %c0_5] : memref<16x48xf32, #tpu.memory_space<vmem>>, vector<16x48xf32>
    %cst = arith.constant dense<0.000000e+00> : vector<16x128xf32>
    %8 = tpu.matmul %7, %6, %cst {dimension_numbers = #tpu.dot_dimension_numbers<[1], [0], [0], [1], [0, 0, 1, 1], [], []>} : vector<16x48xf32>, vector<48x128xf32>, vector<16x128xf32> -> vector<16x128xf32>
    %c0_6 = arith.constant 0 : index
    %c0_7 = arith.constant 0 : index
    %9 = vector.load %arg4[%c0_6, %c0_7] : memref<16x1xf32, #tpu.memory_space<vmem>>, vector<16x1xf32>
    %10 = vector.broadcast %9 : vector<16x1xf32> to vector<16x128xf32>
    %11 = arith.addf %8, %10 : vector<16x128xf32>
    %c0_8 = arith.constant 0 : index
    %c0_9 = arith.constant 0 : index
    %12 = vector.load %arg5[%c0_8, %c0_9] : memref<16x1xf32, #tpu.memory_space<vmem>>, vector<16x1xf32>
    %c0_10 = arith.constant 0 : index
    %c0_11 = arith.constant 0 : index
    %13 = vector.load %arg6[%c0_10, %c0_11] : memref<16x1xf32, #tpu.memory_space<vmem>>, vector<16x1xf32>
    %c0_12 = arith.constant 0 : index
    %c0_13 = arith.constant 0 : index
    %14 = vector.load %arg7[%c0_12, %c0_13] : memref<16x48xf32, #tpu.memory_space<vmem>>, vector<16x48xf32>
    %c0_14 = arith.constant 0 : index
    %c0_15 = arith.constant 0 : index
    %15 = vector.load %arg8[%c0_14, %c0_15] : memref<16x1xf32, #tpu.memory_space<vmem>>, vector<16x1xf32>
    %cst_16 = arith.constant dense<0.000000e+00> : vector<16xf32>
    %16 = vector.multi_reduction <add>, %11, %cst_16 [1] : vector<16x128xf32> to vector<16xf32>
    %17 = vector.shape_cast %16 : vector<16xf32> to vector<16x1xf32>
    %18 = arith.mulf %11, %11 : vector<16x128xf32>
    %cst_17 = arith.constant dense<0.000000e+00> : vector<16xf32>
    %19 = vector.multi_reduction <add>, %18, %cst_17 [1] : vector<16x128xf32> to vector<16xf32>
    %20 = vector.shape_cast %19 : vector<16xf32> to vector<16x1xf32>
    %21 = tpu.concatenate %17, %20 in 1 : vector<16x1xf32>, vector<16x1xf32> -> vector<16x2xf32>
    %cst_18 = arith.constant dense<0.000000e+00> : vector<16x2xf32>
    %22 = tpu.matmul %0, %21, %cst_18 {dimension_numbers = #tpu.dot_dimension_numbers<[1], [0], [0], [1], [0, 0, 1, 1], [], []>} : vector<16x16xf32>, vector<16x2xf32>, vector<16x2xf32> -> vector<16x2xf32>
    %23 = vector.extract_strided_slice %22 {offsets = [0, 0], sizes = [16, 1], strides = [1, 1]} : vector<16x2xf32> to vector<16x1xf32>
    %24 = vector.extract_strided_slice %22 {offsets = [0, 1], sizes = [16, 1], strides = [1, 1]} : vector<16x2xf32> to vector<16x1xf32>
    %25 = arith.mulf %23, %23 : vector<16x1xf32>
    %26 = arith.subf %24, %25 : vector<16x1xf32>
    %27 = vector.broadcast %23 : vector<16x1xf32> to vector<16x128xf32>
    %28 = arith.subf %11, %27 : vector<16x128xf32>
    %cst_19 = arith.constant 9.99999974E-6 : f32
    %29 = vector.broadcast %cst_19 : f32 to vector<16x1xf32>
    %30 = arith.addf %26, %29 : vector<16x1xf32>
    %31 = math.rsqrt %30 : vector<16x1xf32>
    %32 = vector.broadcast %31 : vector<16x1xf32> to vector<16x128xf32>
    %33 = arith.mulf %28, %32 : vector<16x128xf32>
    %34 = vector.broadcast %12 : vector<16x1xf32> to vector<16x128xf32>
    %35 = arith.mulf %33, %34 : vector<16x128xf32>
    %36 = vector.broadcast %13 : vector<16x1xf32> to vector<16x128xf32>
    %37 = arith.addf %35, %36 : vector<16x128xf32>
    %38 = arith.negf %37 : vector<16x128xf32>
    %39 = math.exp %38 : vector<16x128xf32>
    %cst_20 = arith.constant 1.000000e+00 : f32
    %40 = vector.broadcast %cst_20 : f32 to vector<16x128xf32>
    %41 = arith.addf %40, %39 : vector<16x128xf32>
    %42 = arith.divf %40, %41 : vector<16x128xf32>
    %43 = arith.mulf %37, %42 : vector<16x128xf32>
    %cst_21 = arith.constant 0.000000e+00 : f32
    %44 = vector.broadcast %cst_21 : f32 to vector<16x1xf32>
    %45 = vector.extract_strided_slice %43 {offsets = [0, 0], sizes = [16, 127], strides = [1, 1]} : vector<16x128xf32> to vector<16x127xf32>
    %46 = tpu.concatenate %44, %45 in 1 : vector<16x1xf32>, vector<16x127xf32> -> vector<16x128xf32>
    %cst_22 = arith.constant 0.000000e+00 : f32
    %47 = vector.broadcast %cst_22 : f32 to vector<16x1xf32>
    %48 = vector.extract_strided_slice %43 {offsets = [0, 1], sizes = [16, 127], strides = [1, 1]} : vector<16x128xf32> to vector<16x127xf32>
    %49 = tpu.concatenate %48, %47 in 1 : vector<16x127xf32>, vector<16x1xf32> -> vector<16x128xf32>
    %50 = tpu.concatenate %46, %43, %49 in 0 : vector<16x128xf32>, vector<16x128xf32>, vector<16x128xf32> -> vector<48x128xf32>
    %cst_23 = arith.constant dense<0.000000e+00> : vector<16x128xf32>
    %51 = tpu.matmul %14, %50, %cst_23 {dimension_numbers = #tpu.dot_dimension_numbers<[1], [0], [0], [1], [0, 0, 1, 1], [], []>} : vector<16x48xf32>, vector<48x128xf32>, vector<16x128xf32> -> vector<16x128xf32>
    %52 = vector.broadcast %15 : vector<16x1xf32> to vector<16x128xf32>
    %53 = arith.addf %51, %52 : vector<16x128xf32>
    %c0_24 = arith.constant 0 : index
    %c0_25 = arith.constant 0 : index
    %54 = vector.load %arg9[%c0_24, %c0_25] : memref<16x1xf32, #tpu.memory_space<vmem>>, vector<16x1xf32>
    %c0_26 = arith.constant 0 : index
    %c0_27 = arith.constant 0 : index
    %55 = vector.load %arg10[%c0_26, %c0_27] : memref<16x1xf32, #tpu.memory_space<vmem>>, vector<16x1xf32>
    %c0_28 = arith.constant 0 : index
    %c0_29 = arith.constant 0 : index
    %56 = vector.load %arg11[%c0_28, %c0_29] : memref<16x48xf32, #tpu.memory_space<vmem>>, vector<16x48xf32>
    %c0_30 = arith.constant 0 : index
    %c0_31 = arith.constant 0 : index
    %57 = vector.load %arg12[%c0_30, %c0_31] : memref<16x1xf32, #tpu.memory_space<vmem>>, vector<16x1xf32>
    %cst_32 = arith.constant dense<0.000000e+00> : vector<16xf32>
    %58 = vector.multi_reduction <add>, %53, %cst_32 [1] : vector<16x128xf32> to vector<16xf32>
    %59 = vector.shape_cast %58 : vector<16xf32> to vector<16x1xf32>
    %60 = arith.mulf %53, %53 : vector<16x128xf32>
    %cst_33 = arith.constant dense<0.000000e+00> : vector<16xf32>
    %61 = vector.multi_reduction <add>, %60, %cst_33 [1] : vector<16x128xf32> to vector<16xf32>
    %62 = vector.shape_cast %61 : vector<16xf32> to vector<16x1xf32>
    %63 = tpu.concatenate %59, %62 in 1 : vector<16x1xf32>, vector<16x1xf32> -> vector<16x2xf32>
    %cst_34 = arith.constant dense<0.000000e+00> : vector<16x2xf32>
    %64 = tpu.matmul %0, %63, %cst_34 {dimension_numbers = #tpu.dot_dimension_numbers<[1], [0], [0], [1], [0, 0, 1, 1], [], []>} : vector<16x16xf32>, vector<16x2xf32>, vector<16x2xf32> -> vector<16x2xf32>
    %65 = vector.extract_strided_slice %64 {offsets = [0, 0], sizes = [16, 1], strides = [1, 1]} : vector<16x2xf32> to vector<16x1xf32>
    %66 = vector.extract_strided_slice %64 {offsets = [0, 1], sizes = [16, 1], strides = [1, 1]} : vector<16x2xf32> to vector<16x1xf32>
    %67 = arith.mulf %65, %65 : vector<16x1xf32>
    %68 = arith.subf %66, %67 : vector<16x1xf32>
    %69 = vector.broadcast %65 : vector<16x1xf32> to vector<16x128xf32>
    %70 = arith.subf %53, %69 : vector<16x128xf32>
    %cst_35 = arith.constant 9.99999974E-6 : f32
    %71 = vector.broadcast %cst_35 : f32 to vector<16x1xf32>
    %72 = arith.addf %68, %71 : vector<16x1xf32>
    %73 = math.rsqrt %72 : vector<16x1xf32>
    %74 = vector.broadcast %73 : vector<16x1xf32> to vector<16x128xf32>
    %75 = arith.mulf %70, %74 : vector<16x128xf32>
    %76 = vector.broadcast %54 : vector<16x1xf32> to vector<16x128xf32>
    %77 = arith.mulf %75, %76 : vector<16x128xf32>
    %78 = vector.broadcast %55 : vector<16x1xf32> to vector<16x128xf32>
    %79 = arith.addf %77, %78 : vector<16x128xf32>
    %80 = arith.negf %79 : vector<16x128xf32>
    %81 = math.exp %80 : vector<16x128xf32>
    %cst_36 = arith.constant 1.000000e+00 : f32
    %82 = vector.broadcast %cst_36 : f32 to vector<16x128xf32>
    %83 = arith.addf %82, %81 : vector<16x128xf32>
    %84 = arith.divf %82, %83 : vector<16x128xf32>
    %85 = arith.mulf %79, %84 : vector<16x128xf32>
    %cst_37 = arith.constant 0.000000e+00 : f32
    %86 = vector.broadcast %cst_37 : f32 to vector<16x1xf32>
    %87 = vector.extract_strided_slice %85 {offsets = [0, 0], sizes = [16, 127], strides = [1, 1]} : vector<16x128xf32> to vector<16x127xf32>
    %88 = tpu.concatenate %86, %87 in 1 : vector<16x1xf32>, vector<16x127xf32> -> vector<16x128xf32>
    %cst_38 = arith.constant 0.000000e+00 : f32
    %89 = vector.broadcast %cst_38 : f32 to vector<16x1xf32>
    %90 = vector.extract_strided_slice %85 {offsets = [0, 1], sizes = [16, 127], strides = [1, 1]} : vector<16x128xf32> to vector<16x127xf32>
    %91 = tpu.concatenate %90, %89 in 1 : vector<16x127xf32>, vector<16x1xf32> -> vector<16x128xf32>
    %92 = tpu.concatenate %88, %85, %91 in 0 : vector<16x128xf32>, vector<16x128xf32>, vector<16x128xf32> -> vector<48x128xf32>
    %cst_39 = arith.constant dense<0.000000e+00> : vector<16x128xf32>
    %93 = tpu.matmul %56, %92, %cst_39 {dimension_numbers = #tpu.dot_dimension_numbers<[1], [0], [0], [1], [0, 0, 1, 1], [], []>} : vector<16x48xf32>, vector<48x128xf32>, vector<16x128xf32> -> vector<16x128xf32>
    %94 = vector.broadcast %57 : vector<16x1xf32> to vector<16x128xf32>
    %95 = arith.addf %93, %94 : vector<16x128xf32>
    %96 = arith.addf %11, %95 : vector<16x128xf32>
    %c0_40 = arith.constant 0 : index
    %c0_41 = arith.constant 0 : index
    %97 = vector.load %arg13[%c0_40, %c0_41] : memref<16x1xf32, #tpu.memory_space<vmem>>, vector<16x1xf32>
    %c0_42 = arith.constant 0 : index
    %c0_43 = arith.constant 0 : index
    %98 = vector.load %arg14[%c0_42, %c0_43] : memref<16x1xf32, #tpu.memory_space<vmem>>, vector<16x1xf32>
    %c0_44 = arith.constant 0 : index
    %c0_45 = arith.constant 0 : index
    %99 = vector.load %arg15[%c0_44, %c0_45] : memref<16x48xf32, #tpu.memory_space<vmem>>, vector<16x48xf32>
    %c0_46 = arith.constant 0 : index
    %c0_47 = arith.constant 0 : index
    %100 = vector.load %arg16[%c0_46, %c0_47] : memref<16x1xf32, #tpu.memory_space<vmem>>, vector<16x1xf32>
    %cst_48 = arith.constant dense<0.000000e+00> : vector<16xf32>
    %101 = vector.multi_reduction <add>, %96, %cst_48 [1] : vector<16x128xf32> to vector<16xf32>
    %102 = vector.shape_cast %101 : vector<16xf32> to vector<16x1xf32>
    %103 = arith.mulf %96, %96 : vector<16x128xf32>
    %cst_49 = arith.constant dense<0.000000e+00> : vector<16xf32>
    %104 = vector.multi_reduction <add>, %103, %cst_49 [1] : vector<16x128xf32> to vector<16xf32>
    %105 = vector.shape_cast %104 : vector<16xf32> to vector<16x1xf32>
    %106 = tpu.concatenate %102, %105 in 1 : vector<16x1xf32>, vector<16x1xf32> -> vector<16x2xf32>
    %cst_50 = arith.constant dense<0.000000e+00> : vector<16x2xf32>
    %107 = tpu.matmul %0, %106, %cst_50 {dimension_numbers = #tpu.dot_dimension_numbers<[1], [0], [0], [1], [0, 0, 1, 1], [], []>} : vector<16x16xf32>, vector<16x2xf32>, vector<16x2xf32> -> vector<16x2xf32>
    %108 = vector.extract_strided_slice %107 {offsets = [0, 0], sizes = [16, 1], strides = [1, 1]} : vector<16x2xf32> to vector<16x1xf32>
    %109 = vector.extract_strided_slice %107 {offsets = [0, 1], sizes = [16, 1], strides = [1, 1]} : vector<16x2xf32> to vector<16x1xf32>
    %110 = arith.mulf %108, %108 : vector<16x1xf32>
    %111 = arith.subf %109, %110 : vector<16x1xf32>
    %112 = vector.broadcast %108 : vector<16x1xf32> to vector<16x128xf32>
    %113 = arith.subf %96, %112 : vector<16x128xf32>
    %cst_51 = arith.constant 9.99999974E-6 : f32
    %114 = vector.broadcast %cst_51 : f32 to vector<16x1xf32>
    %115 = arith.addf %111, %114 : vector<16x1xf32>
    %116 = math.rsqrt %115 : vector<16x1xf32>
    %117 = vector.broadcast %116 : vector<16x1xf32> to vector<16x128xf32>
    %118 = arith.mulf %113, %117 : vector<16x128xf32>
    %119 = vector.broadcast %97 : vector<16x1xf32> to vector<16x128xf32>
    %120 = arith.mulf %118, %119 : vector<16x128xf32>
    %121 = vector.broadcast %98 : vector<16x1xf32> to vector<16x128xf32>
    %122 = arith.addf %120, %121 : vector<16x128xf32>
    %123 = arith.negf %122 : vector<16x128xf32>
    %124 = math.exp %123 : vector<16x128xf32>
    %cst_52 = arith.constant 1.000000e+00 : f32
    %125 = vector.broadcast %cst_52 : f32 to vector<16x128xf32>
    %126 = arith.addf %125, %124 : vector<16x128xf32>
    %127 = arith.divf %125, %126 : vector<16x128xf32>
    %128 = arith.mulf %122, %127 : vector<16x128xf32>
    %cst_53 = arith.constant 0.000000e+00 : f32
    %129 = vector.broadcast %cst_53 : f32 to vector<16x1xf32>
    %130 = vector.extract_strided_slice %128 {offsets = [0, 0], sizes = [16, 127], strides = [1, 1]} : vector<16x128xf32> to vector<16x127xf32>
    %131 = tpu.concatenate %129, %130 in 1 : vector<16x1xf32>, vector<16x127xf32> -> vector<16x128xf32>
    %cst_54 = arith.constant 0.000000e+00 : f32
    %132 = vector.broadcast %cst_54 : f32 to vector<16x1xf32>
    %133 = vector.extract_strided_slice %128 {offsets = [0, 1], sizes = [16, 127], strides = [1, 1]} : vector<16x128xf32> to vector<16x127xf32>
    %134 = tpu.concatenate %133, %132 in 1 : vector<16x127xf32>, vector<16x1xf32> -> vector<16x128xf32>
    %135 = tpu.concatenate %131, %128, %134 in 0 : vector<16x128xf32>, vector<16x128xf32>, vector<16x128xf32> -> vector<48x128xf32>
    %cst_55 = arith.constant dense<0.000000e+00> : vector<16x128xf32>
    %136 = tpu.matmul %99, %135, %cst_55 {dimension_numbers = #tpu.dot_dimension_numbers<[1], [0], [0], [1], [0, 0, 1, 1], [], []>} : vector<16x48xf32>, vector<48x128xf32>, vector<16x128xf32> -> vector<16x128xf32>
    %137 = vector.broadcast %100 : vector<16x1xf32> to vector<16x128xf32>
    %138 = arith.addf %136, %137 : vector<16x128xf32>
    %c0_56 = arith.constant 0 : index
    %c0_57 = arith.constant 0 : index
    %139 = vector.load %arg17[%c0_56, %c0_57] : memref<16x1xf32, #tpu.memory_space<vmem>>, vector<16x1xf32>
    %c0_58 = arith.constant 0 : index
    %c0_59 = arith.constant 0 : index
    %140 = vector.load %arg18[%c0_58, %c0_59] : memref<16x1xf32, #tpu.memory_space<vmem>>, vector<16x1xf32>
    %c0_60 = arith.constant 0 : index
    %c0_61 = arith.constant 0 : index
    %141 = vector.load %arg19[%c0_60, %c0_61] : memref<16x48xf32, #tpu.memory_space<vmem>>, vector<16x48xf32>
    %c0_62 = arith.constant 0 : index
    %c0_63 = arith.constant 0 : index
    %142 = vector.load %arg20[%c0_62, %c0_63] : memref<16x1xf32, #tpu.memory_space<vmem>>, vector<16x1xf32>
    %cst_64 = arith.constant dense<0.000000e+00> : vector<16xf32>
    %143 = vector.multi_reduction <add>, %138, %cst_64 [1] : vector<16x128xf32> to vector<16xf32>
    %144 = vector.shape_cast %143 : vector<16xf32> to vector<16x1xf32>
    %145 = arith.mulf %138, %138 : vector<16x128xf32>
    %cst_65 = arith.constant dense<0.000000e+00> : vector<16xf32>
    %146 = vector.multi_reduction <add>, %145, %cst_65 [1] : vector<16x128xf32> to vector<16xf32>
    %147 = vector.shape_cast %146 : vector<16xf32> to vector<16x1xf32>
    %148 = tpu.concatenate %144, %147 in 1 : vector<16x1xf32>, vector<16x1xf32> -> vector<16x2xf32>
    %cst_66 = arith.constant dense<0.000000e+00> : vector<16x2xf32>
    %149 = tpu.matmul %0, %148, %cst_66 {dimension_numbers = #tpu.dot_dimension_numbers<[1], [0], [0], [1], [0, 0, 1, 1], [], []>} : vector<16x16xf32>, vector<16x2xf32>, vector<16x2xf32> -> vector<16x2xf32>
    %150 = vector.extract_strided_slice %149 {offsets = [0, 0], sizes = [16, 1], strides = [1, 1]} : vector<16x2xf32> to vector<16x1xf32>
    %151 = vector.extract_strided_slice %149 {offsets = [0, 1], sizes = [16, 1], strides = [1, 1]} : vector<16x2xf32> to vector<16x1xf32>
    %152 = arith.mulf %150, %150 : vector<16x1xf32>
    %153 = arith.subf %151, %152 : vector<16x1xf32>
    %154 = vector.broadcast %150 : vector<16x1xf32> to vector<16x128xf32>
    %155 = arith.subf %138, %154 : vector<16x128xf32>
    %cst_67 = arith.constant 9.99999974E-6 : f32
    %156 = vector.broadcast %cst_67 : f32 to vector<16x1xf32>
    %157 = arith.addf %153, %156 : vector<16x1xf32>
    %158 = math.rsqrt %157 : vector<16x1xf32>
    %159 = vector.broadcast %158 : vector<16x1xf32> to vector<16x128xf32>
    %160 = arith.mulf %155, %159 : vector<16x128xf32>
    %161 = vector.broadcast %139 : vector<16x1xf32> to vector<16x128xf32>
    %162 = arith.mulf %160, %161 : vector<16x128xf32>
    %163 = vector.broadcast %140 : vector<16x1xf32> to vector<16x128xf32>
    %164 = arith.addf %162, %163 : vector<16x128xf32>
    %165 = arith.negf %164 : vector<16x128xf32>
    %166 = math.exp %165 : vector<16x128xf32>
    %cst_68 = arith.constant 1.000000e+00 : f32
    %167 = vector.broadcast %cst_68 : f32 to vector<16x128xf32>
    %168 = arith.addf %167, %166 : vector<16x128xf32>
    %169 = arith.divf %167, %168 : vector<16x128xf32>
    %170 = arith.mulf %164, %169 : vector<16x128xf32>
    %cst_69 = arith.constant 0.000000e+00 : f32
    %171 = vector.broadcast %cst_69 : f32 to vector<16x1xf32>
    %172 = vector.extract_strided_slice %170 {offsets = [0, 0], sizes = [16, 127], strides = [1, 1]} : vector<16x128xf32> to vector<16x127xf32>
    %173 = tpu.concatenate %171, %172 in 1 : vector<16x1xf32>, vector<16x127xf32> -> vector<16x128xf32>
    %cst_70 = arith.constant 0.000000e+00 : f32
    %174 = vector.broadcast %cst_70 : f32 to vector<16x1xf32>
    %175 = vector.extract_strided_slice %170 {offsets = [0, 1], sizes = [16, 127], strides = [1, 1]} : vector<16x128xf32> to vector<16x127xf32>
    %176 = tpu.concatenate %175, %174 in 1 : vector<16x127xf32>, vector<16x1xf32> -> vector<16x128xf32>
    %177 = tpu.concatenate %173, %170, %176 in 0 : vector<16x128xf32>, vector<16x128xf32>, vector<16x128xf32> -> vector<48x128xf32>
    %cst_71 = arith.constant dense<0.000000e+00> : vector<16x128xf32>
    %178 = tpu.matmul %141, %177, %cst_71 {dimension_numbers = #tpu.dot_dimension_numbers<[1], [0], [0], [1], [0, 0, 1, 1], [], []>} : vector<16x48xf32>, vector<48x128xf32>, vector<16x128xf32> -> vector<16x128xf32>
    %179 = vector.broadcast %142 : vector<16x1xf32> to vector<16x128xf32>
    %180 = arith.addf %178, %179 : vector<16x128xf32>
    %181 = arith.addf %96, %180 : vector<16x128xf32>
    %c0_72 = arith.constant 0 : index
    %c0_73 = arith.constant 0 : index
    %c0_74 = arith.constant 0 : index
    %182 = vector.load %arg21[%c0_72, %c0_73, %c0_74] : memref<1x16x128xf32, #tpu.memory_space<vmem>>, vector<1x16x128xf32>
    %183 = vector.shape_cast %182 : vector<1x16x128xf32> to vector<16x128xf32>
    %184 = vector.shape_cast %181 : vector<16x128xf32> to vector<1x16x128xf32>
    tpu.vector_store %arg21[%c0_72, %c0_73, %c0_74], %184 {strides = array<i32>} : memref<1x16x128xf32, #tpu.memory_space<vmem>>, vector<1x16x128xf32>,
    return
  }
  func.func @transform_0(%arg0: i32) -> (i32, i32, i32) {
    %c0_i32 = arith.constant 0 : i32
    %c0_i32_0 = arith.constant 0 : i32
    %c0_i32_1 = arith.constant 0 : i32
    return %arg0, %c0_i32, %c0_i32_0 : i32, i32, i32
  }
  func.func @transform_1(%arg0: i32) -> (i32, i32) {
    %c0_i32 = arith.constant 0 : i32
    %c0_i32_0 = arith.constant 0 : i32
    %c0_i32_1 = arith.constant 0 : i32
    return %c0_i32, %c0_i32_0 : i32, i32
  }
  func.func @transform_2(%arg0: i32) -> (i32, i32) {
    %c0_i32 = arith.constant 0 : i32
    %c0_i32_0 = arith.constant 0 : i32
    %c0_i32_1 = arith.constant 0 : i32
    return %c0_i32, %c0_i32_0 : i32, i32
  }
  func.func @transform_3(%arg0: i32) -> (i32, i32) {
    %c0_i32 = arith.constant 0 : i32
    %c0_i32_0 = arith.constant 0 : i32
    %c0_i32_1 = arith.constant 0 : i32
    return %c0_i32, %c0_i32_0 : i32, i32
  }
  func.func @transform_4(%arg0: i32) -> (i32, i32) {
    %c0_i32 = arith.constant 0 : i32
    %c0_i32_0 = arith.constant 0 : i32
    %c0_i32_1 = arith.constant 0 : i32
    return %c0_i32, %c0_i32_0 : i32, i32
  }
  func.func @transform_5(%arg0: i32) -> (i32, i32) {
    %c0_i32 = arith.constant 0 : i32
    %c0_i32_0 = arith.constant 0 : i32
    %c0_i32_1 = arith.constant 0 : i32
    return %c0_i32, %c0_i32_0 : i32, i32
  }
  func.func @transform_6(%arg0: i32) -> (i32, i32) {
    %c0_i32 = arith.constant 0 : i32
    %c0_i32_0 = arith.constant 0 : i32
    %c0_i32_1 = arith.constant 0 : i32
    return %c0_i32, %c0_i32_0 : i32, i32
  }
  func.func @transform_7(%arg0: i32) -> (i32, i32) {
    %c0_i32 = arith.constant 0 : i32
    %c0_i32_0 = arith.constant 0 : i32
    %c0_i32_1 = arith.constant 0 : i32
    return %c0_i32, %c0_i32_0 : i32, i32
  }
  func.func @transform_8(%arg0: i32) -> (i32, i32) {
    %c0_i32 = arith.constant 0 : i32
    %c0_i32_0 = arith.constant 0 : i32
    %c0_i32_1 = arith.constant 0 : i32
    return %c0_i32, %c0_i32_0 : i32, i32
  }
  func.func @transform_9(%arg0: i32) -> (i32, i32) {
    %c0_i32 = arith.constant 0 : i32
    %c0_i32_0 = arith.constant 0 : i32
    %c0_i32_1 = arith.constant 0 : i32
    return %c0_i32, %c0_i32_0 : i32, i32
  }
  func.func @transform_10(%arg0: i32) -> (i32, i32) {
    %c0_i32 = arith.constant 0 : i32
    %c0_i32_0 = arith.constant 0 : i32
    %c0_i32_1 = arith.constant 0 : i32
    return %c0_i32, %c0_i32_0 : i32, i32
  }
  func.func @transform_11(%arg0: i32) -> (i32, i32) {
    %c0_i32 = arith.constant 0 : i32
    %c0_i32_0 = arith.constant 0 : i32
    %c0_i32_1 = arith.constant 0 : i32
    return %c0_i32, %c0_i32_0 : i32, i32
  }
  func.func @transform_12(%arg0: i32) -> (i32, i32) {
    %c0_i32 = arith.constant 0 : i32
    %c0_i32_0 = arith.constant 0 : i32
    %c0_i32_1 = arith.constant 0 : i32
    return %c0_i32, %c0_i32_0 : i32, i32
  }
  func.func @transform_13(%arg0: i32) -> (i32, i32) {
    %c0_i32 = arith.constant 0 : i32
    %c0_i32_0 = arith.constant 0 : i32
    %c0_i32_1 = arith.constant 0 : i32
    return %c0_i32, %c0_i32_0 : i32, i32
  }
  func.func @transform_14(%arg0: i32) -> (i32, i32) {
    %c0_i32 = arith.constant 0 : i32
    %c0_i32_0 = arith.constant 0 : i32
    %c0_i32_1 = arith.constant 0 : i32
    return %c0_i32, %c0_i32_0 : i32, i32
  }
  func.func @transform_15(%arg0: i32) -> (i32, i32) {
    %c0_i32 = arith.constant 0 : i32
    %c0_i32_0 = arith.constant 0 : i32
    %c0_i32_1 = arith.constant 0 : i32
    return %c0_i32, %c0_i32_0 : i32, i32
  }
  func.func @transform_16(%arg0: i32) -> (i32, i32) {
    %c0_i32 = arith.constant 0 : i32
    %c0_i32_0 = arith.constant 0 : i32
    %c0_i32_1 = arith.constant 0 : i32
    return %c0_i32, %c0_i32_0 : i32, i32
  }
  func.func @transform_17(%arg0: i32) -> (i32, i32) {
    %c0_i32 = arith.constant 0 : i32
    %c0_i32_0 = arith.constant 0 : i32
    %c0_i32_1 = arith.constant 0 : i32
    return %c0_i32, %c0_i32_0 : i32, i32
  }
  func.func @transform_18(%arg0: i32) -> (i32, i32) {
    %c0_i32 = arith.constant 0 : i32
    %c0_i32_0 = arith.constant 0 : i32
    %c0_i32_1 = arith.constant 0 : i32
    return %c0_i32, %c0_i32_0 : i32, i32
  }
  func.func @transform_19(%arg0: i32) -> (i32, i32) {
    %c0_i32 = arith.constant 0 : i32
    %c0_i32_0 = arith.constant 0 : i32
    %c0_i32_1 = arith.constant 0 : i32
    return %c0_i32, %c0_i32_0 : i32, i32
  }
  func.func @transform_20(%arg0: i32) -> (i32, i32, i32) {
    %c0_i32 = arith.constant 0 : i32
    %c0_i32_0 = arith.constant 0 : i32
    %c0_i32_1 = arith.constant 0 : i32
    return %arg0, %c0_i32, %c0_i32_0 : i32, i32, i32
  }
}

</mosaic_0001>

<bundles_post_ra>
// kernel: tpu_custom_call.1
= control target key start
LH: loop header
LB: loop body
LE: loop exit
PB: predicated region body
PF: predicated region fallthrough
CT: control target
= control target key end

     0   :  { %6 = vsyncpa [#allocation3], 0  ;;  %s128_s0 = inlined_call_operand.hbm [shape: f32[8,128], index: 0, kind: input, shape index: {}]   ;;  %s129_s1 = inlined_call_operand.hbm [shape: f32[8,128], index: 1, kind: output, shape index: {}]  }
   0x1   :  { %7 = vsyncpa [#allocation4], 0  ;;  %s91_s6 = smov [#allocation2]   ;;  %s43_s10 = scalar_lea.hbm %s128_s0, 128 }
   0x2   :  { %s14_s7 = sshll.u32 %s91_s6, 4  ;;  %p44_p0 = scmp.ne.s32.totalorder %s128_s0, %s43_s10  ;;  %s15_s7 = int_to_ptr.vmem [resolvable:$true] %s14_s7 }
   0x3   :  { %p47_p1 = scmp.lt.u32.totalorder %s43_s10, %s128_s0 }
   0x5   :  { %p49_p2 = pnand %p47_p1, %p44_p0 }
   0x7   :  { %52 = shalt.err (!%p49_p2)
}
   0x8   :  { %s53_s15 = scalar_lea.vmem %s15_s7, 128  ;;  %p58_p4 = scmp.lt.s32.totalorder %s15_s7, %s15_s7 }
   0x9   :  { %p54_p3 = scmp.ne.s32.totalorder %s15_s7, %s53_s15  ;;  %p59_p5 = scmp.lt.s32.totalorder %s53_s15, %s53_s15 }
   0xb   :  { %p60_p6 = por %p59_p5, %p58_p4 }
   0xd   :  { %p61_p7 = pnand %p60_p6, %p54_p3 }
   0xf   :  { %64 = shalt.err (!%p61_p7)
}
  0x10   :  { %17 = dma.hbm_to_vmem [thread:$0]  %s128_s0, 128, %s15_s7, [#allocation3]  }
  0x11   :  { %87 = dma.done.wait [#allocation3], 128  }
  0x12   :  { %88 = vsyncadd [#allocation3], 4294967168  ;;  %v21_v0 = vld [vmem:[#allocation2] sm:$0xff]  ;;  %s92_s18 = smov 1   ;;  %s93_s19 = smov [#allocation5]  }
  0x13   :  { %22 = vrot.lane.b32.xlu0 %v21_v0, %s92_s18  ;;  %s31_s20 = sshll.u32 %s93_s19, 4  ;;  %s32_s20 = int_to_ptr.vmem [resolvable:$true] %s31_s20 }
  0x14   :  { %s65_s21 = scalar_lea.vmem %s32_s20, 128  ;;  %p70_p9 = scmp.lt.s32.totalorder %s32_s20, %s32_s20 }
  0x15   :  { %p66_p8 = scmp.ne.s32.totalorder %s32_s20, %s65_s21  ;;  %p71_p10 = scmp.lt.s32.totalorder %s65_s21, %s65_s21 }
  0x17   :  { %p72_p11 = por %p71_p10, %p70_p9 }
  0x19   :  { %p73_p12 = pnand %p72_p11, %p66_p8 }
  0x85   :  { %v23_v1 = vpop.permute.xlu0 %22 }
  0x86   :  { %24 = vst [vmem:[#allocation5] sm:$0xff] %v23_v1 }
  0x87   :  { %76 = shalt.err (!%p73_p12)
}
  0x88   :  { %s77_s0 = scalar_lea.hbm %s129_s1, 128 }
  0x89   :  { %p78_p13 = scmp.ne.s32.totalorder %s129_s1, %s77_s0  ;;  %p81_p0 = scmp.lt.u32.totalorder %s77_s0, %s129_s1 }
  0x8b   :  { %p83_p1 = pnand %p81_p0, %p78_p13 }
  0x8d   :  { %86 = shalt.err (!%p83_p1)
}
  0x8e   :  { %34 = dma.vmem_to_hbm [thread:$0]  %s32_s20, 128, %s129_s1, [#allocation4]  }
  0x8f   :  { %89 = dma.done.wait [#allocation4], 128  }
  0x90   :  { %90 = vsyncadd [#allocation4], 4294967168 }
  0x91   :  { %38 = vsyncpa [#allocation3], 1 }
  0x92   :  { %39 = vsyncpa [#allocation4], 1 }

// kernel: tpu_custom_call.1
= control target key start
LH: loop header
LB: loop body
LE: loop exit
PB: predicated region body
PF: predicated region fallthrough
CT: control target
= control target key end

     0   :  { %s3006_s0 = inlined_call_operand.vmem [shape: f32[2,16,130], index: 0, kind: input, shape index: {}]   ;;  %s3007_s1 = inlined_call_operand.vmem [shape: f32[16,16], index: 1, kind: input, shape index: {}]   ;;  %s3008_s2 = inlined_call_operand.vmem [shape: f32[16,48], index: 2, kind: input, shape index: {}]   ;;  %s3009_s3 = inlined_call_operand.vmem [shape: f32[16,1], index: 3, kind: input, shape index: {}]   ;;  %s3010_s4 = inlined_call_operand.vmem [shape: f32[16,1], index: 4, kind: input, shape index: {}]   ;;  %s3011_s5 = inlined_call_operand.vmem [shape: f32[16,1], index: 5, kind: input, shape index: {}]   ;;  %s3012_s6 = inlined_call_operand.vmem [shape: f32[16,48], index: 6, kind: input, shape index: {}]   ;;  %s3013_s7 = inlined_call_operand.vmem [shape: f32[16,1], index: 7, kind: input, shape index: {}]   ;;  %s3014_s8 = inlined_call_operand.vmem [shape: f32[16,1], index: 8, kind: input, shape index: {}]   ;;  %s3015_s9 = inlined_call_operand.vmem [shape: f32[16,1], index: 9, kind: input, shape index: {}]   ;;  %s3016_s10 = inlined_call_operand.vmem [shape: f32[16,48], index: 10, kind: input, shape index: {}]   ;;  %s3017_s11 = inlined_call_operand.vmem [shape: f32[16,1], index: 11, kind: input, shape index: {}]   ;;  %s3018_s12 = inlined_call_operand.vmem [shape: f32[16,1], index: 12, kind: input, shape index: {}]   ;;  %s3019_s13 = inlined_call_operand.vmem [shape: f32[16,1], index: 13, kind: input, shape index: {}]   ;;  %s3020_s14 = inlined_call_operand.vmem [shape: f32[16,48], index: 14, kind: input, shape index: {}]   ;;  %s3021_s15 = inlined_call_operand.vmem [shape: f32[16,1], index: 15, kind: input, shape index: {}]   ;;  %s3022_s16 = inlined_call_operand.vmem [shape: f32[16,1], index: 16, kind: input, shape index: {}]   ;;  %s3023_s17 = inlined_call_operand.vmem [shape: f32[16,1], index: 17, kind: input, shape index: {}]   ;;  %s3024_s18 = inlined_call_operand.vmem [shape: f32[16,48], index: 18, kind: input, shape index: {}]   ;;  %s3025_s19 = inlined_call_operand.vmem [shape: f32[16,1], index: 19, kind: input, shape index: {}]   ;;  %s3026_s20 = inlined_call_operand.hbm [shape: f32[2,16,128], index: 20, kind: output, shape index: {}]  }
   0x1   :  { %3036 = sst [smem:[#allocation9_spill]] %s3006_s0 }
   0x2   :  { %3037 = sst [smem:[#allocation10_spill]] %s3007_s1 }
   0x3   :  { %3038 = sst [smem:[#allocation11_spill]] %s3008_s2 }
   0x4   :  { %3039 = sst [smem:[#allocation12_spill]] %s3009_s3 }
   0x5   :  { %3040 = sst [smem:[#allocation13_spill]] %s3010_s4 }
   0x6   :  { %3041 = sst [smem:[#allocation14_spill]] %s3011_s5 }
   0x7   :  { %3042 = sst [smem:[#allocation15_spill]] %s3012_s6 }
   0x8   :  { %3043 = sst [smem:[#allocation16_spill]] %s3013_s7 }
   0x9   :  { %25 = vsyncpa [#allocation3], 0 }
   0xa   :  { %27 = vsyncpa [#allocation3 + $0x1], 0  ;;  %s2642_s1 = smov 0   ;;  %s2644_s22 = smov 0  }
   0xb   :  { %s2646_s23 = smov 0   ;;  %s2648_s24 = smov 0  }
   0xc LB: > { %3044 = sst [smem:[#allocation5_spill]] %s2523_s23  ;;  %s2663_s2 = sadd.s32 4294967295, %s2527_s24   ;;  %s2527_s24 = sphi %s2648_s24, %s3063_s24   ;;  %s2523_s23 = sphi %s2646_s23, %s3065_s23   ;;  %s2519_s22 = sphi %s2644_s22, %s3067_s22   ;;  %s2515_s1 = sphi %s2642_s1, %s3066_s1  }
   0xd   : > { %s1978_s25 = sadd.s32 4294967294, %s2527_s24   ;;  %s2667_s3 = sadd.s32 1, %s2527_s24  }
   0xe   : > { %3045 = sst [smem:[#allocation6_spill]] %s2667_s3  ;;  %s465_s26 = sadd.s32 1, %s2523_s23 }
   0xf   : > { %s462_s27 = ssub.s32 %s2527_s24, %s2667_s3  ;;  %p475_p0 = scmp.ne.s32.totalorder %s2523_s23, %s2519_s22 }
  0x10   : > { %p463_p1 = scmp.eq.s32.totalorder %s462_s27, 0  ;;  %p476_p2 = scmp.eq.s32.totalorder %s2663_s2, 1 }
  0x11   : > { %p481_p3 = scmp.ne.s32.totalorder %s2519_s22, %s2515_s1  ;;  %p482_p4 = scmp.eq.s32.totalorder %s1978_s25, 1 }
  0x12   : > { %s2678_s28 = scalar_select %p463_p1, %s2523_s23, %s465_s26  }
  0x13   : > { %p2680_p5 = por %p476_p2, %p475_p0  ;;  %p2684_p6 = por %p482_p4, %p481_p3 }
  0x14   : > { %3046 = sst [smem:[#allocation7_spill]] %s2678_s28  ;;  %p1981_p7 = scmp.ge.s32.totalorder %s2527_s24, 1 }
  0x15   : > { %s3048_s29 = scalar_select %p2684_p6, 1, 0 }
  0x16   : > { %p565_p8 = scmp.lt.s32.totalorder %s2527_s24, 3 }
  0x17   : > { %3049 = sst [smem:[#allocation8_spill]] %s3048_s29 }
  0x18   : > { %p566_p9 = pnand %p1981_p7, %p565_p8 }
  0x19   : > { %p623_p10 = scmp.lt.s32.totalorder (!%p566_p9), %s2663_s2, 1  ;;  %s3050_s26 = sld [smem:[#allocation9_spill]] (!%p566_p9)  ;;  %vm678_vm0 = vcmask (!%p566_p9), 392192   ;;  %v2531_v8 = vmov (!%p566_p9), 0   ;;  %vm646_vm1 = vcmask (!%p566_p9), 1039360   ;;  %vm659_vm2 = vcmask (!%p566_p9), 1031168  }
  0x1a   : > { %569 = sbr.rel (%p566_p9) target bundleno = 4442 (0x115a), region = 100  ;;  %s2529_s28 = smov (!%p566_p9), 126   ;;  %2360 = vset.pattern.permute.xlu1 (!%p566_p9), %v2531_v8  ;;  %2359 = vset.pattern.permute.xlu0 (!%p566_p9), %v2531_v8  ;;  %vm781_vm3 = vcmask (!%p566_p9), 130048   ;;  %vm778_vm4 = vcmask (!%p566_p9), 7168   ;;  %v2533_v53 = vmov (!%p566_p9), 1   ;;  %vm2784_vm7 = vmpackc.low (!%p566_p9), %vm646_vm1, %vm646_vm1 }
  0x1b   : > { %s2530_s23 = smov (!%p566_p9), 127   ;;  %s3052_s25 = sld [smem:[#allocation12_spill]] (!%p566_p9)  ;;  %vm1991_vm5 = vmneg (!%p566_p9), %vm778_vm4 }
  0x1c   : > { %s3053_s21 = sld [smem:[#allocation10_spill]] (!%p566_p9)  ;;  %s2532_s3 = smov (!%p566_p9), 1   ;;  %vm2774_vm6 = vmpackc.low (!%p566_p9), %vm1991_vm5, %vm1991_vm5 }
  0x1d   : > { %s3055_s5 = sld [smem:[#allocation14_spill]] (!%p566_p9)  ;;  %s3056_s6 = sld [smem:[#allocation15_spill]] (!%p566_p9) }
  0x1e   : > { %s3057_s7 = sld [smem:[#allocation16_spill]] (!%p566_p9) }
  0x21   : > { %s624_s30 = scalar_select %p623_p10, %s2663_s2, 1  ;;  %v667_v9 = vld [vmem:[%s3052_s25 + $0x8] sm:$0xff]  ;;  %v666_v10 = vld [vmem:[%s3052_s25] sm:$0xff] }
  0x22   : > { %v2728_v38 = vld [vmem:[%s3053_s21] sm:$0xff]  ;;  %v2737_v46 = vld [vmem:[%s3053_s21 + $0x8] sm:$0xff] }
  0x23   : > { %s2040_s0 = sshll.u32 %s624_s30, 5  ;;  %s3051_s30 = sld [smem:[#allocation11_spill]]  ;;  %2117 = vmatprep.mubr.msk.f32.mxu1 %vm781_vm3, %v2728_v38  ;;  %v762_v62 = vld [vmem:[%s3055_s5] sm:$0xff]  ;;  %v763_v63 = vld [vmem:[%s3055_s5 + $0x8] sm:$0xff] }
  0x24   : > { %s627_s27 = scalar_lea.vmem %s3050_s26, %s2040_s0  ;;  %s3054_s0 = sld [smem:[#allocation13_spill]] }
  0x25   : > { %v630_v0 = vld [vmem:[%s627_s27] sm:$0xff]  ;;  %v631_v1 = vld [vmem:[%s627_s27 + $0x8] sm:$0xff]  ;;  %v632_v2 = vld [vmem:[%s627_s27 + $0x10] sm:$0xff]  ;;  %s620_s5 = sand.u32 1, %s2519_s22   ;;  %s2041_s26 = sshll.u32 %s2663_s2, 8 }
  0x26   : > { %v2349_v3 = vpack.i.bf16 %v631_v1, %v630_v0  ;;  %v633_v4 = vld [vmem:[%s627_s27 + $0x18] sm:$0xff]  ;;  %v2201_v5 = vpack.c.bf16 %v632_v2, %v630_v0  ;;  %s2965_s2 = scalar_lea.sflag [#allocation3], %s620_s5 }
  0x27   : > { %v2354_v6 = vpack.i.bf16 %v633_v4, %v632_v2 }
  0x28   : > { %2350 = vrot.lane.b32.xlu1 %v2349_v3, %s2529_s28  ;;  %2340 = vrot.lane.b32.xlu0 %v2349_v3, %s2530_s23 }
  0x29   : > { %2202 = vmatprep.subr.bf16.mxu0 %v2201_v5  ;;  %v664_v7 = vld [vmem:[%s3051_s30] sm:$0xff]  ;;  %v665_v29 = vld [vmem:[%s3051_s30 + $0x8] sm:$0xff] }
  0x2a   : > { %2204 = vmatpush3.bf16.msra.mxu0 %v2201_v5  ;;  %2110 = vmatprep.mubr.msk.f32.mxu0 %vm678_vm0, %v664_v7  ;;  %v760_v51 = vld [vmem:[%s3054_s0] sm:$0xff]  ;;  %v761_v52 = vld [vmem:[%s3054_s0 + $0x8] sm:$0xff]  ;;  %s1982_s0 = sshll.u32 %s620_s5, 4 }
  0x2c   : > { %2355 = vrot.lane.b32.xlu1 %v2354_v6, %s2529_s28  ;;  %2345 = vrot.lane.b32.xlu0 %v2354_v6, %s2530_s23  ;;  %s622_s28 = scalar_lea.vmem [#allocation2], %s1982_s0 }
  0x2d   : > { %s1916_s29 = sshll.u32 %s622_s28, 4  ;;  %s2957_s29 = int_to_ptr.vmem [resolvable:$true] %s1916_s29 }
  0x2e   : > { %s2465_s0 = scalar_lea.vmem %s2957_s29, 256 }
  0x2f   : > { %p2466_p11 = scmp.ne.s32.totalorder %s2957_s29, %s2465_s0 }
  0x30   : > { %675 = vperm.xlu1 %2360, %v667_v9   ;;  %670 = vperm.xlu0 %2359, %v666_v10  }
  0x31   : > { %p2467_p12 = pnand %p2466_p11, %p2680_p5 }
  0x33   : > { %p2468_p13 = pneg %p2467_p12 }
  0x9a   : > { %v2351_v11 = vpop.permute.xlu1 %2350  ;;  %v2341_v12 = vpop.permute.xlu0 %2340 }
  0x9b   : > { %v2353_v13 = vunpack.i.h.bf16 %v2351_v11  ;;  %v2352_v14 = vunpack.i.l.bf16 %v2351_v11  ;;  %v2343_v15 = vunpack.i.h.bf16 %v2341_v12  ;;  %v2342_v16 = vunpack.i.l.bf16 %v2341_v12 }
  0x9d   : > { %v647_v23 = vsel %vm646_vm1, %v2342_v16, %v2343_v15  ;;  %v660_v25 = vsel %vm659_vm2, %v2352_v14, %v2353_v13 }
  0x9e   : > { %v2356_v17 = vpop.permute.xlu1 %2355  ;;  %v2346_v18 = vpop.permute.xlu0 %2345 }
  0x9f   : > { %v2358_v19 = vunpack.i.h.bf16 %v2356_v17  ;;  %v2357_v20 = vunpack.i.l.bf16 %v2356_v17  ;;  %v2348_v21 = vunpack.i.h.bf16 %v2346_v18  ;;  %v2347_v22 = vunpack.i.l.bf16 %v2346_v18 }
  0xa1   : > { %v648_v24 = vsel %vm646_vm1, %v2347_v22, %v2348_v21  ;;  %v661_v26 = vsel %vm659_vm2, %v2357_v20, %v2358_v19 }
  0xa2   : > { %v2205_v27 = vpack.c.bf16 %v648_v24, %v647_v23  ;;  %v2209_v28 = vpack.c.bf16 %v661_v26, %v660_v25 }
  0xa4   : > { %2206 = vmatprep.subr.bf16.mxu0 %v2205_v27 }
  0xa5   : > { %2208 = vmatpush3.bf16.msra.mxu0 %v2205_v27 }
  0xa6   : > { %2210 = vmatprep.subr.bf16.mxu0 %v2209_v28 }
  0xa9   : > { %2212 = vmatpush3.bf16.msra.mxu0 %v2209_v28 }
  0xac   : > { %2111 = vmatmul.mubr.msk.f32.vlgmr.msra.gmra.mrb[0].mxu0 %vm678_vm0, %v665_v29  ;;  %v764_v29 = vld [vmem:[%s3056_s6] sm:$0xff] }
  0xaf   : > { %v676_v30 = vpop.permute.xlu1 %675  ;;  %v671_v31 = vpop.permute.xlu0 %670 }
 0x17f   : > { %v2112_v32 = vpop.f32.mrb[0].mxu0 }
 0x180   : > { %v2715_v33 = vadd.f32 %v2112_v32, %v676_v30  ;;  %v751_v34 = vpop.f32.mrb[1].mxu0  ;;  %v767_v30 = vld [vmem:[%s3057_s7 + $0x8] sm:$0xff] }
 0x181   : > { %v2717_v35 = vadd.f32 %v751_v34, %v671_v31  ;;  %v766_v31 = vld [vmem:[%s3057_s7] sm:$0xff] }
 0x182   : > { %770 = vadd.xlane.f32.xlu0 %v2715_v33  ;;  %v773_v37 = vmul.f32 %v2715_v33, %v2715_v33 }
 0x183   : > { %768 = vadd.xlane.f32.xlu1 %v2717_v35  ;;  %v772_v36 = vmul.f32 %v2717_v35, %v2717_v35 }
 0x186   : > { %774 = vadd.xlane.f32.xlu0 %v772_v36 }
 0x187   : > { %776 = vadd.xlane.f32.xlu1 %v773_v37 }
 0x20f   : > { %v771_v39 = vpop.xlane.xlu0 %770 }
 0x210   : > { %v769_v40 = vpop.xlane.xlu1 %768 }
 0x213   : > { %v775_v41 = vpop.xlane.xlu0 %774 }
 0x214   : > { %v779_v42 = vsel %vm778_vm4, %v769_v40, %v775_v41  ;;  %v777_v43 = vpop.xlane.xlu1 %776 }
 0x215   : > { %v780_v44 = vsel %vm778_vm4, %v771_v39, %v777_v43 }
 0x216   : > { %v2213_v45 = vpack.c.bf16 %v780_v44, %v779_v42 }
 0x218   : > { %2214 = vmatprep.subr.bf16.mxu1 %v2213_v45 }
 0x219   : > { %2216 = vmatpush3.bf16.msra.mxu1 %v2213_v45  ;;  %v765_v45 = vld [vmem:[%s3056_s6 + $0x8] sm:$0xff]  ;;  %s2534_s6 = smov [#allocation2]  }
 0x21a   : > { %s2469_s7 = sshll.u32 %s2534_s6, 4  ;;  %s2470_s7 = int_to_ptr.vmem [resolvable:$false] %s2469_s7 }
 0x21b   : > { %s2471_s27 = scalar_lea.vmem %s2470_s7, 512  ;;  %p2472_p0 = scmp.lt.s32.totalorder %s2957_s29, %s2470_s7 }
 0x21c   : > { %2118 = vmatmul.mubr.msk.f32.vlgmr.msra.gmra.mrb[0].mxu1 %vm781_vm3, %v2737_v46  ;;  %p2473_p1 = scmp.lt.s32.totalorder %s2471_s27, %s2465_s0 }
 0x21d   : > { %2132 = vmatprep.mubr.msk.f32.mxu1 %vm678_vm0, %v764_v29 }
 0x21e   : > { %p2474_p2 = por %p2473_p1, %p2472_p0 }
 0x220   : > { %p2475_p3 = pnand %p2474_p2, %p2468_p13 }
 0x2ef   : > { %v2119_v47 = vpop.f32.mrb[0].mxu1 }
 0x2f0   : > { %v864_v48 = vmul.f32 %v2119_v47, %v2119_v47  ;;  %v854_v49 = vpop.f32.mrb[1].mxu1 }
 0x2f1   : > { %v863_v50 = vmul.f32 %v854_v49, %v854_v49 }
 0x2f2   : > { %869 = vrot.lane.b32.xlu1 %v864_v48, %s2532_s3 }
 0x2f3   : > { %867 = vrot.lane.b32.xlu0 %v863_v50, %s2532_s3 }
 0x2f6   : > { %877 = vperm.xlu1 %2360, %v854_v49  }
 0x2f7   : > { %882 = vperm.xlu0 %2359, %v2119_v47  }
 0x2fa   : > { %905 = vperm.xlu1 %2360, %v760_v51  }
 0x2fb   : > { %2361 = vset.pattern.permute.xlu0 %v2533_v53 }
 0x2fe   : > { %910 = vperm.xlu1 %2360, %v761_v52  }
 0x302   : > { %2363 = vset.pattern.permute.xlu1 %v2533_v53 }
 0x364   : > { %v870_v54 = vpop.permute.xlu1 %869 }
 0x365   : > { %v874_v55 = vsub.f32 %v2119_v47, %v870_v54  ;;  %v868_v56 = vpop.permute.xlu0 %867 }
 0x366   : > { %v873_v57 = vsub.f32 %v854_v49, %v868_v56 }
 0x367   : > { %v888_v58 = vadd.f32 1e-05, %v874_v55 }
 0x368   : > { %v887_v59 = vadd.f32 1e-05, %v873_v57 }
 0x369   : > { %2417 = vrsqrt.f32 %v888_v58 }
 0x36a   : > { %2419 = vrsqrt.f32 %v887_v59 }
 0x373   : > { %v2418_v60 = vpop.eup %2417 }
 0x374   : > { %v2420_v61 = vpop.eup %2419  ;;  %898 = vperm.xlu0 %2361, %v2418_v60  }
 0x375   : > { %893 = vperm.xlu1 %2363, %v2420_v61   ;;  %v878_v0 = vpop.permute.xlu1 %877 }
 0x376   : > { %v883_v2 = vpop.permute.xlu0 %882  ;;  %v885_v5 = vsub.f32 %v2717_v35, %v878_v0 }
 0x377   : > { %v886_v4 = vsub.f32 %v2715_v33, %v883_v2 }
 0x378   : > { %2362 = vset.pattern.permute.xlu0 %v2531_v8 }
 0x379   : > { %917 = vperm.xlu0 %2362, %v762_v62   ;;  %2364 = vset.pattern.permute.xlu1 %v2531_v8  ;;  %v906_v1 = vpop.permute.xlu1 %905 }
 0x37a   : > { %922 = vperm.xlu1 %2364, %v763_v63  }
 0x37d   : > { %v911_v3 = vpop.permute.xlu1 %910 }
 0x3f3   : > { %v899_v6 = vpop.permute.xlu0 %898 }
 0x3f4   : > { %v902_v7 = vmul.f32 %v899_v6, %v886_v4  ;;  %v894_v9 = vpop.permute.xlu1 %893  ;;  %v1051_v4 = vld [vmem:[%s3014_s8 + $0x8] sm:$0xff] }
 0x3f5   : > { %v901_v10 = vmul.f32 %v894_v9, %v885_v5 }
 0x3f6   : > { %v914_v13 = vmul.f32 %v911_v3, %v902_v7  ;;  %v1050_v3 = vld [vmem:[%s3014_s8] sm:$0xff] }
 0x3f7   : > { %v913_v11 = vmul.f32 %v906_v1, %v901_v10 }
 0x3f8   : > { %v918_v12 = vpop.permute.xlu0 %917 }
 0x3f9   : > { %v925_v14 = vadd.f32 %v918_v12, %v913_v11  ;;  %v923_v15 = vpop.permute.xlu1 %922 }
 0x3fa   : > { %v926_v16 = vadd.f32 %v923_v15, %v914_v13  ;;  %v1053_v15 = vld [vmem:[%s3015_s9 + $0x8] sm:$0xff] }
 0x3fb   : > { %v1989_v17 = vmul.f32 -1.442695, %v925_v14 }
 0x3fc   : > { %v1990_v18 = vmul.f32 -1.442695, %v926_v16 }
 0x3fd   : > { %2421 = vpow2.f32 %v1989_v17 }
 0x3fe   : > { %2423 = vpow2.f32 %v1990_v18 }
 0x407   : > { %v2422_v19 = vpop.eup %2421 }
 0x408   : > { %v2424_v20 = vpop.eup %2423  ;;  %v933_v21 = vadd.f32 1.0, %v2422_v19 }
 0x409   : > { %v934_v22 = vadd.f32 1.0, %v2424_v20 }
 0x40a   : > { %2425 = vrcp.f32 %v933_v21 }
 0x40b   : > { %2427 = vrcp.f32 %v934_v22 }
 0x414   : > { %v2426_v23 = vpop.eup %2425 }
 0x415   : > { %v2428_v24 = vpop.eup %2427  ;;  %v939_v25 = vmul.f32 %v2426_v23, %v925_v14  ;;  %v1052_v14 = vld [vmem:[%s3015_s9] sm:$0xff] }
 0x416   : > { %v940_v26 = vmul.f32 %v2428_v24, %v926_v16 }
 0x418   : > { %v2370_v27 = vpack.i.bf16 %v940_v26, %v939_v25  ;;  %v2223_v28 = vpack.c.bf16 %v940_v26, %v939_v25 }
 0x41a   : > { %2371 = vrot.lane.b32.xlu0 %v2370_v27, %s2530_s23  ;;  %2366 = vrot.lane.b32.xlu1 %v2370_v27, %s2532_s3 }
 0x41e   : > { %966 = vperm.xlu0 %2362, %v767_v30   ;;  %961 = vperm.xlu1 %2364, %v766_v31  }
 0x48c   : > { %v2367_v32 = vpop.permute.xlu1 %2366  ;;  %v2372_v37 = vpop.permute.xlu0 %2371 }
 0x48d   : > { %v2369_v34 = vunpack.i.h.bf16 %v2367_v32  ;;  %v2368_v36 = vunpack.i.l.bf16 %v2367_v32  ;;  %v2374_v41 = vunpack.i.h.bf16 %v2372_v37  ;;  %v2373_v42 = vunpack.i.l.bf16 %v2372_v37 }
 0x48f   : > { %v2217_v40 = vpack.c.bf16 %v2369_v34, %v2368_v36  ;;  %v2227_v44 = vpack.c.bf16 %v2374_v41, %v2373_v42 }
 0x491   : > { %2219 = vmatprep.subr.msk.bf16.mxu1 %vm2774_vm6, %v2217_v40 }
 0x492   : > { %2222 = vmatpush3.bf16.msk.msra.mxu1 %vm2774_vm6, %v2217_v40 }
 0x493   : > { %2224 = vmatprep.subr.bf16.mxu1 %v2223_v28 }
 0x496   : > { %2226 = vmatpush3.bf16.msra.mxu1 %v2223_v28 }
 0x497   : > { %2229 = vmatprep.subr.msk.bf16.mxu1 %vm2784_vm7, %v2227_v44 }
 0x49a   : > { %2232 = vmatpush3.bf16.msk.msra.mxu1 %vm2784_vm7, %v2227_v44 }
 0x49d   : > { %2133 = vmatmul.mubr.msk.f32.vlgmr.msra.gmra.mrb[2].mxu1 %vm678_vm0, %v765_v45  ;;  %v967_v47 = vpop.permute.xlu0 %966  ;;  %v962_v49 = vpop.permute.xlu1 %961 }
 0x49e   : > { %2139 = vmatprep.mubr.msk.f32.mxu1 %vm781_vm3, %v2728_v38 }
 0x570   : > { %v2134_v48 = vpop.f32.mrb[2].mxu1 }
 0x571   : > { %v1047_v50 = vadd.f32 %v2134_v48, %v967_v47  ;;  %v1041_v51 = vpop.f32.mrb[3].mxu1 }
 0x572   : > { %v1042_v52 = vadd.f32 %v1041_v51, %v962_v49  ;;  %v1057_v51 = vld [vmem:[%s3017_s11 + $0x8] sm:$0xff] }
 0x573   : > { %1060 = vadd.xlane.f32.xlu0 %v1047_v50  ;;  %v1063_v55 = vmul.f32 %v1047_v50, %v1047_v50 }
 0x574   : > { %1058 = vadd.xlane.f32.xlu1 %v1042_v52  ;;  %v1062_v54 = vmul.f32 %v1042_v52, %v1042_v52 }
 0x577   : > { %1064 = vadd.xlane.f32.xlu0 %v1062_v54 }
 0x578   : > { %1066 = vadd.xlane.f32.xlu1 %v1063_v55 }
 0x600   : > { %v1061_v56 = vpop.xlane.xlu0 %1060 }
 0x601   : > { %v1059_v57 = vpop.xlane.xlu1 %1058 }
 0x604   : > { %v1065_v58 = vpop.xlane.xlu0 %1064 }
 0x605   : > { %v1068_v59 = vsel %vm778_vm4, %v1059_v57, %v1065_v58  ;;  %v1067_v60 = vpop.xlane.xlu1 %1066 }
 0x606   : > { %v1069_v61 = vsel %vm778_vm4, %v1061_v56, %v1067_v60 }
 0x607   : > { %v2233_v62 = vpack.c.bf16 %v1069_v61, %v1068_v59 }
 0x609   : > { %2234 = vmatprep.subr.bf16.mxu1 %v2233_v62 }
 0x60a   : > { %2236 = vmatpush3.bf16.msra.mxu1 %v2233_v62  ;;  %v1055_v62 = vld [vmem:[%s3016_s10 + $0x8] sm:$0xff] }
 0x60d   : > { %2140 = vmatmul.mubr.msk.f32.vlgmr.msra.gmra.mrb[4].mxu1 %vm781_vm3, %v2737_v46 }
 0x60e   : > { %2161 = vmatprep.mubr.msk.f32.mxu1 %vm781_vm3, %v2728_v38 }
 0x6e0   : > { %v2141_v63 = vpop.f32.mrb[4].mxu1 }
 0x6e1   : > { %v1146_v0 = vmul.f32 %v2141_v63, %v2141_v63  ;;  %v1136_v1 = vpop.f32.mrb[5].mxu1 }
 0x6e2   : > { %v1145_v2 = vmul.f32 %v1136_v1, %v1136_v1 }
 0x6e3   : > { %1151 = vrot.lane.b32.xlu1 %v1146_v0, %s2532_s3 }
 0x6e4   : > { %1149 = vrot.lane.b32.xlu0 %v1145_v2, %s2532_s3 }
 0x6e7   : > { %1159 = vperm.xlu1 %2364, %v1136_v1  }
 0x6e8   : > { %1164 = vperm.xlu0 %2362, %v2141_v63  }
 0x6eb   : > { %1187 = vperm.xlu1 %2364, %v1050_v3  }
 0x6ec   : > { %2375 = vset.pattern.permute.xlu0 %v2533_v53 }
 0x6ef   : > { %1192 = vperm.xlu1 %2364, %v1051_v4  }
 0x6f3   : > { %2377 = vset.pattern.permute.xlu1 %v2533_v53 }
 0x755   : > { %v1152_v5 = vpop.permute.xlu1 %1151 }
 0x756   : > { %v1156_v6 = vsub.f32 %v2141_v63, %v1152_v5  ;;  %v1150_v7 = vpop.permute.xlu0 %1149 }
 0x757   : > { %v1155_v9 = vsub.f32 %v1136_v1, %v1150_v7 }
 0x758   : > { %v1170_v10 = vadd.f32 1e-05, %v1156_v6 }
 0x759   : > { %v1169_v11 = vadd.f32 1e-05, %v1155_v9 }
 0x75a   : > { %2429 = vrsqrt.f32 %v1170_v10 }
 0x75b   : > { %2431 = vrsqrt.f32 %v1169_v11 }
 0x764   : > { %v2430_v12 = vpop.eup %2429 }
 0x765   : > { %v2432_v13 = vpop.eup %2431  ;;  %1180 = vperm.xlu0 %2375, %v2430_v12  }
 0x766   : > { %1175 = vperm.xlu1 %2377, %v2432_v13   ;;  %v1160_v16 = vpop.permute.xlu1 %1159 }
 0x767   : > { %v1165_v18 = vpop.permute.xlu0 %1164  ;;  %v1167_v21 = vsub.f32 %v1042_v52, %v1160_v16  ;;  %v1056_v52 = vld [vmem:[%s3017_s11] sm:$0xff] }
 0x768   : > { %v1168_v20 = vsub.f32 %v1047_v50, %v1165_v18  ;;  %v1054_v50 = vld [vmem:[%s3016_s10] sm:$0xff] }
 0x769   : > { %2376 = vset.pattern.permute.xlu0 %v2531_v8  ;;  %2154 = vmatprep.mubr.msk.f32.mxu0 %vm678_vm0, %v1054_v50  ;;  %v1334_v18 = vld [vmem:[%s3018_s12] sm:$0xff] }
 0x76a   : > { %1199 = vperm.xlu0 %2376, %v1052_v14   ;;  %2378 = vset.pattern.permute.xlu1 %v2531_v8  ;;  %v1188_v17 = vpop.permute.xlu1 %1187 }
 0x76b   : > { %1204 = vperm.xlu1 %2378, %v1053_v15  }
 0x76e   : > { %v1193_v19 = vpop.permute.xlu1 %1192 }
 0x7e4   : > { %v1181_v22 = vpop.permute.xlu0 %1180 }
 0x7e5   : > { %v1184_v23 = vmul.f32 %v1181_v22, %v1168_v20  ;;  %v1176_v24 = vpop.permute.xlu1 %1175 }
 0x7e6   : > { %v1183_v25 = vmul.f32 %v1176_v24, %v1167_v21 }
 0x7e7   : > { %v1196_v28 = vmul.f32 %v1193_v19, %v1184_v23  ;;  %v1335_v19 = vld [vmem:[%s3018_s12 + $0x8] sm:$0xff] }
 0x7e8   : > { %v1195_v26 = vmul.f32 %v1188_v17, %v1183_v25 }
 0x7e9   : > { %v1200_v27 = vpop.permute.xlu0 %1199 }
 0x7ea   : > { %v1207_v29 = vadd.f32 %v1200_v27, %v1195_v26  ;;  %v1205_v30 = vpop.permute.xlu1 %1204 }
 0x7eb   : > { %v1208_v31 = vadd.f32 %v1205_v30, %v1196_v28  ;;  %v1336_v28 = vld [vmem:[%s3019_s13] sm:$0xff] }
 0x7ec   : > { %v2001_v32 = vmul.f32 -1.442695, %v1207_v29 }
 0x7ed   : > { %v2002_v34 = vmul.f32 -1.442695, %v1208_v31 }
 0x7ee   : > { %2433 = vpow2.f32 %v2001_v32 }
 0x7ef   : > { %2435 = vpow2.f32 %v2002_v34 }
 0x7f8   : > { %v2434_v36 = vpop.eup %2433 }
 0x7f9   : > { %v2436_v37 = vpop.eup %2435  ;;  %v1215_v40 = vadd.f32 1.0, %v2434_v36 }
 0x7fa   : > { %v1216_v41 = vadd.f32 1.0, %v2436_v37 }
 0x7fb   : > { %2437 = vrcp.f32 %v1215_v40 }
 0x7fc   : > { %2439 = vrcp.f32 %v1216_v41 }
 0x805   : > { %v2438_v42 = vpop.eup %2437 }
 0x806   : > { %v2440_v44 = vpop.eup %2439  ;;  %v1221_v45 = vmul.f32 %v2438_v42, %v1207_v29  ;;  %v1337_v29 = vld [vmem:[%s3019_s13 + $0x8] sm:$0xff] }
 0x807   : > { %v1222_v47 = vmul.f32 %v2440_v44, %v1208_v31 }
 0x809   : > { %v2384_v48 = vpack.i.bf16 %v1222_v47, %v1221_v45  ;;  %v2243_v49 = vpack.c.bf16 %v1222_v47, %v1221_v45 }
 0x80b   : > { %2385 = vrot.lane.b32.xlu0 %v2384_v48, %s2530_s23  ;;  %2380 = vrot.lane.b32.xlu1 %v2384_v48, %s2532_s3 }
 0x80f   : > { %1248 = vperm.xlu0 %2376, %v1057_v51   ;;  %1243 = vperm.xlu1 %2378, %v1056_v52  }
 0x87d   : > { %v2381_v54 = vpop.permute.xlu1 %2380  ;;  %v2386_v57 = vpop.permute.xlu0 %2385 }
 0x87e   : > { %v2383_v55 = vunpack.i.h.bf16 %v2381_v54  ;;  %v2382_v56 = vunpack.i.l.bf16 %v2381_v54  ;;  %v2388_v59 = vunpack.i.h.bf16 %v2386_v57  ;;  %v2387_v60 = vunpack.i.l.bf16 %v2386_v57 }
 0x880   : > { %v2237_v58 = vpack.c.bf16 %v2383_v55, %v2382_v56  ;;  %v2247_v61 = vpack.c.bf16 %v2388_v59, %v2387_v60 }
 0x882   : > { %2239 = vmatprep.subr.msk.bf16.mxu0 %vm2774_vm6, %v2237_v58 }
 0x883   : > { %2242 = vmatpush3.bf16.msk.msra.mxu0 %vm2774_vm6, %v2237_v58 }
 0x884   : > { %2244 = vmatprep.subr.bf16.mxu0 %v2243_v49 }
 0x887   : > { %2246 = vmatpush3.bf16.msra.mxu0 %v2243_v49 }
 0x888   : > { %2249 = vmatprep.subr.msk.bf16.mxu0 %vm2784_vm7, %v2247_v61 }
 0x88b   : > { %2252 = vmatpush3.bf16.msk.msra.mxu0 %vm2784_vm7, %v2247_v61 }
 0x88e   : > { %2155 = vmatmul.mubr.msk.f32.vlgmr.msra.gmra.mrb[2].mxu0 %vm678_vm0, %v1055_v62  ;;  %v1249_v63 = vpop.permute.xlu0 %1248  ;;  %v1244_v1 = vpop.permute.xlu1 %1243 }
 0x88f   : > { %2183 = vmatprep.mubr.msk.f32.mxu0 %vm781_vm3, %v2728_v38 }
 0x961   : > { %v2156_v0 = vpop.f32.mrb[2].mxu0 }
 0x962   : > { %v1329_v2 = vadd.f32 %v2156_v0, %v1249_v63  ;;  %v1323_v3 = vpop.f32.mrb[3].mxu0 }
 0x963   : > { %v1324_v4 = vadd.f32 %v1323_v3, %v1244_v1  ;;  %v1338_v1 = vld [vmem:[%s3020_s14] sm:$0xff] }
 0x964   : > { %v2849_v5 = vadd.f32 %v1329_v2, %v2715_v33  ;;  %v1341_v2 = vld [vmem:[%s3021_s15 + $0x8] sm:$0xff]  ;;  %v1340_v3 = vld [vmem:[%s3021_s15] sm:$0xff] }
 0x965   : > { %v2852_v6 = vadd.f32 %v1324_v4, %v2717_v35 }
 0x966   : > { %1344 = vadd.xlane.f32.xlu0 %v2849_v5  ;;  %v1347_v38 = vmul.f32 %v2849_v5, %v2849_v5 }
 0x967   : > { %1342 = vadd.xlane.f32.xlu1 %v2852_v6  ;;  %v1346_v7 = vmul.f32 %v2852_v6, %v2852_v6 }
 0x96a   : > { %1348 = vadd.xlane.f32.xlu0 %v1346_v7 }
 0x96b   : > { %1350 = vadd.xlane.f32.xlu1 %v1347_v38 }
 0x9f3   : > { %v1345_v9 = vpop.xlane.xlu0 %1344 }
 0x9f4   : > { %v1343_v10 = vpop.xlane.xlu1 %1342 }
 0x9f7   : > { %v1349_v11 = vpop.xlane.xlu0 %1348 }
 0x9f8   : > { %v1352_v33 = vsel %vm778_vm4, %v1343_v10, %v1349_v11  ;;  %v1351_v12 = vpop.xlane.xlu1 %1350 }
 0x9f9   : > { %v1353_v35 = vsel %vm778_vm4, %v1345_v9, %v1351_v12 }
 0x9fa   : > { %v2253_v13 = vpack.c.bf16 %v1353_v35, %v1352_v33  ;;  %v1339_v35 = vld [vmem:[%s3020_s14 + $0x8] sm:$0xff] }
 0x9fc   : > { %2254 = vmatprep.subr.bf16.mxu1 %v2253_v13 }
 0x9fd   : > { %2256 = vmatpush3.bf16.msra.mxu1 %v2253_v13 }
 0xa00   : > { %2162 = vmatmul.mubr.msk.f32.vlgmr.msra.gmra.mrb[6].mxu1 %vm781_vm3, %v2737_v46 }
 0xa01   : > { %2176 = vmatprep.mubr.msk.f32.mxu1 %vm678_vm0, %v1338_v1 }
 0xad3   : > { %v2163_v14 = vpop.f32.mrb[6].mxu1 }
 0xad4   : > { %v1430_v15 = vmul.f32 %v2163_v14, %v2163_v14  ;;  %v1420_v16 = vpop.f32.mrb[7].mxu1 }
 0xad5   : > { %v1429_v17 = vmul.f32 %v1420_v16, %v1420_v16 }
 0xad6   : > { %1435 = vrot.lane.b32.xlu1 %v1430_v15, %s2532_s3 }
 0xad7   : > { %1433 = vrot.lane.b32.xlu0 %v1429_v17, %s2532_s3 }
 0xada   : > { %1443 = vperm.xlu1 %2378, %v1420_v16  }
 0xadb   : > { %1448 = vperm.xlu0 %2376, %v2163_v14  }
 0xade   : > { %1471 = vperm.xlu1 %2378, %v1334_v18  }
 0xadf   : > { %2389 = vset.pattern.permute.xlu0 %v2533_v53 }
 0xae2   : > { %1476 = vperm.xlu1 %2378, %v1335_v19  }
 0xae6   : > { %2391 = vset.pattern.permute.xlu1 %v2533_v53 }
 0xb48   : > { %v1436_v20 = vpop.permute.xlu1 %1435 }
 0xb49   : > { %v1440_v21 = vsub.f32 %v2163_v14, %v1436_v20  ;;  %v1434_v22 = vpop.permute.xlu0 %1433 }
 0xb4a   : > { %v1439_v23 = vsub.f32 %v1420_v16, %v1434_v22 }
 0xb4b   : > { %v1454_v24 = vadd.f32 1e-05, %v1440_v21 }
 0xb4c   : > { %v1453_v25 = vadd.f32 1e-05, %v1439_v23 }
 0xb4d   : > { %2441 = vrsqrt.f32 %v1454_v24 }
 0xb4e   : > { %2443 = vrsqrt.f32 %v1453_v25 }
 0xb57   : > { %v2442_v26 = vpop.eup %2441 }
 0xb58   : > { %v2444_v27 = vpop.eup %2443  ;;  %1464 = vperm.xlu0 %2389, %v2442_v26  }
 0xb59   : > { %1459 = vperm.xlu1 %2391, %v2444_v27   ;;  %v1444_v30 = vpop.permute.xlu1 %1443 }
 0xb5a   : > { %v1449_v32 = vpop.permute.xlu0 %1448  ;;  %v1451_v37 = vsub.f32 %v2852_v6, %v1444_v30 }
 0xb5b   : > { %v1452_v36 = vsub.f32 %v2849_v5, %v1449_v32  ;;  %v1616_v32 = vld [vmem:[%s3022_s16] sm:$0xff] }
 0xb5c   : > { %2390 = vset.pattern.permute.xlu0 %v2531_v8 }
 0xb5d   : > { %1483 = vperm.xlu0 %2390, %v1336_v28   ;;  %2392 = vset.pattern.permute.xlu1 %v2531_v8  ;;  %v1472_v31 = vpop.permute.xlu1 %1471 }
 0xb5e   : > { %1488 = vperm.xlu1 %2392, %v1337_v29  }
 0xb61   : > { %v1477_v34 = vpop.permute.xlu1 %1476 }
 0xbd7   : > { %v1465_v40 = vpop.permute.xlu0 %1464 }
 0xbd8   : > { %v1468_v41 = vmul.f32 %v1465_v40, %v1452_v36  ;;  %v1460_v42 = vpop.permute.xlu1 %1459 }
 0xbd9   : > { %v1467_v44 = vmul.f32 %v1460_v42, %v1451_v37 }
 0xbda   : > { %v1480_v48 = vmul.f32 %v1477_v34, %v1468_v41  ;;  %v1617_v34 = vld [vmem:[%s3022_s16 + $0x8] sm:$0xff] }
 0xbdb   : > { %v1479_v45 = vmul.f32 %v1472_v31, %v1467_v44 }
 0xbdc   : > { %v1484_v47 = vpop.permute.xlu0 %1483 }
 0xbdd   : > { %v1491_v49 = vadd.f32 %v1484_v47, %v1479_v45  ;;  %v1489_v50 = vpop.permute.xlu1 %1488  ;;  %v1618_v47 = vld [vmem:[%s3023_s17] sm:$0xff] }
 0xbde   : > { %v1492_v51 = vadd.f32 %v1489_v50, %v1480_v48 }
 0xbdf   : > { %v2013_v52 = vmul.f32 -1.442695, %v1491_v49 }
 0xbe0   : > { %v2014_v54 = vmul.f32 -1.442695, %v1492_v51 }
 0xbe1   : > { %2445 = vpow2.f32 %v2013_v52 }
 0xbe2   : > { %2447 = vpow2.f32 %v2014_v54 }
 0xbeb   : > { %v2446_v55 = vpop.eup %2445 }
 0xbec   : > { %v2448_v56 = vpop.eup %2447  ;;  %v1499_v57 = vadd.f32 1.0, %v2446_v55 }
 0xbed   : > { %v1500_v58 = vadd.f32 1.0, %v2448_v56 }
 0xbee   : > { %2449 = vrcp.f32 %v1499_v57 }
 0xbef   : > { %2451 = vrcp.f32 %v1500_v58 }
 0xbf8   : > { %v2450_v59 = vpop.eup %2449 }
 0xbf9   : > { %v2452_v60 = vpop.eup %2451  ;;  %v1505_v61 = vmul.f32 %v2450_v59, %v1491_v49 }
 0xbfa   : > { %v1506_v62 = vmul.f32 %v2452_v60, %v1492_v51 }
 0xbfc   : > { %v2398_v63 = vpack.i.bf16 %v1506_v62, %v1505_v61  ;;  %v2263_v0 = vpack.c.bf16 %v1506_v62, %v1505_v61 }
 0xbfe   : > { %2399 = vrot.lane.b32.xlu0 %v2398_v63, %s2530_s23  ;;  %2394 = vrot.lane.b32.xlu1 %v2398_v63, %s2532_s3 }
 0xc02   : > { %1532 = vperm.xlu0 %2390, %v1341_v2   ;;  %1527 = vperm.xlu1 %2392, %v1340_v3  }
 0xc70   : > { %v2395_v4 = vpop.permute.xlu1 %2394  ;;  %v2400_v9 = vpop.permute.xlu0 %2399 }
 0xc71   : > { %v2397_v7 = vunpack.i.h.bf16 %v2395_v4  ;;  %v2396_v38 = vunpack.i.l.bf16 %v2395_v4  ;;  %v2402_v11 = vunpack.i.h.bf16 %v2400_v9  ;;  %v2401_v33 = vunpack.i.l.bf16 %v2400_v9 }
 0xc73   : > { %v2257_v10 = vpack.c.bf16 %v2397_v7, %v2396_v38  ;;  %v2267_v12 = vpack.c.bf16 %v2402_v11, %v2401_v33 }
 0xc75   : > { %2259 = vmatprep.subr.msk.bf16.mxu1 %vm2774_vm6, %v2257_v10 }
 0xc76   : > { %2262 = vmatpush3.bf16.msk.msra.mxu1 %vm2774_vm6, %v2257_v10 }
 0xc77   : > { %2264 = vmatprep.subr.bf16.mxu1 %v2263_v0 }
 0xc7a   : > { %2266 = vmatpush3.bf16.msra.mxu1 %v2263_v0 }
 0xc7b   : > { %2269 = vmatprep.subr.msk.bf16.mxu1 %vm2784_vm7, %v2267_v12 }
 0xc7e   : > { %2272 = vmatpush3.bf16.msk.msra.mxu1 %vm2784_vm7, %v2267_v12 }
 0xc81   : > { %2177 = vmatmul.mubr.msk.f32.vlgmr.msra.gmra.mrb[8].mxu1 %vm678_vm0, %v1339_v35  ;;  %v1533_v13 = vpop.permute.xlu0 %1532  ;;  %v1528_v15 = vpop.permute.xlu1 %1527  ;;  %v1620_v35 = vld [vmem:[%s3024_s18] sm:$0xff] }
 0xd54   : > { %v2178_v14 = vpop.f32.mrb[8].mxu1 }
 0xd55   : > { %v1613_v16 = vadd.f32 %v2178_v14, %v1533_v13  ;;  %v1607_v17 = vpop.f32.mrb[9].mxu1  ;;  %v1623_v13 = vld [vmem:[%s3025_s19 + $0x8] sm:$0xff]  ;;  %v1622_v14 = vld [vmem:[%s3025_s19] sm:$0xff] }
 0xd56   : > { %v1608_v18 = vadd.f32 %v1607_v17, %v1528_v15 }
 0xd57   : > { %1626 = vadd.xlane.f32.xlu0 %v1613_v16  ;;  %v1629_v20 = vmul.f32 %v1613_v16, %v1613_v16 }
 0xd58   : > { %1624 = vadd.xlane.f32.xlu1 %v1608_v18  ;;  %v1628_v19 = vmul.f32 %v1608_v18, %v1608_v18 }
 0xd5b   : > { %1630 = vadd.xlane.f32.xlu0 %v1628_v19 }
 0xd5c   : > { %1632 = vadd.xlane.f32.xlu1 %v1629_v20 }
 0xde4   : > { %v1627_v21 = vpop.xlane.xlu0 %1626 }
 0xde5   : > { %v1625_v22 = vpop.xlane.xlu1 %1624 }
 0xde8   : > { %v1631_v23 = vpop.xlane.xlu0 %1630 }
 0xde9   : > { %v1634_v24 = vsel %vm778_vm4, %v1625_v22, %v1631_v23  ;;  %v1633_v25 = vpop.xlane.xlu1 %1632  ;;  %v1621_v23 = vld [vmem:[%s3024_s18 + $0x8] sm:$0xff] }
 0xdea   : > { %v1635_v26 = vsel %vm778_vm4, %v1627_v21, %v1633_v25 }
 0xdeb   : > { %v2273_v27 = vpack.c.bf16 %v1635_v26, %v1634_v24 }
 0xded   : > { %2274 = vmatprep.subr.bf16.mxu0 %v2273_v27 }
 0xdee   : > { %2276 = vmatpush3.bf16.msra.mxu0 %v2273_v27 }
 0xdf1   : > { %2184 = vmatmul.mubr.msk.f32.vlgmr.msra.gmra.mrb[4].mxu0 %vm781_vm3, %v2737_v46 }
 0xdf2   : > { %2198 = vmatprep.mubr.msk.f32.mxu0 %vm678_vm0, %v1620_v35 }
 0xec4   : > { %v2185_v28 = vpop.f32.mrb[4].mxu0 }
 0xec5   : > { %v1712_v29 = vmul.f32 %v2185_v28, %v2185_v28  ;;  %v1702_v30 = vpop.f32.mrb[5].mxu0 }
 0xec6   : > { %v1711_v31 = vmul.f32 %v1702_v30, %v1702_v30 }
 0xec7   : > { %1717 = vrot.lane.b32.xlu1 %v1712_v29, %s2532_s3 }
 0xec8   : > { %1715 = vrot.lane.b32.xlu0 %v1711_v31, %s2532_s3 }
 0xecb   : > { %1725 = vperm.xlu1 %2392, %v1702_v30  }
 0xecc   : > { %1730 = vperm.xlu0 %2390, %v2185_v28  }
 0xecf   : > { %1753 = vperm.xlu1 %2392, %v1616_v32  }
 0xed0   : > { %2403 = vset.pattern.permute.xlu0 %v2533_v53 }
 0xed3   : > { %1758 = vperm.xlu1 %2392, %v1617_v34  }
 0xed7   : > { %2405 = vset.pattern.permute.xlu1 %v2533_v53  ;;  %v1619_v53 = vld [vmem:[%s3023_s17 + $0x8] sm:$0xff] }
 0xf39   : > { %v1718_v46 = vpop.permute.xlu1 %1717 }
 0xf3a   : > { %v1722_v36 = vsub.f32 %v2185_v28, %v1718_v46  ;;  %v1716_v37 = vpop.permute.xlu0 %1715 }
 0xf3b   : > { %v1721_v40 = vsub.f32 %v1702_v30, %v1716_v37 }
 0xf3c   : > { %v1736_v41 = vadd.f32 1e-05, %v1722_v36 }
 0xf3d   : > { %v1735_v42 = vadd.f32 1e-05, %v1721_v40 }
 0xf3e   : > { %2453 = vrsqrt.f32 %v1736_v41 }
 0xf3f   : > { %2455 = vrsqrt.f32 %v1735_v42 }
 0xf48   : > { %v2454_v44 = vpop.eup %2453 }
 0xf49   : > { %v2456_v45 = vpop.eup %2455  ;;  %1746 = vperm.xlu0 %2403, %v2454_v44  }
 0xf4a   : > { %1741 = vperm.xlu1 %2405, %v2456_v45   ;;  %v1726_v48 = vpop.permute.xlu1 %1725 }
 0xf4b   : > { %v1731_v50 = vpop.permute.xlu0 %1730  ;;  %v1733_v54 = vsub.f32 %v1608_v18, %v1726_v48 }
 0xf4c   : > { %v1734_v52 = vsub.f32 %v1613_v16, %v1731_v50 }
 0xf4d   : > { %2404 = vset.pattern.permute.xlu0 %v2531_v8 }
 0xf4e   : > { %1765 = vperm.xlu0 %2404, %v1618_v47   ;;  %2406 = vset.pattern.permute.xlu1 %v2531_v8  ;;  %v1754_v49 = vpop.permute.xlu1 %1753 }
 0xf4f   : > { %1770 = vperm.xlu1 %2406, %v1619_v53  }
 0xf52   : > { %v1759_v51 = vpop.permute.xlu1 %1758 }
 0xfc8   : > { %v1747_v55 = vpop.permute.xlu0 %1746 }
 0xfc9   : > { %v1750_v56 = vmul.f32 %v1747_v55, %v1734_v52  ;;  %v1742_v57 = vpop.permute.xlu1 %1741 }
 0xfca   : > { %v1749_v58 = vmul.f32 %v1742_v57, %v1733_v54 }
 0xfcb   : > { %v1762_v61 = vmul.f32 %v1759_v51, %v1750_v56 }
 0xfcc   : > { %v1761_v59 = vmul.f32 %v1754_v49, %v1749_v58 }
 0xfcd   : > { %v1766_v60 = vpop.permute.xlu0 %1765 }
 0xfce   : > { %v1773_v62 = vadd.f32 %v1766_v60, %v1761_v59  ;;  %v1771_v63 = vpop.permute.xlu1 %1770 }
 0xfcf   : > { %v1774_v0 = vadd.f32 %v1771_v63, %v1762_v61 }
 0xfd0   : > { %v2025_v1 = vmul.f32 -1.442695, %v1773_v62 }
 0xfd1   : > { %v2026_v2 = vmul.f32 -1.442695, %v1774_v0 }
 0xfd2   : > { %2457 = vpow2.f32 %v2025_v1 }
 0xfd3   : > { %2459 = vpow2.f32 %v2026_v2 }
 0xfdc   : > { %v2458_v8 = vpop.eup %2457 }
 0xfdd   : > { %v2460_v3 = vpop.eup %2459  ;;  %v1781_v4 = vadd.f32 1.0, %v2458_v8 }
 0xfde   : > { %v1782_v7 = vadd.f32 1.0, %v2460_v3 }
 0xfdf   : > { %2461 = vrcp.f32 %v1781_v4 }
 0xfe0   : > { %2463 = vrcp.f32 %v1782_v7 }
 0xfe9   : > { %v2462_v38 = vpop.eup %2461 }
 0xfea   : > { %v2464_v9 = vpop.eup %2463  ;;  %v1787_v10 = vmul.f32 %v2462_v38, %v1773_v62 }
 0xfeb   : > { %v1788_v11 = vmul.f32 %v2464_v9, %v1774_v0 }
 0xfed   : > { %v2412_v33 = vpack.i.bf16 %v1788_v11, %v1787_v10  ;;  %v2283_v12 = vpack.c.bf16 %v1788_v11, %v1787_v10 }
 0xfef   : > { %2413 = vrot.lane.b32.xlu0 %v2412_v33, %s2530_s23  ;;  %2408 = vrot.lane.b32.xlu1 %v2412_v33, %s2532_s3  ;;  %s2962_s3 = scalar_lea.hbm %s3026_s20, %s2041_s26 }
 0xff3   : > { %1814 = vperm.xlu0 %2404, %v1623_v13   ;;  %1809 = vperm.xlu1 %2406, %v1622_v14  }
0x1061   : > { %v2409_v15 = vpop.permute.xlu1 %2408  ;;  %v2414_v18 = vpop.permute.xlu0 %2413 }
0x1062   : > { %v2411_v16 = vunpack.i.h.bf16 %v2409_v15  ;;  %v2410_v17 = vunpack.i.l.bf16 %v2409_v15  ;;  %v2416_v20 = vunpack.i.h.bf16 %v2414_v18  ;;  %v2415_v21 = vunpack.i.l.bf16 %v2414_v18 }
0x1064   : > { %v2277_v19 = vpack.c.bf16 %v2411_v16, %v2410_v17  ;;  %v2287_v22 = vpack.c.bf16 %v2416_v20, %v2415_v21 }
0x1066   : > { %2279 = vmatprep.subr.msk.bf16.mxu0 %vm2774_vm6, %v2277_v19 }
0x1067   : > { %2282 = vmatpush3.bf16.msk.msra.mxu0 %vm2774_vm6, %v2277_v19 }
0x1068   : > { %2284 = vmatprep.subr.bf16.mxu0 %v2283_v12 }
0x106b   : > { %2286 = vmatpush3.bf16.msra.mxu0 %v2283_v12 }
0x106c   : > { %2289 = vmatprep.subr.msk.bf16.mxu0 %vm2784_vm7, %v2287_v22 }
0x106f   : > { %2292 = vmatpush3.bf16.msk.msra.mxu0 %vm2784_vm7, %v2287_v22 }
0x1072   : > { %2199 = vmatmul.mubr.msk.f32.vlgmr.msra.gmra.mrb[6].mxu0 %vm678_vm0, %v1621_v23  ;;  %v1815_v24 = vpop.permute.xlu0 %1814  ;;  %v1810_v25 = vpop.permute.xlu1 %1809 }
0x1145   : > { %v2200_v39 = vpop.f32.mrb[6].mxu0 }
0x1146   : > { %v1895_v26 = vadd.f32 %v2200_v39, %v1815_v24  ;;  %v1889_v27 = vpop.f32.mrb[7].mxu0 }
0x1147   : > { %v1890_v28 = vadd.f32 %v1889_v27, %v1810_v25 }
0x1148   : > { %v1899_v43 = vadd.f32 %v1895_v26, %v2849_v5 }
0x1149   : > { %v1898_v29 = vadd.f32 %v1890_v28, %v2852_v6 }
0x114a   : > { %1901 = vst [vmem:[%s622_s28 + $0x8] sm:$0xff] %v1899_v43 }
0x114b   : > { %1900 = vst [vmem:[%s622_s28] sm:$0xff] %v1898_v29 }
0x114c   : > { %2478 = shalt.err (!%p2475_p3)
}
0x114d   : > { %s2479_s5 = scalar_lea.hbm %s2962_s3, 256  ;;  %s2483_s6 = scalar_lea.hbm %s3026_s20, 512 }
0x114e   : > { %p2480_p4 = scmp.ne.s32.totalorder %s2962_s3, %s2479_s5  ;;  %p2484_p9 = scmp.lt.u32.totalorder %s2962_s3, %s3026_s20 }
0x114f   : > { %p2485_p10 = scmp.lt.u32.totalorder %s2483_s6, %s2479_s5  ;;  %p2487_p12 = scmp.lt.u32.totalorder %s2479_s5, %s2962_s3 }
0x1150   : > { %p2481_p7 = pnand %p2480_p4, %p2680_p5 }
0x1151   : > { %p2486_p11 = por %p2485_p10, %p2484_p9 }
0x1152   : > { %p2482_p8 = pneg %p2481_p7 }
0x1153   : > { %p2488_p13 = por %p2487_p12, %p2486_p11 }
0x1155   : > { %p2489_p0 = pnand %p2488_p13, %p2482_p8 }
0x1157   : > { %2492 = shalt.err (!%p2489_p0)
}
0x1158   : > { %s2535_s0 = smov 128   ;;  %s2536_s27 = smov 8  }
0x1159   : > { %2293 = dma.vmem_to_hbm [thread:$0]  (%p2680_p5), %s2957_s29, 256, %s2962_s3, %s2965_s2, %s2535_s0, %s2535_s0, %s2536_s27  }
0x115a PF: > { %p2299_p1 = scmp.ge.s32.totalorder %s2527_s24, 2  ;;  %s1931_s26 = sand.u32 1, %s2515_s1  }
0x115b   : > { %s1932_s5 = scalar_lea.sflag [#allocation3], %s1931_s26 }
0x115c   : > { %p2296_p2 = pnand %p2299_p1, %p2684_p6 }
0x115e   : > { %2510 = dma.done.wait (!%p2296_p2), %s1932_s5, 256  }
0x115f   : > { %2512 = vsyncadd (!%p2296_p2), %s1932_s5, 4294967040  ;;  %s3063_s24 = sld [smem:[#allocation6_spill]]  ;;  %s3064_s6 = sld [smem:[#allocation5_spill]] }
0x1160   : > { %s3065_s23 = sld [smem:[#allocation7_spill]]  ;;  %s3066_s1 = smov %s2519_s22 }
0x1165   : > { %p30_p3 = scmp.ge.s32.totalorder %s3063_s24, 4   ;;  %s3067_s22 = smov %s3064_s6 }
0x1167   :  { %32 = sbr.rel (!%p30_p3) target bundleno = 12 (0xc), region = 135 }
0x116e   :  { %1937 = vsyncpa [#allocation3], 1 }
0x116f   :  { %1939 = vsyncpa [#allocation3 + $0x1], 1 }

// kernel: tpu_custom_call.1
= control target key start
LH: loop header
LB: loop body
LE: loop exit
PB: predicated region body
PF: predicated region fallthrough
CT: control target
= control target key end

     0   :  { %s3006_s0 = inlined_call_operand.vmem [shape: f32[2,16,130], index: 0, kind: input, shape index: {}]   ;;  %s3007_s1 = inlined_call_operand.vmem [shape: f32[16,16], index: 1, kind: input, shape index: {}]   ;;  %s3008_s2 = inlined_call_operand.vmem [shape: f32[16,48], index: 2, kind: input, shape index: {}]   ;;  %s3009_s3 = inlined_call_operand.vmem [shape: f32[16,1], index: 3, kind: input, shape index: {}]   ;;  %s3010_s4 = inlined_call_operand.vmem [shape: f32[16,1], index: 4, kind: input, shape index: {}]   ;;  %s3011_s5 = inlined_call_operand.vmem [shape: f32[16,1], index: 5, kind: input, shape index: {}]   ;;  %s3012_s6 = inlined_call_operand.vmem [shape: f32[16,48], index: 6, kind: input, shape index: {}]   ;;  %s3013_s7 = inlined_call_operand.vmem [shape: f32[16,1], index: 7, kind: input, shape index: {}]   ;;  %s3014_s8 = inlined_call_operand.vmem [shape: f32[16,1], index: 8, kind: input, shape index: {}]   ;;  %s3015_s9 = inlined_call_operand.vmem [shape: f32[16,1], index: 9, kind: input, shape index: {}]   ;;  %s3016_s10 = inlined_call_operand.vmem [shape: f32[16,48], index: 10, kind: input, shape index: {}]   ;;  %s3017_s11 = inlined_call_operand.vmem [shape: f32[16,1], index: 11, kind: input, shape index: {}]   ;;  %s3018_s12 = inlined_call_operand.vmem [shape: f32[16,1], index: 12, kind: input, shape index: {}]   ;;  %s3019_s13 = inlined_call_operand.vmem [shape: f32[16,1], index: 13, kind: input, shape index: {}]   ;;  %s3020_s14 = inlined_call_operand.vmem [shape: f32[16,48], index: 14, kind: input, shape index: {}]   ;;  %s3021_s15 = inlined_call_operand.vmem [shape: f32[16,1], index: 15, kind: input, shape index: {}]   ;;  %s3022_s16 = inlined_call_operand.vmem [shape: f32[16,1], index: 16, kind: input, shape index: {}]   ;;  %s3023_s17 = inlined_call_operand.vmem [shape: f32[16,1], index: 17, kind: input, shape index: {}]   ;;  %s3024_s18 = inlined_call_operand.vmem [shape: f32[16,48], index: 18, kind: input, shape index: {}]   ;;  %s3025_s19 = inlined_call_operand.vmem [shape: f32[16,1], index: 19, kind: input, shape index: {}]   ;;  %s3026_s20 = inlined_call_operand.hbm [shape: f32[2,16,128], index: 20, kind: output, shape index: {}]  }
   0x1   :  { %3036 = sst [smem:[#allocation9_spill]] %s3006_s0 }
   0x2   :  { %3037 = sst [smem:[#allocation10_spill]] %s3007_s1 }
   0x3   :  { %3038 = sst [smem:[#allocation11_spill]] %s3008_s2 }
   0x4   :  { %3039 = sst [smem:[#allocation12_spill]] %s3009_s3 }
   0x5   :  { %3040 = sst [smem:[#allocation13_spill]] %s3010_s4 }
   0x6   :  { %3041 = sst [smem:[#allocation14_spill]] %s3011_s5 }
   0x7   :  { %3042 = sst [smem:[#allocation15_spill]] %s3012_s6 }
   0x8   :  { %3043 = sst [smem:[#allocation16_spill]] %s3013_s7 }
   0x9   :  { %25 = vsyncpa [#allocation3], 0 }
   0xa   :  { %27 = vsyncpa [#allocation3 + $0x1], 0  ;;  %s2642_s1 = smov 0   ;;  %s2644_s22 = smov 0  }
   0xb   :  { %s2646_s23 = smov 0   ;;  %s2648_s24 = smov 0  }
   0xc LB: > { %3044 = sst [smem:[#allocation5_spill]] %s2523_s23  ;;  %s2663_s2 = sadd.s32 4294967295, %s2527_s24   ;;  %s2527_s24 = sphi %s2648_s24, %s3063_s24   ;;  %s2523_s23 = sphi %s2646_s23, %s3065_s23   ;;  %s2519_s22 = sphi %s2644_s22, %s3067_s22   ;;  %s2515_s1 = sphi %s2642_s1, %s3066_s1  }
   0xd   : > { %s1978_s25 = sadd.s32 4294967294, %s2527_s24   ;;  %s2667_s3 = sadd.s32 1, %s2527_s24  }
   0xe   : > { %3045 = sst [smem:[#allocation6_spill]] %s2667_s3  ;;  %s465_s26 = sadd.s32 1, %s2523_s23 }
   0xf   : > { %s462_s27 = ssub.s32 %s2527_s24, %s2667_s3  ;;  %p475_p0 = scmp.ne.s32.totalorder %s2523_s23, %s2519_s22 }
  0x10   : > { %p463_p1 = scmp.eq.s32.totalorder %s462_s27, 0  ;;  %p476_p2 = scmp.eq.s32.totalorder %s2663_s2, 1 }
  0x11   : > { %p481_p3 = scmp.ne.s32.totalorder %s2519_s22, %s2515_s1  ;;  %p482_p4 = scmp.eq.s32.totalorder %s1978_s25, 1 }
  0x12   : > { %s2678_s28 = scalar_select %p463_p1, %s2523_s23, %s465_s26  }
  0x13   : > { %p2680_p5 = por %p476_p2, %p475_p0  ;;  %p2684_p6 = por %p482_p4, %p481_p3 }
  0x14   : > { %3046 = sst [smem:[#allocation7_spill]] %s2678_s28  ;;  %p1981_p7 = scmp.ge.s32.totalorder %s2527_s24, 1 }
  0x15   : > { %s3048_s29 = scalar_select %p2684_p6, 1, 0 }
  0x16   : > { %p565_p8 = scmp.lt.s32.totalorder %s2527_s24, 3 }
  0x17   : > { %3049 = sst [smem:[#allocation8_spill]] %s3048_s29 }
  0x18   : > { %p566_p9 = pnand %p1981_p7, %p565_p8 }
  0x19   : > { %p623_p10 = scmp.lt.s32.totalorder (!%p566_p9), %s2663_s2, 1  ;;  %s3050_s26 = sld [smem:[#allocation9_spill]] (!%p566_p9)  ;;  %vm678_vm0 = vcmask (!%p566_p9), 392192   ;;  %v2531_v8 = vmov (!%p566_p9), 0   ;;  %vm646_vm1 = vcmask (!%p566_p9), 1039360   ;;  %vm659_vm2 = vcmask (!%p566_p9), 1031168  }
  0x1a   : > { %569 = sbr.rel (%p566_p9) target bundleno = 4442 (0x115a), region = 100  ;;  %s2529_s28 = smov (!%p566_p9), 126   ;;  %2360 = vset.pattern.permute.xlu1 (!%p566_p9), %v2531_v8  ;;  %2359 = vset.pattern.permute.xlu0 (!%p566_p9), %v2531_v8  ;;  %vm781_vm3 = vcmask (!%p566_p9), 130048   ;;  %vm778_vm4 = vcmask (!%p566_p9), 7168   ;;  %v2533_v53 = vmov (!%p566_p9), 1   ;;  %vm2784_vm7 = vmpackc.low (!%p566_p9), %vm646_vm1, %vm646_vm1 }
  0x1b   : > { %s2530_s23 = smov (!%p566_p9), 127   ;;  %s3052_s25 = sld [smem:[#allocation12_spill]] (!%p566_p9)  ;;  %vm1991_vm5 = vmneg (!%p566_p9), %vm778_vm4 }
  0x1c   : > { %s3053_s21 = sld [smem:[#allocation10_spill]] (!%p566_p9)  ;;  %s2532_s3 = smov (!%p566_p9), 1   ;;  %vm2774_vm6 = vmpackc.low (!%p566_p9), %vm1991_vm5, %vm1991_vm5 }
  0x1d   : > { %s3055_s5 = sld [smem:[#allocation14_spill]] (!%p566_p9)  ;;  %s3056_s6 = sld [smem:[#allocation15_spill]] (!%p566_p9) }
  0x1e   : > { %s3057_s7 = sld [smem:[#allocation16_spill]] (!%p566_p9) }
  0x21   : > { %s624_s30 = scalar_select %p623_p10, %s2663_s2, 1  ;;  %v667_v9 = vld [vmem:[%s3052_s25 + $0x8] sm:$0xff]  ;;  %v666_v10 = vld [vmem:[%s3052_s25] sm:$0xff] }
  0x22   : > { %v2728_v38 = vld [vmem:[%s3053_s21] sm:$0xff]  ;;  %v2737_v46 = vld [vmem:[%s3053_s21 + $0x8] sm:$0xff] }
  0x23   : > { %s2040_s0 = sshll.u32 %s624_s30, 5  ;;  %s3051_s30 = sld [smem:[#allocation11_spill]]  ;;  %2117 = vmatprep.mubr.msk.f32.mxu1 %vm781_vm3, %v2728_v38  ;;  %v762_v62 = vld [vmem:[%s3055_s5] sm:$0xff]  ;;  %v763_v63 = vld [vmem:[%s3055_s5 + $0x8] sm:$0xff] }
  0x24   : > { %s627_s27 = scalar_lea.vmem %s3050_s26, %s2040_s0  ;;  %s3054_s0 = sld [smem:[#allocation13_spill]] }
  0x25   : > { %v630_v0 = vld [vmem:[%s627_s27] sm:$0xff]  ;;  %v631_v1 = vld [vmem:[%s627_s27 + $0x8] sm:$0xff]  ;;  %v632_v2 = vld [vmem:[%s627_s27 + $0x10] sm:$0xff]  ;;  %s620_s5 = sand.u32 1, %s2519_s22   ;;  %s2041_s26 = sshll.u32 %s2663_s2, 8 }
  0x26   : > { %v2349_v3 = vpack.i.bf16 %v631_v1, %v630_v0  ;;  %v633_v4 = vld [vmem:[%s627_s27 + $0x18] sm:$0xff]  ;;  %v2201_v5 = vpack.c.bf16 %v632_v2, %v630_v0  ;;  %s2965_s2 = scalar_lea.sflag [#allocation3], %s620_s5 }
  0x27   : > { %v2354_v6 = vpack.i.bf16 %v633_v4, %v632_v2 }
  0x28   : > { %2350 = vrot.lane.b32.xlu1 %v2349_v3, %s2529_s28  ;;  %2340 = vrot.lane.b32.xlu0 %v2349_v3, %s2530_s23 }
  0x29   : > { %2202 = vmatprep.subr.bf16.mxu0 %v2201_v5  ;;  %v664_v7 = vld [vmem:[%s3051_s30] sm:$0xff]  ;;  %v665_v29 = vld [vmem:[%s3051_s30 + $0x8] sm:$0xff] }
  0x2a   : > { %2204 = vmatpush3.bf16.msra.mxu0 %v2201_v5  ;;  %2110 = vmatprep.mubr.msk.f32.mxu0 %vm678_vm0, %v664_v7  ;;  %v760_v51 = vld [vmem:[%s3054_s0] sm:$0xff]  ;;  %v761_v52 = vld [vmem:[%s3054_s0 + $0x8] sm:$0xff]  ;;  %s1982_s0 = sshll.u32 %s620_s5, 4 }
  0x2c   : > { %2355 = vrot.lane.b32.xlu1 %v2354_v6, %s2529_s28  ;;  %2345 = vrot.lane.b32.xlu0 %v2354_v6, %s2530_s23  ;;  %s622_s28 = scalar_lea.vmem [#allocation2], %s1982_s0 }
  0x2d   : > { %s1916_s29 = sshll.u32 %s622_s28, 4  ;;  %s2957_s29 = int_to_ptr.vmem [resolvable:$true] %s1916_s29 }
  0x2e   : > { %s2465_s0 = scalar_lea.vmem %s2957_s29, 256 }
  0x2f   : > { %p2466_p11 = scmp.ne.s32.totalorder %s2957_s29, %s2465_s0 }
  0x30   : > { %675 = vperm.xlu1 %2360, %v667_v9   ;;  %670 = vperm.xlu0 %2359, %v666_v10  }
  0x31   : > { %p2467_p12 = pnand %p2466_p11, %p2680_p5 }
  0x33   : > { %p2468_p13 = pneg %p2467_p12 }
  0x9a   : > { %v2351_v11 = vpop.permute.xlu1 %2350  ;;  %v2341_v12 = vpop.permute.xlu0 %2340 }
  0x9b   : > { %v2353_v13 = vunpack.i.h.bf16 %v2351_v11  ;;  %v2352_v14 = vunpack.i.l.bf16 %v2351_v11  ;;  %v2343_v15 = vunpack.i.h.bf16 %v2341_v12  ;;  %v2342_v16 = vunpack.i.l.bf16 %v2341_v12 }
  0x9d   : > { %v647_v23 = vsel %vm646_vm1, %v2342_v16, %v2343_v15  ;;  %v660_v25 = vsel %vm659_vm2, %v2352_v14, %v2353_v13 }
  0x9e   : > { %v2356_v17 = vpop.permute.xlu1 %2355  ;;  %v2346_v18 = vpop.permute.xlu0 %2345 }
  0x9f   : > { %v2358_v19 = vunpack.i.h.bf16 %v2356_v17  ;;  %v2357_v20 = vunpack.i.l.bf16 %v2356_v17  ;;  %v2348_v21 = vunpack.i.h.bf16 %v2346_v18  ;;  %v2347_v22 = vunpack.i.l.bf16 %v2346_v18 }
  0xa1   : > { %v648_v24 = vsel %vm646_vm1, %v2347_v22, %v2348_v21  ;;  %v661_v26 = vsel %vm659_vm2, %v2357_v20, %v2358_v19 }
  0xa2   : > { %v2205_v27 = vpack.c.bf16 %v648_v24, %v647_v23  ;;  %v2209_v28 = vpack.c.bf16 %v661_v26, %v660_v25 }
  0xa4   : > { %2206 = vmatprep.subr.bf16.mxu0 %v2205_v27 }
  0xa5   : > { %2208 = vmatpush3.bf16.msra.mxu0 %v2205_v27 }
  0xa6   : > { %2210 = vmatprep.subr.bf16.mxu0 %v2209_v28 }
  0xa9   : > { %2212 = vmatpush3.bf16.msra.mxu0 %v2209_v28 }
  0xac   : > { %2111 = vmatmul.mubr.msk.f32.vlgmr.msra.gmra.mrb[0].mxu0 %vm678_vm0, %v665_v29  ;;  %v764_v29 = vld [vmem:[%s3056_s6] sm:$0xff] }
  0xaf   : > { %v676_v30 = vpop.permute.xlu1 %675  ;;  %v671_v31 = vpop.permute.xlu0 %670 }
 0x17f   : > { %v2112_v32 = vpop.f32.mrb[0].mxu0 }
 0x180   : > { %v2715_v33 = vadd.f32 %v2112_v32, %v676_v30  ;;  %v751_v34 = vpop.f32.mrb[1].mxu0  ;;  %v767_v30 = vld [vmem:[%s3057_s7 + $0x8] sm:$0xff] }
 0x181   : > { %v2717_v35 = vadd.f32 %v751_v34, %v671_v31  ;;  %v766_v31 = vld [vmem:[%s3057_s7] sm:$0xff] }
 0x182   : > { %770 = vadd.xlane.f32.xlu0 %v2715_v33  ;;  %v773_v37 = vmul.f32 %v2715_v33, %v2715_v33 }
 0x183   : > { %768 = vadd.xlane.f32.xlu1 %v2717_v35  ;;  %v772_v36 = vmul.f32 %v2717_v35, %v2717_v35 }
 0x186   : > { %774 = vadd.xlane.f32.xlu0 %v772_v36 }
 0x187   : > { %776 = vadd.xlane.f32.xlu1 %v773_v37 }
 0x20f   : > { %v771_v39 = vpop.xlane.xlu0 %770 }
 0x210   : > { %v769_v40 = vpop.xlane.xlu1 %768 }
 0x213   : > { %v775_v41 = vpop.xlane.xlu0 %774 }
 0x214   : > { %v779_v42 = vsel %vm778_vm4, %v769_v40, %v775_v41  ;;  %v777_v43 = vpop.xlane.xlu1 %776 }
 0x215   : > { %v780_v44 = vsel %vm778_vm4, %v771_v39, %v777_v43 }
 0x216   : > { %v2213_v45 = vpack.c.bf16 %v780_v44, %v779_v42 }
 0x218   : > { %2214 = vmatprep.subr.bf16.mxu1 %v2213_v45 }
 0x219   : > { %2216 = vmatpush3.bf16.msra.mxu1 %v2213_v45  ;;  %v765_v45 = vld [vmem:[%s3056_s6 + $0x8] sm:$0xff]  ;;  %s2534_s6 = smov [#allocation2]  }
 0x21a   : > { %s2469_s7 = sshll.u32 %s2534_s6, 4  ;;  %s2470_s7 = int_to_ptr.vmem [resolvable:$false] %s2469_s7 }
 0x21b   : > { %s2471_s27 = scalar_lea.vmem %s2470_s7, 512  ;;  %p2472_p0 = scmp.lt.s32.totalorder %s2957_s29, %s2470_s7 }
 0x21c   : > { %2118 = vmatmul.mubr.msk.f32.vlgmr.msra.gmra.mrb[0].mxu1 %vm781_vm3, %v2737_v46  ;;  %p2473_p1 = scmp.lt.s32.totalorder %s2471_s27, %s2465_s0 }
 0x21d   : > { %2132 = vmatprep.mubr.msk.f32.mxu1 %vm678_vm0, %v764_v29 }
 0x21e   : > { %p2474_p2 = por %p2473_p1, %p2472_p0 }
 0x220   : > { %p2475_p3 = pnand %p2474_p2, %p2468_p13 }
 0x2ef   : > { %v2119_v47 = vpop.f32.mrb[0].mxu1 }
 0x2f0   : > { %v864_v48 = vmul.f32 %v2119_v47, %v2119_v47  ;;  %v854_v49 = vpop.f32.mrb[1].mxu1 }
 0x2f1   : > { %v863_v50 = vmul.f32 %v854_v49, %v854_v49 }
 0x2f2   : > { %869 = vrot.lane.b32.xlu1 %v864_v48, %s2532_s3 }
 0x2f3   : > { %867 = vrot.lane.b32.xlu0 %v863_v50, %s2532_s3 }
 0x2f6   : > { %877 = vperm.xlu1 %2360, %v854_v49  }
 0x2f7   : > { %882 = vperm.xlu0 %2359, %v2119_v47  }
 0x2fa   : > { %905 = vperm.xlu1 %2360, %v760_v51  }
 0x2fb   : > { %2361 = vset.pattern.permute.xlu0 %v2533_v53 }
 0x2fe   : > { %910 = vperm.xlu1 %2360, %v761_v52  }
 0x302   : > { %2363 = vset.pattern.permute.xlu1 %v2533_v53 }
 0x364   : > { %v870_v54 = vpop.permute.xlu1 %869 }
 0x365   : > { %v874_v55 = vsub.f32 %v2119_v47, %v870_v54  ;;  %v868_v56 = vpop.permute.xlu0 %867 }
 0x366   : > { %v873_v57 = vsub.f32 %v854_v49, %v868_v56 }
 0x367   : > { %v888_v58 = vadd.f32 1e-05, %v874_v55 }
 0x368   : > { %v887_v59 = vadd.f32 1e-05, %v873_v57 }
 0x369   : > { %2417 = vrsqrt.f32 %v888_v58 }
 0x36a   : > { %2419 = vrsqrt.f32 %v887_v59 }
 0x373   : > { %v2418_v60 = vpop.eup %2417 }
 0x374   : > { %v2420_v61 = vpop.eup %2419  ;;  %898 = vperm.xlu0 %2361, %v2418_v60  }
 0x375   : > { %893 = vperm.xlu1 %2363, %v2420_v61   ;;  %v878_v0 = vpop.permute.xlu1 %877 }
 0x376   : > { %v883_v2 = vpop.permute.xlu0 %882  ;;  %v885_v5 = vsub.f32 %v2717_v35, %v878_v0 }
 0x377   : > { %v886_v4 = vsub.f32 %v2715_v33, %v883_v2 }
 0x378   : > { %2362 = vset.pattern.permute.xlu0 %v2531_v8 }
 0x379   : > { %917 = vperm.xlu0 %2362, %v762_v62   ;;  %2364 = vset.pattern.permute.xlu1 %v2531_v8  ;;  %v906_v1 = vpop.permute.xlu1 %905 }
 0x37a   : > { %922 = vperm.xlu1 %2364, %v763_v63  }
 0x37d   : > { %v911_v3 = vpop.permute.xlu1 %910 }
 0x3f3   : > { %v899_v6 = vpop.permute.xlu0 %898 }
 0x3f4   : > { %v902_v7 = vmul.f32 %v899_v6, %v886_v4  ;;  %v894_v9 = vpop.permute.xlu1 %893  ;;  %v1051_v4 = vld [vmem:[%s3014_s8 + $0x8] sm:$0xff] }
 0x3f5   : > { %v901_v10 = vmul.f32 %v894_v9, %v885_v5 }
 0x3f6   : > { %v914_v13 = vmul.f32 %v911_v3, %v902_v7  ;;  %v1050_v3 = vld [vmem:[%s3014_s8] sm:$0xff] }
 0x3f7   : > { %v913_v11 = vmul.f32 %v906_v1, %v901_v10 }
 0x3f8   : > { %v918_v12 = vpop.permute.xlu0 %917 }
 0x3f9   : > { %v925_v14 = vadd.f32 %v918_v12, %v913_v11  ;;  %v923_v15 = vpop.permute.xlu1 %922 }
 0x3fa   : > { %v926_v16 = vadd.f32 %v923_v15, %v914_v13  ;;  %v1053_v15 = vld [vmem:[%s3015_s9 + $0x8] sm:$0xff] }
 0x3fb   : > { %v1989_v17 = vmul.f32 -1.442695, %v925_v14 }
 0x3fc   : > { %v1990_v18 = vmul.f32 -1.442695, %v926_v16 }
 0x3fd   : > { %2421 = vpow2.f32 %v1989_v17 }
 0x3fe   : > { %2423 = vpow2.f32 %v1990_v18 }
 0x407   : > { %v2422_v19 = vpop.eup %2421 }
 0x408   : > { %v2424_v20 = vpop.eup %2423  ;;  %v933_v21 = vadd.f32 1.0, %v2422_v19 }
 0x409   : > { %v934_v22 = vadd.f32 1.0, %v2424_v20 }
 0x40a   : > { %2425 = vrcp.f32 %v933_v21 }
 0x40b   : > { %2427 = vrcp.f32 %v934_v22 }
 0x414   : > { %v2426_v23 = vpop.eup %2425 }
 0x415   : > { %v2428_v24 = vpop.eup %2427  ;;  %v939_v25 = vmul.f32 %v2426_v23, %v925_v14  ;;  %v1052_v14 = vld [vmem:[%s3015_s9] sm:$0xff] }
 0x416   : > { %v940_v26 = vmul.f32 %v2428_v24, %v926_v16 }
 0x418   : > { %v2370_v27 = vpack.i.bf16 %v940_v26, %v939_v25  ;;  %v2223_v28 = vpack.c.bf16 %v940_v26, %v939_v25 }
 0x41a   : > { %2371 = vrot.lane.b32.xlu0 %v2370_v27, %s2530_s23  ;;  %2366 = vrot.lane.b32.xlu1 %v2370_v27, %s2532_s3 }
 0x41e   : > { %966 = vperm.xlu0 %2362, %v767_v30   ;;  %961 = vperm.xlu1 %2364, %v766_v31  }
 0x48c   : > { %v2367_v32 = vpop.permute.xlu1 %2366  ;;  %v2372_v37 = vpop.permute.xlu0 %2371 }
 0x48d   : > { %v2369_v34 = vunpack.i.h.bf16 %v2367_v32  ;;  %v2368_v36 = vunpack.i.l.bf16 %v2367_v32  ;;  %v2374_v41 = vunpack.i.h.bf16 %v2372_v37  ;;  %v2373_v42 = vunpack.i.l.bf16 %v2372_v37 }
 0x48f   : > { %v2217_v40 = vpack.c.bf16 %v2369_v34, %v2368_v36  ;;  %v2227_v44 = vpack.c.bf16 %v2374_v41, %v2373_v42 }
 0x491   : > { %2219 = vmatprep.subr.msk.bf16.mxu1 %vm2774_vm6, %v2217_v40 }
 0x492   : > { %2222 = vmatpush3.bf16.msk.msra.mxu1 %vm2774_vm6, %v2217_v40 }
 0x493   : > { %2224 = vmatprep.subr.bf16.mxu1 %v2223_v28 }
 0x496   : > { %2226 = vmatpush3.bf16.msra.mxu1 %v2223_v28 }
 0x497   : > { %2229 = vmatprep.subr.msk.bf16.mxu1 %vm2784_vm7, %v2227_v44 }
 0x49a   : > { %2232 = vmatpush3.bf16.msk.msra.mxu1 %vm2784_vm7, %v2227_v44 }
 0x49d   : > { %2133 = vmatmul.mubr.msk.f32.vlgmr.msra.gmra.mrb[2].mxu1 %vm678_vm0, %v765_v45  ;;  %v967_v47 = vpop.permute.xlu0 %966  ;;  %v962_v49 = vpop.permute.xlu1 %961 }
 0x49e   : > { %2139 = vmatprep.mubr.msk.f32.mxu1 %vm781_vm3, %v2728_v38 }
 0x570   : > { %v2134_v48 = vpop.f32.mrb[2].mxu1 }
 0x571   : > { %v1047_v50 = vadd.f32 %v2134_v48, %v967_v47  ;;  %v1041_v51 = vpop.f32.mrb[3].mxu1 }
 0x572   : > { %v1042_v52 = vadd.f32 %v1041_v51, %v962_v49  ;;  %v1057_v51 = vld [vmem:[%s3017_s11 + $0x8] sm:$0xff] }
 0x573   : > { %1060 = vadd.xlane.f32.xlu0 %v1047_v50  ;;  %v1063_v55 = vmul.f32 %v1047_v50, %v1047_v50 }
 0x574   : > { %1058 = vadd.xlane.f32.xlu1 %v1042_v52  ;;  %v1062_v54 = vmul.f32 %v1042_v52, %v1042_v52 }
 0x577   : > { %1064 = vadd.xlane.f32.xlu0 %v1062_v54 }
 0x578   : > { %1066 = vadd.xlane.f32.xlu1 %v1063_v55 }
 0x600   : > { %v1061_v56 = vpop.xlane.xlu0 %1060 }
 0x601   : > { %v1059_v57 = vpop.xlane.xlu1 %1058 }
 0x604   : > { %v1065_v58 = vpop.xlane.xlu0 %1064 }
 0x605   : > { %v1068_v59 = vsel %vm778_vm4, %v1059_v57, %v1065_v58  ;;  %v1067_v60 = vpop.xlane.xlu1 %1066 }
 0x606   : > { %v1069_v61 = vsel %vm778_vm4, %v1061_v56, %v1067_v60 }
 0x607   : > { %v2233_v62 = vpack.c.bf16 %v1069_v61, %v1068_v59 }
 0x609   : > { %2234 = vmatprep.subr.bf16.mxu1 %v2233_v62 }
 0x60a   : > { %2236 = vmatpush3.bf16.msra.mxu1 %v2233_v62  ;;  %v1055_v62 = vld [vmem:[%s3016_s10 + $0x8] sm:$0xff] }
 0x60d   : > { %2140 = vmatmul.mubr.msk.f32.vlgmr.msra.gmra.mrb[4].mxu1 %vm781_vm3, %v2737_v46 }
 0x60e   : > { %2161 = vmatprep.mubr.msk.f32.mxu1 %vm781_vm3, %v2728_v38 }
 0x6e0   : > { %v2141_v63 = vpop.f32.mrb[4].mxu1 }
 0x6e1   : > { %v1146_v0 = vmul.f32 %v2141_v63, %v2141_v63  ;;  %v1136_v1 = vpop.f32.mrb[5].mxu1 }
 0x6e2   : > { %v1145_v2 = vmul.f32 %v1136_v1, %v1136_v1 }
 0x6e3   : > { %1151 = vrot.lane.b32.xlu1 %v1146_v0, %s2532_s3 }
 0x6e4   : > { %1149 = vrot.lane.b32.xlu0 %v1145_v2, %s2532_s3 }
 0x6e7   : > { %1159 = vperm.xlu1 %2364, %v1136_v1  }
 0x6e8   : > { %1164 = vperm.xlu0 %2362, %v2141_v63  }
 0x6eb   : > { %1187 = vperm.xlu1 %2364, %v1050_v3  }
 0x6ec   : > { %2375 = vset.pattern.permute.xlu0 %v2533_v53 }
 0x6ef   : > { %1192 = vperm.xlu1 %2364, %v1051_v4  }
 0x6f3   : > { %2377 = vset.pattern.permute.xlu1 %v2533_v53 }
 0x755   : > { %v1152_v5 = vpop.permute.xlu1 %1151 }
 0x756   : > { %v1156_v6 = vsub.f32 %v2141_v63, %v1152_v5  ;;  %v1150_v7 = vpop.permute.xlu0 %1149 }
 0x757   : > { %v1155_v9 = vsub.f32 %v1136_v1, %v1150_v7 }
 0x758   : > { %v1170_v10 = vadd.f32 1e-05, %v1156_v6 }
 0x759   : > { %v1169_v11 = vadd.f32 1e-05, %v1155_v9 }
 0x75a   : > { %2429 = vrsqrt.f32 %v1170_v10 }
 0x75b   : > { %2431 = vrsqrt.f32 %v1169_v11 }
 0x764   : > { %v2430_v12 = vpop.eup %2429 }
 0x765   : > { %v2432_v13 = vpop.eup %2431  ;;  %1180 = vperm.xlu0 %2375, %v2430_v12  }
 0x766   : > { %1175 = vperm.xlu1 %2377, %v2432_v13   ;;  %v1160_v16 = vpop.permute.xlu1 %1159 }
 0x767   : > { %v1165_v18 = vpop.permute.xlu0 %1164  ;;  %v1167_v21 = vsub.f32 %v1042_v52, %v1160_v16  ;;  %v1056_v52 = vld [vmem:[%s3017_s11] sm:$0xff] }
 0x768   : > { %v1168_v20 = vsub.f32 %v1047_v50, %v1165_v18  ;;  %v1054_v50 = vld [vmem:[%s3016_s10] sm:$0xff] }
 0x769   : > { %2376 = vset.pattern.permute.xlu0 %v2531_v8  ;;  %2154 = vmatprep.mubr.msk.f32.mxu0 %vm678_vm0, %v1054_v50  ;;  %v1334_v18 = vld [vmem:[%s3018_s12] sm:$0xff] }
 0x76a   : > { %1199 = vperm.xlu0 %2376, %v1052_v14   ;;  %2378 = vset.pattern.permute.xlu1 %v2531_v8  ;;  %v1188_v17 = vpop.permute.xlu1 %1187 }
 0x76b   : > { %1204 = vperm.xlu1 %2378, %v1053_v15  }
 0x76e   : > { %v1193_v19 = vpop.permute.xlu1 %1192 }
 0x7e4   : > { %v1181_v22 = vpop.permute.xlu0 %1180 }
 0x7e5   : > { %v1184_v23 = vmul.f32 %v1181_v22, %v1168_v20  ;;  %v1176_v24 = vpop.permute.xlu1 %1175 }
 0x7e6   : > { %v1183_v25 = vmul.f32 %v1176_v24, %v1167_v21 }
 0x7e7   : > { %v1196_v28 = vmul.f32 %v1193_v19, %v1184_v23  ;;  %v1335_v19 = vld [vmem:[%s3018_s12 + $0x8] sm:$0xff] }
 0x7e8   : > { %v1195_v26 = vmul.f32 %v1188_v17, %v1183_v25 }
 0x7e9   : > { %v1200_v27 = vpop.permute.xlu0 %1199 }
 0x7ea   : > { %v1207_v29 = vadd.f32 %v1200_v27, %v1195_v26  ;;  %v1205_v30 = vpop.permute.xlu1 %1204 }
 0x7eb   : > { %v1208_v31 = vadd.f32 %v1205_v30, %v1196_v28  ;;  %v1336_v28 = vld [vmem:[%s3019_s13] sm:$0xff] }
 0x7ec   : > { %v2001_v32 = vmul.f32 -1.442695, %v1207_v29 }
 0x7ed   : > { %v2002_v34 = vmul.f32 -1.442695, %v1208_v31 }
 0x7ee   : > { %2433 = vpow2.f32 %v2001_v32 }
 0x7ef   : > { %2435 = vpow2.f32 %v2002_v34 }
 0x7f8   : > { %v2434_v36 = vpop.eup %2433 }
 0x7f9   : > { %v2436_v37 = vpop.eup %2435  ;;  %v1215_v40 = vadd.f32 1.0, %v2434_v36 }
 0x7fa   : > { %v1216_v41 = vadd.f32 1.0, %v2436_v37 }
 0x7fb   : > { %2437 = vrcp.f32 %v1215_v40 }
 0x7fc   : > { %2439 = vrcp.f32 %v1216_v41 }
 0x805   : > { %v2438_v42 = vpop.eup %2437 }
 0x806   : > { %v2440_v44 = vpop.eup %2439  ;;  %v1221_v45 = vmul.f32 %v2438_v42, %v1207_v29  ;;  %v1337_v29 = vld [vmem:[%s3019_s13 + $0x8] sm:$0xff] }
 0x807   : > { %v1222_v47 = vmul.f32 %v2440_v44, %v1208_v31 }
 0x809   : > { %v2384_v48 = vpack.i.bf16 %v1222_v47, %v1221_v45  ;;  %v2243_v49 = vpack.c.bf16 %v1222_v47, %v1221_v45 }
 0x80b   : > { %2385 = vrot.lane.b32.xlu0 %v2384_v48, %s2530_s23  ;;  %2380 = vrot.lane.b32.xlu1 %v2384_v48, %s2532_s3 }
 0x80f   : > { %1248 = vperm.xlu0 %2376, %v1057_v51   ;;  %1243 = vperm.xlu1 %2378, %v1056_v52  }
 0x87d   : > { %v2381_v54 = vpop.permute.xlu1 %2380  ;;  %v2386_v57 = vpop.permute.xlu0 %2385 }
 0x87e   : > { %v2383_v55 = vunpack.i.h.bf16 %v2381_v54  ;;  %v2382_v56 = vunpack.i.l.bf16 %v2381_v54  ;;  %v2388_v59 = vunpack.i.h.bf16 %v2386_v57  ;;  %v2387_v60 = vunpack.i.l.bf16 %v2386_v57 }
 0x880   : > { %v2237_v58 = vpack.c.bf16 %v2383_v55, %v2382_v56  ;;  %v2247_v61 = vpack.c.bf16 %v2388_v59, %v2387_v60 }
 0x882   : > { %2239 = vmatprep.subr.msk.bf16.mxu0 %vm2774_vm6, %v2237_v58 }
 0x883   : > { %2242 = vmatpush3.bf16.msk.msra.mxu0 %vm2774_vm6, %v2237_v58 }
 0x884   : > { %2244 = vmatprep.subr.bf16.mxu0 %v2243_v49 }
 0x887   : > { %2246 = vmatpush3.bf16.msra.mxu0 %v2243_v49 }
 0x888   : > { %2249 = vmatprep.subr.msk.bf16.mxu0 %vm2784_vm7, %v2247_v61 }
 0x88b   : > { %2252 = vmatpush3.bf16.msk.msra.mxu0 %vm2784_vm7, %v2247_v61 }
 0x88e   : > { %2155 = vmatmul.mubr.msk.f32.vlgmr.msra.gmra.mrb[2].mxu0 %vm678_vm0, %v1055_v62  ;;  %v1249_v63 = vpop.permute.xlu0 %1248  ;;  %v1244_v1 = vpop.permute.xlu1 %1243 }
 0x88f   : > { %2183 = vmatprep.mubr.msk.f32.mxu0 %vm781_vm3, %v2728_v38 }
 0x961   : > { %v2156_v0 = vpop.f32.mrb[2].mxu0 }
 0x962   : > { %v1329_v2 = vadd.f32 %v2156_v0, %v1249_v63  ;;  %v1323_v3 = vpop.f32.mrb[3].mxu0 }
 0x963   : > { %v1324_v4 = vadd.f32 %v1323_v3, %v1244_v1  ;;  %v1338_v1 = vld [vmem:[%s3020_s14] sm:$0xff] }
 0x964   : > { %v2849_v5 = vadd.f32 %v1329_v2, %v2715_v33  ;;  %v1341_v2 = vld [vmem:[%s3021_s15 + $0x8] sm:$0xff]  ;;  %v1340_v3 = vld [vmem:[%s3021_s15] sm:$0xff] }
 0x965   : > { %v2852_v6 = vadd.f32 %v1324_v4, %v2717_v35 }
 0x966   : > { %1344 = vadd.xlane.f32.xlu0 %v2849_v5  ;;  %v1347_v38 = vmul.f32 %v2849_v5, %v2849_v5 }
 0x967   : > { %1342 = vadd.xlane.f32.xlu1 %v2852_v6  ;;  %v1346_v7 = vmul.f32 %v2852_v6, %v2852_v6 }
 0x96a   : > { %1348 = vadd.xlane.f32.xlu0 %v1346_v7 }
 0x96b   : > { %1350 = vadd.xlane.f32.xlu1 %v1347_v38 }
 0x9f3   : > { %v1345_v9 = vpop.xlane.xlu0 %1344 }
 0x9f4   : > { %v1343_v10 = vpop.xlane.xlu1 %1342 }
 0x9f7   : > { %v1349_v11 = vpop.xlane.xlu0 %1348 }
 0x9f8   : > { %v1352_v33 = vsel %vm778_vm4, %v1343_v10, %v1349_v11  ;;  %v1351_v12 = vpop.xlane.xlu1 %1350 }
 0x9f9   : > { %v1353_v35 = vsel %vm778_vm4, %v1345_v9, %v1351_v12 }
 0x9fa   : > { %v2253_v13 = vpack.c.bf16 %v1353_v35, %v1352_v33  ;;  %v1339_v35 = vld [vmem:[%s3020_s14 + $0x8] sm:$0xff] }
 0x9fc   : > { %2254 = vmatprep.subr.bf16.mxu1 %v2253_v13 }
 0x9fd   : > { %2256 = vmatpush3.bf16.msra.mxu1 %v2253_v13 }
 0xa00   : > { %2162 = vmatmul.mubr.msk.f32.vlgmr.msra.gmra.mrb[6].mxu1 %vm781_vm3, %v2737_v46 }
 0xa01   : > { %2176 = vmatprep.mubr.msk.f32.mxu1 %vm678_vm0, %v1338_v1 }
 0xad3   : > { %v2163_v14 = vpop.f32.mrb[6].mxu1 }
 0xad4   : > { %v1430_v15 = vmul.f32 %v2163_v14, %v2163_v14  ;;  %v1420_v16 = vpop.f32.mrb[7].mxu1 }
 0xad5   : > { %v1429_v17 = vmul.f32 %v1420_v16, %v1420_v16 }
 0xad6   : > { %1435 = vrot.lane.b32.xlu1 %v1430_v15, %s2532_s3 }
 0xad7   : > { %1433 = vrot.lane.b32.xlu0 %v1429_v17, %s2532_s3 }
 0xada   : > { %1443 = vperm.xlu1 %2378, %v1420_v16  }
 0xadb   : > { %1448 = vperm.xlu0 %2376, %v2163_v14  }
 0xade   : > { %1471 = vperm.xlu1 %2378, %v1334_v18  }
 0xadf   : > { %2389 = vset.pattern.permute.xlu0 %v2533_v53 }
 0xae2   : > { %1476 = vperm.xlu1 %2378, %v1335_v19  }
 0xae6   : > { %2391 = vset.pattern.permute.xlu1 %v2533_v53 }
 0xb48   : > { %v1436_v20 = vpop.permute.xlu1 %1435 }
 0xb49   : > { %v1440_v21 = vsub.f32 %v2163_v14, %v1436_v20  ;;  %v1434_v22 = vpop.permute.xlu0 %1433 }
 0xb4a   : > { %v1439_v23 = vsub.f32 %v1420_v16, %v1434_v22 }
 0xb4b   : > { %v1454_v24 = vadd.f32 1e-05, %v1440_v21 }
 0xb4c   : > { %v1453_v25 = vadd.f32 1e-05, %v1439_v23 }
 0xb4d   : > { %2441 = vrsqrt.f32 %v1454_v24 }
 0xb4e   : > { %2443 = vrsqrt.f32 %v1453_v25 }
 0xb57   : > { %v2442_v26 = vpop.eup %2441 }
 0xb58   : > { %v2444_v27 = vpop.eup %2443  ;;  %1464 = vperm.xlu0 %2389, %v2442_v26  }
 0xb59   : > { %1459 = vperm.xlu1 %2391, %v2444_v27   ;;  %v1444_v30 = vpop.permute.xlu1 %1443 }
 0xb5a   : > { %v1449_v32 = vpop.permute.xlu0 %1448  ;;  %v1451_v37 = vsub.f32 %v2852_v6, %v1444_v30 }
 0xb5b   : > { %v1452_v36 = vsub.f32 %v2849_v5, %v1449_v32  ;;  %v1616_v32 = vld [vmem:[%s3022_s16] sm:$0xff] }
 0xb5c   : > { %2390 = vset.pattern.permute.xlu0 %v2531_v8 }
 0xb5d   : > { %1483 = vperm.xlu0 %2390, %v1336_v28   ;;  %2392 = vset.pattern.permute.xlu1 %v2531_v8  ;;  %v1472_v31 = vpop.permute.xlu1 %1471 }
 0xb5e   : > { %1488 = vperm.xlu1 %2392, %v1337_v29  }
 0xb61   : > { %v1477_v34 = vpop.permute.xlu1 %1476 }
 0xbd7   : > { %v1465_v40 = vpop.permute.xlu0 %1464 }
 0xbd8   : > { %v1468_v41 = vmul.f32 %v1465_v40, %v1452_v36  ;;  %v1460_v42 = vpop.permute.xlu1 %1459 }
 0xbd9   : > { %v1467_v44 = vmul.f32 %v1460_v42, %v1451_v37 }
 0xbda   : > { %v1480_v48 = vmul.f32 %v1477_v34, %v1468_v41  ;;  %v1617_v34 = vld [vmem:[%s3022_s16 + $0x8] sm:$0xff] }
 0xbdb   : > { %v1479_v45 = vmul.f32 %v1472_v31, %v1467_v44 }
 0xbdc   : > { %v1484_v47 = vpop.permute.xlu0 %1483 }
 0xbdd   : > { %v1491_v49 = vadd.f32 %v1484_v47, %v1479_v45  ;;  %v1489_v50 = vpop.permute.xlu1 %1488  ;;  %v1618_v47 = vld [vmem:[%s3023_s17] sm:$0xff] }
 0xbde   : > { %v1492_v51 = vadd.f32 %v1489_v50, %v1480_v48 }
 0xbdf   : > { %v2013_v52 = vmul.f32 -1.442695, %v1491_v49 }
 0xbe0   : > { %v2014_v54 = vmul.f32 -1.442695, %v1492_v51 }
 0xbe1   : > { %2445 = vpow2.f32 %v2013_v52 }
 0xbe2   : > { %2447 = vpow2.f32 %v2014_v54 }
 0xbeb   : > { %v2446_v55 = vpop.eup %2445 }
 0xbec   : > { %v2448_v56 = vpop.eup %2447  ;;  %v1499_v57 = vadd.f32 1.0, %v2446_v55 }
 0xbed   : > { %v1500_v58 = vadd.f32 1.0, %v2448_v56 }
 0xbee   : > { %2449 = vrcp.f32 %v1499_v57 }
 0xbef   : > { %2451 = vrcp.f32 %v1500_v58 }
 0xbf8   : > { %v2450_v59 = vpop.eup %2449 }
 0xbf9   : > { %v2452_v60 = vpop.eup %2451  ;;  %v1505_v61 = vmul.f32 %v2450_v59, %v1491_v49 }
 0xbfa   : > { %v1506_v62 = vmul.f32 %v2452_v60, %v1492_v51 }
 0xbfc   : > { %v2398_v63 = vpack.i.bf16 %v1506_v62, %v1505_v61  ;;  %v2263_v0 = vpack.c.bf16 %v1506_v62, %v1505_v61 }
 0xbfe   : > { %2399 = vrot.lane.b32.xlu0 %v2398_v63, %s2530_s23  ;;  %2394 = vrot.lane.b32.xlu1 %v2398_v63, %s2532_s3 }
 0xc02   : > { %1532 = vperm.xlu0 %2390, %v1341_v2   ;;  %1527 = vperm.xlu1 %2392, %v1340_v3  }
 0xc70   : > { %v2395_v4 = vpop.permute.xlu1 %2394  ;;  %v2400_v9 = vpop.permute.xlu0 %2399 }
 0xc71   : > { %v2397_v7 = vunpack.i.h.bf16 %v2395_v4  ;;  %v2396_v38 = vunpack.i.l.bf16 %v2395_v4  ;;  %v2402_v11 = vunpack.i.h.bf16 %v2400_v9  ;;  %v2401_v33 = vunpack.i.l.bf16 %v2400_v9 }
 0xc73   : > { %v2257_v10 = vpack.c.bf16 %v2397_v7, %v2396_v38  ;;  %v2267_v12 = vpack.c.bf16 %v2402_v11, %v2401_v33 }
 0xc75   : > { %2259 = vmatprep.subr.msk.bf16.mxu1 %vm2774_vm6, %v2257_v10 }
 0xc76   : > { %2262 = vmatpush3.bf16.msk.msra.mxu1 %vm2774_vm6, %v2257_v10 }
 0xc77   : > { %2264 = vmatprep.subr.bf16.mxu1 %v2263_v0 }
 0xc7a   : > { %2266 = vmatpush3.bf16.msra.mxu1 %v2263_v0 }
 0xc7b   : > { %2269 = vmatprep.subr.msk.bf16.mxu1 %vm2784_vm7, %v2267_v12 }
 0xc7e   : > { %2272 = vmatpush3.bf16.msk.msra.mxu1 %vm2784_vm7, %v2267_v12 }
 0xc81   : > { %2177 = vmatmul.mubr.msk.f32.vlgmr.msra.gmra.mrb[8].mxu1 %vm678_vm0, %v1339_v35  ;;  %v1533_v13 = vpop.permute.xlu0 %1532  ;;  %v1528_v15 = vpop.permute.xlu1 %1527  ;;  %v1620_v35 = vld [vmem:[%s3024_s18] sm:$0xff] }
 0xd54   : > { %v2178_v14 = vpop.f32.mrb[8].mxu1 }
 0xd55   : > { %v1613_v16 = vadd.f32 %v2178_v14, %v1533_v13  ;;  %v1607_v17 = vpop.f32.mrb[9].mxu1  ;;  %v1623_v13 = vld [vmem:[%s3025_s19 + $0x8] sm:$0xff]  ;;  %v1622_v14 = vld [vmem:[%s3025_s19] sm:$0xff] }
 0xd56   : > { %v1608_v18 = vadd.f32 %v1607_v17, %v1528_v15 }
 0xd57   : > { %1626 = vadd.xlane.f32.xlu0 %v1613_v16  ;;  %v1629_v20 = vmul.f32 %v1613_v16, %v1613_v16 }
 0xd58   : > { %1624 = vadd.xlane.f32.xlu1 %v1608_v18  ;;  %v1628_v19 = vmul.f32 %v1608_v18, %v1608_v18 }
 0xd5b   : > { %1630 = vadd.xlane.f32.xlu0 %v1628_v19 }
 0xd5c   : > { %1632 = vadd.xlane.f32.xlu1 %v1629_v20 }
 0xde4   : > { %v1627_v21 = vpop.xlane.xlu0 %1626 }
 0xde5   : > { %v1625_v22 = vpop.xlane.xlu1 %1624 }
 0xde8   : > { %v1631_v23 = vpop.xlane.xlu0 %1630 }
 0xde9   : > { %v1634_v24 = vsel %vm778_vm4, %v1625_v22, %v1631_v23  ;;  %v1633_v25 = vpop.xlane.xlu1 %1632  ;;  %v1621_v23 = vld [vmem:[%s3024_s18 + $0x8] sm:$0xff] }
 0xdea   : > { %v1635_v26 = vsel %vm778_vm4, %v1627_v21, %v1633_v25 }
 0xdeb   : > { %v2273_v27 = vpack.c.bf16 %v1635_v26, %v1634_v24 }
 0xded   : > { %2274 = vmatprep.subr.bf16.mxu0 %v2273_v27 }
 0xdee   : > { %2276 = vmatpush3.bf16.msra.mxu0 %v2273_v27 }
 0xdf1   : > { %2184 = vmatmul.mubr.msk.f32.vlgmr.msra.gmra.mrb[4].mxu0 %vm781_vm3, %v2737_v46 }
 0xdf2   : > { %2198 = vmatprep.mubr.msk.f32.mxu0 %vm678_vm0, %v1620_v35 }
 0xec4   : > { %v2185_v28 = vpop.f32.mrb[4].mxu0 }
 0xec5   : > { %v1712_v29 = vmul.f32 %v2185_v28, %v2185_v28  ;;  %v1702_v30 = vpop.f32.mrb[5].mxu0 }
 0xec6   : > { %v1711_v31 = vmul.f32 %v1702_v30, %v1702_v30 }
 0xec7   : > { %1717 = vrot.lane.b32.xlu1 %v1712_v29, %s2532_s3 }
 0xec8   : > { %1715 = vrot.lane.b32.xlu0 %v1711_v31, %s2532_s3 }
 0xecb   : > { %1725 = vperm.xlu1 %2392, %v1702_v30  }
 0xecc   : > { %1730 = vperm.xlu0 %2390, %v2185_v28  }
 0xecf   : > { %1753 = vperm.xlu1 %2392, %v1616_v32  }
 0xed0   : > { %2403 = vset.pattern.permute.xlu0 %v2533_v53 }
 0xed3   : > { %1758 = vperm.xlu1 %2392, %v1617_v34  }
 0xed7   : > { %2405 = vset.pattern.permute.xlu1 %v2533_v53  ;;  %v1619_v53 = vld [vmem:[%s3023_s17 + $0x8] sm:$0xff] }
 0xf39   : > { %v1718_v46 = vpop.permute.xlu1 %1717 }
 0xf3a   : > { %v1722_v36 = vsub.f32 %v2185_v28, %v1718_v46  ;;  %v1716_v37 = vpop.permute.xlu0 %1715 }
 0xf3b   : > { %v1721_v40 = vsub.f32 %v1702_v30, %v1716_v37 }
 0xf3c   : > { %v1736_v41 = vadd.f32 1e-05, %v1722_v36 }
 0xf3d   : > { %v1735_v42 = vadd.f32 1e-05, %v1721_v40 }
 0xf3e   : > { %2453 = vrsqrt.f32 %v1736_v41 }
 0xf3f   : > { %2455 = vrsqrt.f32 %v1735_v42 }
 0xf48   : > { %v2454_v44 = vpop.eup %2453 }
 0xf49   : > { %v2456_v45 = vpop.eup %2455  ;;  %1746 = vperm.xlu0 %2403, %v2454_v44  }
 0xf4a   : > { %1741 = vperm.xlu1 %2405, %v2456_v45   ;;  %v1726_v48 = vpop.permute.xlu1 %1725 }
 0xf4b   : > { %v1731_v50 = vpop.permute.xlu0 %1730  ;;  %v1733_v54 = vsub.f32 %v1608_v18, %v1726_v48 }
 0xf4c   : > { %v1734_v52 = vsub.f32 %v1613_v16, %v1731_v50 }
 0xf4d   : > { %2404 = vset.pattern.permute.xlu0 %v2531_v8 }
 0xf4e   : > { %1765 = vperm.xlu0 %2404, %v1618_v47   ;;  %2406 = vset.pattern.permute.xlu1 %v2531_v8  ;;  %v1754_v49 = vpop.permute.xlu1 %1753 }
 0xf4f   : > { %1770 = vperm.xlu1 %2406, %v1619_v53  }
 0xf52   : > { %v1759_v51 = vpop.permute.xlu1 %1758 }
 0xfc8   : > { %v1747_v55 = vpop.permute.xlu0 %1746 }
 0xfc9   : > { %v1750_v56 = vmul.f32 %v1747_v55, %v1734_v52  ;;  %v1742_v57 = vpop.permute.xlu1 %1741 }
 0xfca   : > { %v1749_v58 = vmul.f32 %v1742_v57, %v1733_v54 }
 0xfcb   : > { %v1762_v61 = vmul.f32 %v1759_v51, %v1750_v56 }
 0xfcc   : > { %v1761_v59 = vmul.f32 %v1754_v49, %v1749_v58 }
 0xfcd   : > { %v1766_v60 = vpop.permute.xlu0 %1765 }
 0xfce   : > { %v1773_v62 = vadd.f32 %v1766_v60, %v1761_v59  ;;  %v1771_v63 = vpop.permute.xlu1 %1770 }
 0xfcf   : > { %v1774_v0 = vadd.f32 %v1771_v63, %v1762_v61 }
 0xfd0   : > { %v2025_v1 = vmul.f32 -1.442695, %v1773_v62 }
 0xfd1   : > { %v2026_v2 = vmul.f32 -1.442695, %v1774_v0 }
 0xfd2   : > { %2457 = vpow2.f32 %v2025_v1 }
 0xfd3   : > { %2459 = vpow2.f32 %v2026_v2 }
 0xfdc   : > { %v2458_v8 = vpop.eup %2457 }
 0xfdd   : > { %v2460_v3 = vpop.eup %2459  ;;  %v1781_v4 = vadd.f32 1.0, %v2458_v8 }
 0xfde   : > { %v1782_v7 = vadd.f32 1.0, %v2460_v3 }
 0xfdf   : > { %2461 = vrcp.f32 %v1781_v4 }
 0xfe0   : > { %2463 = vrcp.f32 %v1782_v7 }
 0xfe9   : > { %v2462_v38 = vpop.eup %2461 }
 0xfea   : > { %v2464_v9 = vpop.eup %2463  ;;  %v1787_v10 = vmul.f32 %v2462_v38, %v1773_v62 }
 0xfeb   : > { %v1788_v11 = vmul.f32 %v2464_v9, %v1774_v0 }
 0xfed   : > { %v2412_v33 = vpack.i.bf16 %v1788_v11, %v1787_v10  ;;  %v2283_v12 = vpack.c.bf16 %v1788_v11, %v1787_v10 }
 0xfef   : > { %2413 = vrot.lane.b32.xlu0 %v2412_v33, %s2530_s23  ;;  %2408 = vrot.lane.b32.xlu1 %v2412_v33, %s2532_s3  ;;  %s2962_s3 = scalar_lea.hbm %s3026_s20, %s2041_s26 }
 0xff3   : > { %1814 = vperm.xlu0 %2404, %v1623_v13   ;;  %1809 = vperm.xlu1 %2406, %v1622_v14  }
0x1061   : > { %v2409_v15 = vpop.permute.xlu1 %2408  ;;  %v2414_v18 = vpop.permute.xlu0 %2413 }
0x1062   : > { %v2411_v16 = vunpack.i.h.bf16 %v2409_v15  ;;  %v2410_v17 = vunpack.i.l.bf16 %v2409_v15  ;;  %v2416_v20 = vunpack.i.h.bf16 %v2414_v18  ;;  %v2415_v21 = vunpack.i.l.bf16 %v2414_v18 }
0x1064   : > { %v2277_v19 = vpack.c.bf16 %v2411_v16, %v2410_v17  ;;  %v2287_v22 = vpack.c.bf16 %v2416_v20, %v2415_v21 }
0x1066   : > { %2279 = vmatprep.subr.msk.bf16.mxu0 %vm2774_vm6, %v2277_v19 }
0x1067   : > { %2282 = vmatpush3.bf16.msk.msra.mxu0 %vm2774_vm6, %v2277_v19 }
0x1068   : > { %2284 = vmatprep.subr.bf16.mxu0 %v2283_v12 }
0x106b   : > { %2286 = vmatpush3.bf16.msra.mxu0 %v2283_v12 }
0x106c   : > { %2289 = vmatprep.subr.msk.bf16.mxu0 %vm2784_vm7, %v2287_v22 }
0x106f   : > { %2292 = vmatpush3.bf16.msk.msra.mxu0 %vm2784_vm7, %v2287_v22 }
0x1072   : > { %2199 = vmatmul.mubr.msk.f32.vlgmr.msra.gmra.mrb[6].mxu0 %vm678_vm0, %v1621_v23  ;;  %v1815_v24 = vpop.permute.xlu0 %1814  ;;  %v1810_v25 = vpop.permute.xlu1 %1809 }
0x1145   : > { %v2200_v39 = vpop.f32.mrb[6].mxu0 }
0x1146   : > { %v1895_v26 = vadd.f32 %v2200_v39, %v1815_v24  ;;  %v1889_v27 = vpop.f32.mrb[7].mxu0 }
0x1147   : > { %v1890_v28 = vadd.f32 %v1889_v27, %v1810_v25 }
0x1148   : > { %v1899_v43 = vadd.f32 %v1895_v26, %v2849_v5 }
0x1149   : > { %v1898_v29 = vadd.f32 %v1890_v28, %v2852_v6 }
0x114a   : > { %1901 = vst [vmem:[%s622_s28 + $0x8] sm:$0xff] %v1899_v43 }
0x114b   : > { %1900 = vst [vmem:[%s622_s28] sm:$0xff] %v1898_v29 }
0x114c   : > { %2478 = shalt.err (!%p2475_p3)
}
0x114d   : > { %s2479_s5 = scalar_lea.hbm %s2962_s3, 256  ;;  %s2483_s6 = scalar_lea.hbm %s3026_s20, 512 }
0x114e   : > { %p2480_p4 = scmp.ne.s32.totalorder %s2962_s3, %s2479_s5  ;;  %p2484_p9 = scmp.lt.u32.totalorder %s2962_s3, %s3026_s20 }
0x114f   : > { %p2485_p10 = scmp.lt.u32.totalorder %s2483_s6, %s2479_s5  ;;  %p2487_p12 = scmp.lt.u32.totalorder %s2479_s5, %s2962_s3 }
0x1150   : > { %p2481_p7 = pnand %p2480_p4, %p2680_p5 }
0x1151   : > { %p2486_p11 = por %p2485_p10, %p2484_p9 }
0x1152   : > { %p2482_p8 = pneg %p2481_p7 }
0x1153   : > { %p2488_p13 = por %p2487_p12, %p2486_p11 }
0x1155   : > { %p2489_p0 = pnand %p2488_p13, %p2482_p8 }
0x1157   : > { %2492 = shalt.err (!%p2489_p0)
}
0x1158   : > { %s2535_s0 = smov 128   ;;  %s2536_s27 = smov 8  }
0x1159   : > { %2293 = dma.vmem_to_hbm [thread:$0]  (%p2680_p5), %s2957_s29, 256, %s2962_s3, %s2965_s2, %s2535_s0, %s2535_s0, %s2536_s27  }
0x115a PF: > { %p2299_p1 = scmp.ge.s32.totalorder %s2527_s24, 2  ;;  %s1931_s26 = sand.u32 1, %s2515_s1  }
0x115b   : > { %s1932_s5 = scalar_lea.sflag [#allocation3], %s1931_s26 }
0x115c   : > { %p2296_p2 = pnand %p2299_p1, %p2684_p6 }
0x115e   : > { %2510 = dma.done.wait (!%p2296_p2), %s1932_s5, 256  }
0x115f   : > { %2512 = vsyncadd (!%p2296_p2), %s1932_s5, 4294967040  ;;  %s3063_s24 = sld [smem:[#allocation6_spill]]  ;;  %s3064_s6 = sld [smem:[#allocation5_spill]] }
0x1160   : > { %s3065_s23 = sld [smem:[#allocation7_spill]]  ;;  %s3066_s1 = smov %s2519_s22 }
0x1165   : > { %p30_p3 = scmp.ge.s32.totalorder %s3063_s24, 4   ;;  %s3067_s22 = smov %s3064_s6 }
0x1167   :  { %32 = sbr.rel (!%p30_p3) target bundleno = 12 (0xc), region = 135 }
0x116e   :  { %1937 = vsyncpa [#allocation3], 1 }
0x116f   :  { %1939 = vsyncpa [#allocation3 + $0x1], 1 }

</bundles_post_ra>
